<compile_context>
chip_gen: v7x
topology: tpu7x:2x2x1
jax: 0.10.0
libtpu: 0.0.40
codegen_flags: <defaults>
</compile_context>

<pallas_src>
import jax
import jax.numpy as jnp
from jax.experimental import pallas as pl
from jax.experimental.pallas import tpu as pltpu

# Geometry fixed by the PyTorch module: three k=5, stride-2 convs must end at L=222
# because of nn.Linear(32*222, 3)  =>  input length 1803.
L_IN = 1803
K = 5
C_IN, C1, C2, C3 = 6, 16, 32, 32
L1, L2, L3 = 900, 448, 222            # (1803-5)//2+1, (900-5)//2+1, (448-5)//2+1
NP_IN, NP1, NP2 = 8, 4, 2             # polyphase counts: input / layer-1 out / layer-2 out
VL1, VL2, VL3 = 225, 224, 222         # valid positions per phase per batch (225*4, 224*2, 222)
PITCH = 256                           # per-batch lane pitch (multiple of 128)
TAIL = 128                            # extra zero lanes so shifted (c<=2) slices stay in-bounds
EPS = 1e-5                            # PyTorch BatchNorm1d default

_VMEM = pl.BlockSpec(memory_space=pltpu.MemorySpace.VMEM)


# ----------------------------------------------------------------------------
# Fused kernel
# ----------------------------------------------------------------------------
def _dqn_kernel(xp_ref, wpack_ref, bnp_ref, whr_ref, o_ref,
                stage_ref, a1_ref, a2_ref):
    """Refs:
      xp_ref    (8, 6, B*256+128)  bf16  polyphase input: xp[p,ci,b*256+i] = x[b,ci,8i+p]
      wpack_ref (32, 512)          bf16  packed tap-stacked conv weights:
                                         [0:16,   0: 80] = w1s[o,16t+i] = w1[o,i,t]
                                         [0:32, 128:208] = w2s[o,16t+i] = w2[o,i,t]
                                         [0:32, 256:416] = w3s[o,32t+i] = w3[o,i,t]
      bnp_ref   (32, 8)            f32   cols: g1,be1,g2,be2,g3,be3, head-bias(rows 0:3)
      whr_ref   (3, 32, 256)       f32   head weight reshaped (out, chan, pos), pos padded
      o_ref     (B, 3)             f32   output
      stage_ref (160, B*256)       bf16  tap-stacked RHS staging slab (shared by all layers)
      a1_ref    (4, 16, B*256+128) f32   layer-1 pre-BN conv outputs (phase, chan, b*256+m)
      a2_ref    (2, 32, B*256+128) f32   layer-2 pre-BN conv outputs
    """
    f32, bf16 = jnp.float32, jnp.bfloat16
    batch = o_ref.shape[0]
    ncol = batch * PITCH

    def lane_mask(valid):
        # 1.0 at lanes whose (col % 256) < valid, else 0.0  (pad/garbage columns masked)
        lanes = jax.lax.broadcasted_iota(jnp.int32, (1, ncol), 1)
        return jnp.where((lanes & (PITCH - 1)) < valid, 1.0, 0.0)

    def bn_affine(s1, s2, n, gamma, beta):
        # training-mode batch statistics, biased variance (PyTorch semantics)
        mean = s1 * (1.0 / n)
        var = s2 * (1.0 / n) - mean * mean
        scale = gamma * jax.lax.rsqrt(var + EPS)
        shift = beta - mean * scale
        return scale, shift

    # ---- one-time zero init (layer-1 pad rows of the staging slab; shifted-read tails)
    stage_ref[0:K * C1, :] = jnp.zeros((K * C1, ncol), bf16)
    for q in range(NP1):
        a1_ref[q, :, ncol:] = jnp.zeros((C1, TAIL), f32)
    for r in range(NP2):
        a2_ref[r, :, ncol:] = jnp.zeros((C2, TAIL), f32)

    # ---- unpack parameters (tiny, hoisted) ----------------------------------
    w1s = wpack_ref[0:C1, 0:K * C1]             # (16, 80)  bf16
    w2s = wpack_ref[:, 128:128 + K * C1]        # (32, 80)  bf16
    w3s = wpack_ref[:, 256:256 + K * C2]        # (32, 160) bf16
    g1, be1 = bnp_ref[0:C1, 0:1], bnp_ref[0:C1, 1:2]
    g2, be2 = bnp_ref[:, 2:3], bnp_ref[:, 3:4]
    g3, be3 = bnp_ref[:, 4:5], bnp_ref[:, 5:6]

    # ---- layer 1: conv(6 -> 16), stats --------------------------------------
    mask1 = lane_mask(VL1)
    s1 = jnp.zeros((C1, 1), f32)
    s2 = jnp.zeros((C1, 1), f32)
    for q in range(NP1):                        # output position l1 = 4*m + q
        for t in range(K):                      # input position = 8*(m+c) + p
            s = 2 * q + t
            p, c = s % NP_IN, s // NP_IN
            stage_ref[C1 * t:C1 * t + C_IN, :] = xp_ref[p, :, c:c + ncol]
        z = jnp.dot(w1s, stage_ref[0:K * C1, :], preferred_element_type=f32)  # (16, ncol)
        zm = z * mask1
        s1 = s1 + jnp.sum(zm, axis=1, keepdims=True)
        s2 = s2 + jnp.sum(zm * zm, axis=1, keepdims=True)
        a1_ref[q, :, 0:ncol] = zm
    scale1, shift1 = bn_affine(s1, s2, float(batch * L1), g1, be1)

    # ---- layer 2: conv(16 -> 32); layer-1 BN+ReLU fused into staging --------
    mask2 = lane_mask(VL2)
    s1 = jnp.zeros((C2, 1), f32)
    s2 = jnp.zeros((C2, 1), f32)
    for r in range(NP2):                        # output position l2 = 2*n + r
        for t in range(K):                      # layer-1 position = 4*(n+c) + q
            s = 2 * r + t
            q, c = s % NP1, s // NP1
            y = jnp.maximum(a1_ref[q, :, c:c + ncol] * scale1 + shift1, 0.0)
            stage_ref[C1 * t:C1 * (t + 1), :] = y.astype(bf16)
        z = jnp.dot(w2s, stage_ref[0:K * C1, :], preferred_element_type=f32)  # (32, ncol)
        zm = z * mask2
        s1 = s1 + jnp.sum(zm, axis=1, keepdims=True)
        s2 = s2 + jnp.sum(zm * zm, axis=1, keepdims=True)
        a2_ref[r, :, 0:ncol] = zm
    scale2, shift2 = bn_affine(s1, s2, float(batch * L2), g2, be2)

    # ---- layer 3: conv(32 -> 32); layer-2 BN+ReLU fused into staging --------
    mask3 = lane_mask(VL3)
    for t in range(K):                          # layer-2 position = 2*(l3+c) + r
        r, c = t % NP2, t // NP2
        y = jnp.maximum(a2_ref[r, :, c:c + ncol] * scale2 + shift2, 0.0)
        stage_ref[C2 * t:C2 * (t + 1), :] = y.astype(bf16)
    z = jnp.dot(w3s, stage_ref[0:K * C2, :], preferred_element_type=f32)       # (32, ncol)
    zm = z * mask3
    s1 = jnp.sum(zm, axis=1, keepdims=True)
    s2 = jnp.sum(zm * zm, axis=1, keepdims=True)
    scale3, shift3 = bn_affine(s1, s2, float(batch * L3), g3, be3)
    y3 = jnp.maximum(zm * scale3 + shift3, 0.0)                                # (32, ncol) f32

    # ---- head: Linear(32*222 -> 3) as multiply + full reduce (no feats scatter)
    # PyTorch x.view(B,-1) flattening is channel-major, matched by whr[j, ch, l].
    for j in range(3):
        wj = whr_ref[j]                          # (32, 256) f32, zero-padded beyond l=222
        bias_j = bnp_ref[j:j + 1, 6:7]           # (1, 1)
        for b in range(batch):
            prod = y3[:, b * PITCH:(b + 1) * PITCH] * wj
            val = jnp.sum(jnp.sum(prod, axis=1, keepdims=True), axis=0, keepdims=True)
            o_ref[b:b + 1, j:j + 1] = val + bias_j


# ----------------------------------------------------------------------------
# Wrapper
# ----------------------------------------------------------------------------
def dqn_forward(kparams, x):
    """x: (B, 6, 1803) float32, NCL layout (as in the PyTorch module). Returns (B, 3)."""
    batch = x.shape[0]
    assert x.shape[1:] == (C_IN, L_IN), x.shape
    ncol = batch * PITCH

    # One cheap layout-plumbing step on the ~86 KB input: pad length 1803 -> 2048 and
    # split into 8 polyphase components with a 128-aligned per-batch pitch of 256, so
    # every stride-2 tap inside the kernel is a contiguous, (almost always) aligned slice.
    #   xp[p, ci, b*256 + i] = x[b, ci, 8*i + p]    (zeros elsewhere)
    x_pad = jnp.pad(x, ((0, 0), (0, 0), (0, NP_IN * PITCH - L_IN)))
    xp = x_pad.reshape(batch, C_IN, PITCH, NP_IN)
    xp = jnp.transpose(xp, (3, 1, 0, 2)).reshape(NP_IN, C_IN, ncol)
    xp = jnp.pad(xp, ((0, 0), (0, 0), (0, TAIL))).astype(jnp.bfloat16)

    return pl.pallas_call(
        _dqn_kernel,
        out_shape=jax.ShapeDtypeStruct((batch, 3), jnp.float32),
        in_specs=[_VMEM] * 4,
        out_specs=_VMEM,
        scratch_shapes=[
            pltpu.VMEM((K * C3, ncol), jnp.bfloat16),          # tap-stacked RHS staging
            pltpu.VMEM((NP1, C1, ncol + TAIL), jnp.float32),   # layer-1 pre-BN activations
            pltpu.VMEM((NP2, C2, ncol + TAIL), jnp.float32),   # layer-2 pre-BN activations
        ],
    )(xp, kparams["wpack"], kparams["bnp"], kparams["whr"])


# ----------------------------------------------------------------------------
# Parameters (PyTorch layout) + one-time kernel-ready preparation
# ----------------------------------------------------------------------------
def make_params(key):
    """Deterministic synthetic parameters in PyTorch layouts.

    NOTE: Conv1d biases are omitted on purpose: each conv is immediately followed by
    training-mode BatchNorm, whose per-channel mean subtraction cancels a per-channel
    bias exactly, so it cannot affect the forward output (dead work removed)."""
    keys = jax.random.split(key, 10)

    def conv_w(k, c_out, c_in):
        bound = 1.0 / jnp.sqrt(c_in * K)
        return jax.random.uniform(k, (c_out, c_in, K), jnp.float32, -bound, bound)

    def vec(k, n, lo, hi):
        return jax.random.uniform(k, (n,), jnp.float32, lo, hi)

    p = {}
    p["w1"], p["g1"], p["be1"] = conv_w(keys[0], C1, C_IN), vec(keys[1], C1, 0.8, 1.2), vec(keys[2], C1, -0.1, 0.1)
    p["w2"], p["g2"], p["be2"] = conv_w(keys[3], C2, C1), vec(keys[4], C2, 0.8, 1.2), vec(keys[5], C2, -0.1, 0.1)
    p["w3"], p["g3"], p["be3"] = conv_w(keys[6], C3, C2), vec(keys[7], C3, 0.8, 1.2), vec(keys[8], C3, -0.1, 0.1)
    bound = 1.0 / jnp.sqrt(C3 * L3)
    hk1, hk2 = jax.random.split(keys[9])
    p["wh"] = jax.random.uniform(hk1, (3, C3 * L3), jnp.float32, -bound, bound)
    p["bh"] = jax.random.uniform(hk2, (3,), jnp.float32, -bound, bound)
    return p


def prepare_params(p):
    """One-time (outside jit) conversion to kernel-ready packed layouts."""
    f32, bf16 = jnp.float32, jnp.bfloat16

    def stack_taps(w, block):
        # w: (c_out, c_in, K) -> (c_out, K*block) with ws[o, block*t + i] = w[o, i, t]
        c_out, c_in, _ = w.shape
        wpad = jnp.pad(w, ((0, 0), (0, block - c_in), (0, 0)))
        return jnp.transpose(wpad, (0, 2, 1)).reshape(c_out, K * block)

    w1s = stack_taps(p["w1"], C1)        # (16, 80)
    w2s = stack_taps(p["w2"], C1)        # (32, 80)
    w3s = stack_taps(p["w3"], C2)        # (32, 160)
    wpack = jnp.zeros((C3, 512), f32)
    wpack = wpack.at[:C1, 0:K * C1].set(w1s)
    wpack = wpack.at[:, 128:128 + K * C1].set(w2s)
    wpack = wpack.at[:, 256:256 + K * C2].set(w3s)

    bnp = jnp.zeros((C3, 8), f32)
    bnp = bnp.at[:C1, 0].set(p["g1"]).at[:C1, 1].set(p["be1"])
    bnp = bnp.at[:, 2].set(p["g2"]).at[:, 3].set(p["be2"])
    bnp = bnp.at[:, 4].set(p["g3"]).at[:, 5].set(p["be3"])
    bnp = bnp.at[:3, 6].set(p["bh"])

    whr = p["wh"].reshape(3, C3, L3)
    whr = jnp.pad(whr, ((0, 0), (0, 0), (0, PITCH - L3))).astype(f32)

    return {"wpack": wpack.astype(bf16), "bnp": bnp, "whr": whr}


# ----------------------------------------------------------------------------
# Plain-JAX reference (same numerics policy: bf16 MXU inputs, f32 stats, f32 head)
# ----------------------------------------------------------------------------
def dqn_reference(params, x):
    def conv_bn_relu(h, w, gamma, beta):
        k = w.shape[2]
        l_out = (h.shape[2] - k) // 2 + 1
        hb = h.astype(jnp.bfloat16)
        wb = w.astype(jnp.bfloat16)
        z = sum(jnp.einsum("oi,bil->bol", wb[:, :, t],
                           hb[:, :, t:t + 2 * (l_out - 1) + 1:2],
                           preferred_element_type=jnp.float32)
                for t in range(k))
        mean = jnp.mean(z, axis=(0, 2), keepdims=True)
        var = jnp.mean((z - mean) ** 2, axis=(0, 2), keepdims=True)
        zh = (z - mean) * jax.lax.rsqrt(var + EPS)
        return jnp.maximum(zh * gamma[None, :, None] + beta[None, :, None], 0.0)

    h = conv_bn_relu(x, params["w1"], params["g1"], params["be1"])
    h = conv_bn_relu(h, params["w2"], params["g2"], params["be2"])
    h = conv_bn_relu(h, params["w3"], params["g3"], params["be3"])
    feats = h.reshape(h.shape[0], -1)
    return feats @ params["wh"].T + params["bh"][None, :]


if __name__ == "__main__":
    key = jax.random.PRNGKey(0)
    pkey, xkey = jax.random.split(key)
    params = make_params(pkey)
    kparams = prepare_params(params)                 # done once, outside jit

    # Input length 1803 so that three stride-2 k=5 convs give L=222 (head needs 32*222).
    x = jax.random.normal(xkey, (2, C_IN, L_IN), dtype=jnp.float32)

    out = jax.block_until_ready(jax.jit(dqn_forward)(kparams, x))
    assert out.shape == (2, 3), out.shape
    assert bool(jnp.all(jnp.isfinite(out)))

    ref = jax.block_until_ready(dqn_reference(params, x))
    err = float(jnp.max(jnp.abs(out - ref)))
    assert err < 1e-2, f"kernel vs reference mismatch: max abs err = {err}"
    print("KERNEL_OK")
</pallas_src>

<mosaic_0001>
module attributes {stable_mosaic.version = 11 : i64} {
  func.func @_dqn_kernel(%arg0: memref<8x6x640xbf16, #tpu.memory_space<vmem>>, %arg1: memref<32x512xbf16, #tpu.memory_space<vmem>>, %arg2: memref<32x8xf32, #tpu.memory_space<vmem>>, %arg3: memref<3x32x256xf32, #tpu.memory_space<vmem>>, %arg4: memref<2x3xf32, #tpu.memory_space<vmem>>, %arg5: memref<160x512xbf16, #tpu.memory_space<vmem>>, %arg6: memref<4x16x640xf32, #tpu.memory_space<vmem>>, %arg7: memref<2x32x640xf32, #tpu.memory_space<vmem>>) attributes {dimension_semantics = [], scalar_prefetch = 0 : i64, scratch_operands = 3 : i64, tpu.core_type = #tpu.core_type<tc>} {
    %cst = arith.constant 0.000000e+00 : bf16
    %0 = vector.broadcast %cst : bf16 to vector<80x512xbf16>
    %c0 = arith.constant 0 : index
    %c0_0 = arith.constant 0 : index
    %1 = vector.load %arg5[%c0, %c0_0] : memref<160x512xbf16, #tpu.memory_space<vmem>>, vector<80x512xbf16>
    tpu.vector_store %arg5[%c0, %c0_0], %0 {strides = array<i32>} : memref<160x512xbf16, #tpu.memory_space<vmem>>, vector<80x512xbf16>,
    %cst_1 = arith.constant 0.000000e+00 : f32
    %2 = vector.broadcast %cst_1 : f32 to vector<16x128xf32>
    %c0_2 = arith.constant 0 : index
    %c0_3 = arith.constant 0 : index
    %c512 = arith.constant 512 : index
    %3 = vector.load %arg6[%c0_2, %c0_3, %c512] : memref<4x16x640xf32, #tpu.memory_space<vmem>>, vector<1x16x128xf32>
    %4 = vector.shape_cast %3 : vector<1x16x128xf32> to vector<16x128xf32>
    %5 = vector.shape_cast %2 : vector<16x128xf32> to vector<1x16x128xf32>
    tpu.vector_store %arg6[%c0_2, %c0_3, %c512], %5 {strides = array<i32>} : memref<4x16x640xf32, #tpu.memory_space<vmem>>, vector<1x16x128xf32>,
    %cst_4 = arith.constant 0.000000e+00 : f32
    %6 = vector.broadcast %cst_4 : f32 to vector<16x128xf32>
    %c1 = arith.constant 1 : index
    %c0_5 = arith.constant 0 : index
    %c512_6 = arith.constant 512 : index
    %7 = vector.load %arg6[%c1, %c0_5, %c512_6] : memref<4x16x640xf32, #tpu.memory_space<vmem>>, vector<1x16x128xf32>
    %8 = vector.shape_cast %7 : vector<1x16x128xf32> to vector<16x128xf32>
    %9 = vector.shape_cast %6 : vector<16x128xf32> to vector<1x16x128xf32>
    tpu.vector_store %arg6[%c1, %c0_5, %c512_6], %9 {strides = array<i32>} : memref<4x16x640xf32, #tpu.memory_space<vmem>>, vector<1x16x128xf32>,
    %cst_7 = arith.constant 0.000000e+00 : f32
    %10 = vector.broadcast %cst_7 : f32 to vector<16x128xf32>
    %c2 = arith.constant 2 : index
    %c0_8 = arith.constant 0 : index
    %c512_9 = arith.constant 512 : index
    %11 = vector.load %arg6[%c2, %c0_8, %c512_9] : memref<4x16x640xf32, #tpu.memory_space<vmem>>, vector<1x16x128xf32>
    %12 = vector.shape_cast %11 : vector<1x16x128xf32> to vector<16x128xf32>
    %13 = vector.shape_cast %10 : vector<16x128xf32> to vector<1x16x128xf32>
    tpu.vector_store %arg6[%c2, %c0_8, %c512_9], %13 {strides = array<i32>} : memref<4x16x640xf32, #tpu.memory_space<vmem>>, vector<1x16x128xf32>,
    %cst_10 = arith.constant 0.000000e+00 : f32
    %14 = vector.broadcast %cst_10 : f32 to vector<16x128xf32>
    %c3 = arith.constant 3 : index
    %c0_11 = arith.constant 0 : index
    %c512_12 = arith.constant 512 : index
    %15 = vector.load %arg6[%c3, %c0_11, %c512_12] : memref<4x16x640xf32, #tpu.memory_space<vmem>>, vector<1x16x128xf32>
    %16 = vector.shape_cast %15 : vector<1x16x128xf32> to vector<16x128xf32>
    %17 = vector.shape_cast %14 : vector<16x128xf32> to vector<1x16x128xf32>
    tpu.vector_store %arg6[%c3, %c0_11, %c512_12], %17 {strides = array<i32>} : memref<4x16x640xf32, #tpu.memory_space<vmem>>, vector<1x16x128xf32>,
    %cst_13 = arith.constant 0.000000e+00 : f32
    %18 = vector.broadcast %cst_13 : f32 to vector<32x128xf32>
    %c0_14 = arith.constant 0 : index
    %c0_15 = arith.constant 0 : index
    %c512_16 = arith.constant 512 : index
    %19 = vector.load %arg7[%c0_14, %c0_15, %c512_16] : memref<2x32x640xf32, #tpu.memory_space<vmem>>, vector<1x32x128xf32>
    %20 = vector.shape_cast %19 : vector<1x32x128xf32> to vector<32x128xf32>
    %21 = vector.shape_cast %18 : vector<32x128xf32> to vector<1x32x128xf32>
    tpu.vector_store %arg7[%c0_14, %c0_15, %c512_16], %21 {strides = array<i32>} : memref<2x32x640xf32, #tpu.memory_space<vmem>>, vector<1x32x128xf32>,
    %cst_17 = arith.constant 0.000000e+00 : f32
    %22 = vector.broadcast %cst_17 : f32 to vector<32x128xf32>
    %c1_18 = arith.constant 1 : index
    %c0_19 = arith.constant 0 : index
    %c512_20 = arith.constant 512 : index
    %23 = vector.load %arg7[%c1_18, %c0_19, %c512_20] : memref<2x32x640xf32, #tpu.memory_space<vmem>>, vector<1x32x128xf32>
    %24 = vector.shape_cast %23 : vector<1x32x128xf32> to vector<32x128xf32>
    %25 = vector.shape_cast %22 : vector<32x128xf32> to vector<1x32x128xf32>
    tpu.vector_store %arg7[%c1_18, %c0_19, %c512_20], %25 {strides = array<i32>} : memref<2x32x640xf32, #tpu.memory_space<vmem>>, vector<1x32x128xf32>,
    %c0_21 = arith.constant 0 : index
    %c0_22 = arith.constant 0 : index
    %26 = vector.load %arg1[%c0_21, %c0_22] : memref<32x512xbf16, #tpu.memory_space<vmem>>, vector<16x80xbf16>
    %c0_23 = arith.constant 0 : index
    %c128 = arith.constant 128 : index
    %27 = vector.load %arg1[%c0_23, %c128] : memref<32x512xbf16, #tpu.memory_space<vmem>>, vector<32x80xbf16>
    %c0_24 = arith.constant 0 : index
    %c256 = arith.constant 256 : index
    %28 = vector.load %arg1[%c0_24, %c256] : memref<32x512xbf16, #tpu.memory_space<vmem>>, vector<32x160xbf16>
    %c0_25 = arith.constant 0 : index
    %c0_26 = arith.constant 0 : index
    %29 = vector.load %arg2[%c0_25, %c0_26] : memref<32x8xf32, #tpu.memory_space<vmem>>, vector<16x1xf32>
    %c0_27 = arith.constant 0 : index
    %c1_28 = arith.constant 1 : index
    %30 = vector.load %arg2[%c0_27, %c1_28] : memref<32x8xf32, #tpu.memory_space<vmem>>, vector<16x1xf32>
    %c0_29 = arith.constant 0 : index
    %c2_30 = arith.constant 2 : index
    %31 = vector.load %arg2[%c0_29, %c2_30] : memref<32x8xf32, #tpu.memory_space<vmem>>, vector<32x1xf32>
    %c0_31 = arith.constant 0 : index
    %c3_32 = arith.constant 3 : index
    %32 = vector.load %arg2[%c0_31, %c3_32] : memref<32x8xf32, #tpu.memory_space<vmem>>, vector<32x1xf32>
    %c0_33 = arith.constant 0 : index
    %c4 = arith.constant 4 : index
    %33 = vector.load %arg2[%c0_33, %c4] : memref<32x8xf32, #tpu.memory_space<vmem>>, vector<32x1xf32>
    %c0_34 = arith.constant 0 : index
    %c5 = arith.constant 5 : index
    %34 = vector.load %arg2[%c0_34, %c5] : memref<32x8xf32, #tpu.memory_space<vmem>>, vector<32x1xf32>
    %35 = tpu.iota {dimensions = array<i32: 1>} : vector<1x512xi32>
    %c255_i32 = arith.constant 255 : i32
    %36 = vector.broadcast %c255_i32 : i32 to vector<1x512xi32>
    %37 = arith.andi %35, %36 : vector<1x512xi32>
    %c225_i32 = arith.constant 225 : i32
    %38 = vector.broadcast %c225_i32 : i32 to vector<1x512xi32>
    %39 = arith.cmpi slt, %37, %38 : vector<1x512xi32>
    %cst_35 = arith.constant 1.000000e+00 : f32
    %cst_36 = arith.constant 0.000000e+00 : f32
    %40 = vector.broadcast %cst_35 : f32 to vector<1x512xf32>
    %41 = vector.broadcast %cst_36 : f32 to vector<1x512xf32>
    %42 = arith.select %39, %40, %41 : vector<1x512xi1>, vector<1x512xf32>
    %cst_37 = arith.constant 0.000000e+00 : f32
    %43 = vector.broadcast %cst_37 : f32 to vector<16x1xf32>
    %cst_38 = arith.constant 0.000000e+00 : f32
    %44 = vector.broadcast %cst_38 : f32 to vector<16x1xf32>
    %c0_39 = arith.constant 0 : index
    %c0_40 = arith.constant 0 : index
    %c0_41 = arith.constant 0 : index
    %45 = vector.load %arg0[%c0_39, %c0_40, %c0_41] : memref<8x6x640xbf16, #tpu.memory_space<vmem>>, vector<1x6x512xbf16>
    %46 = vector.shape_cast %45 : vector<1x6x512xbf16> to vector<6x512xbf16>
    %c0_42 = arith.constant 0 : index
    %c0_43 = arith.constant 0 : index
    %47 = vector.load %arg5[%c0_42, %c0_43] : memref<160x512xbf16, #tpu.memory_space<vmem>>, vector<6x512xbf16>
    tpu.vector_store %arg5[%c0_42, %c0_43], %46 {strides = array<i32>} : memref<160x512xbf16, #tpu.memory_space<vmem>>, vector<6x512xbf16>,
    %c1_44 = arith.constant 1 : index
    %c0_45 = arith.constant 0 : index
    %c0_46 = arith.constant 0 : index
    %48 = vector.load %arg0[%c1_44, %c0_45, %c0_46] : memref<8x6x640xbf16, #tpu.memory_space<vmem>>, vector<1x6x512xbf16>
    %49 = vector.shape_cast %48 : vector<1x6x512xbf16> to vector<6x512xbf16>
    %c16 = arith.constant 16 : index
    %c0_47 = arith.constant 0 : index
    %50 = vector.load %arg5[%c16, %c0_47] : memref<160x512xbf16, #tpu.memory_space<vmem>>, vector<6x512xbf16>
    tpu.vector_store %arg5[%c16, %c0_47], %49 {strides = array<i32>} : memref<160x512xbf16, #tpu.memory_space<vmem>>, vector<6x512xbf16>,
    %c2_48 = arith.constant 2 : index
    %c0_49 = arith.constant 0 : index
    %c0_50 = arith.constant 0 : index
    %51 = vector.load %arg0[%c2_48, %c0_49, %c0_50] : memref<8x6x640xbf16, #tpu.memory_space<vmem>>, vector<1x6x512xbf16>
    %52 = vector.shape_cast %51 : vector<1x6x512xbf16> to vector<6x512xbf16>
    %c32 = arith.constant 32 : index
    %c0_51 = arith.constant 0 : index
    %53 = vector.load %arg5[%c32, %c0_51] : memref<160x512xbf16, #tpu.memory_space<vmem>>, vector<6x512xbf16>
    tpu.vector_store %arg5[%c32, %c0_51], %52 {strides = array<i32>} : memref<160x512xbf16, #tpu.memory_space<vmem>>, vector<6x512xbf16>,
    %c3_52 = arith.constant 3 : index
    %c0_53 = arith.constant 0 : index
    %c0_54 = arith.constant 0 : index
    %54 = vector.load %arg0[%c3_52, %c0_53, %c0_54] : memref<8x6x640xbf16, #tpu.memory_space<vmem>>, vector<1x6x512xbf16>
    %55 = vector.shape_cast %54 : vector<1x6x512xbf16> to vector<6x512xbf16>
    %c48 = arith.constant 48 : index
    %c0_55 = arith.constant 0 : index
    %56 = vector.load %arg5[%c48, %c0_55] : memref<160x512xbf16, #tpu.memory_space<vmem>>, vector<6x512xbf16>
    tpu.vector_store %arg5[%c48, %c0_55], %55 {strides = array<i32>} : memref<160x512xbf16, #tpu.memory_space<vmem>>, vector<6x512xbf16>,
    %c4_56 = arith.constant 4 : index
    %c0_57 = arith.constant 0 : index
    %c0_58 = arith.constant 0 : index
    %57 = vector.load %arg0[%c4_56, %c0_57, %c0_58] : memref<8x6x640xbf16, #tpu.memory_space<vmem>>, vector<1x6x512xbf16>
    %58 = vector.shape_cast %57 : vector<1x6x512xbf16> to vector<6x512xbf16>
    %c64 = arith.constant 64 : index
    %c0_59 = arith.constant 0 : index
    %59 = vector.load %arg5[%c64, %c0_59] : memref<160x512xbf16, #tpu.memory_space<vmem>>, vector<6x512xbf16>
    tpu.vector_store %arg5[%c64, %c0_59], %58 {strides = array<i32>} : memref<160x512xbf16, #tpu.memory_space<vmem>>, vector<6x512xbf16>,
    %c0_60 = arith.constant 0 : index
    %c0_61 = arith.constant 0 : index
    %60 = vector.load %arg5[%c0_60, %c0_61] : memref<160x512xbf16, #tpu.memory_space<vmem>>, vector<80x512xbf16>
    %cst_62 = arith.constant dense<0.000000e+00> : vector<16x512xf32>
    %61 = tpu.matmul %26, %60, %cst_62 {dimension_numbers = #tpu.dot_dimension_numbers<[1], [0], [0], [1], [0, 0, 1, 1], [], []>} : vector<16x80xbf16>, vector<80x512xbf16>, vector<16x512xf32> -> vector<16x512xf32>
    %62 = vector.broadcast %42 : vector<1x512xf32> to vector<16x512xf32>
    %63 = arith.mulf %61, %62 : vector<16x512xf32>
    %cst_63 = arith.constant dense<0.000000e+00> : vector<16xf32>
    %64 = vector.multi_reduction <add>, %63, %cst_63 [1] : vector<16x512xf32> to vector<16xf32>
    %65 = vector.shape_cast %64 : vector<16xf32> to vector<16x1xf32>
    %66 = arith.addf %43, %65 : vector<16x1xf32>
    %67 = arith.mulf %63, %63 : vector<16x512xf32>
    %cst_64 = arith.constant dense<0.000000e+00> : vector<16xf32>
    %68 = vector.multi_reduction <add>, %67, %cst_64 [1] : vector<16x512xf32> to vector<16xf32>
    %69 = vector.shape_cast %68 : vector<16xf32> to vector<16x1xf32>
    %70 = arith.addf %44, %69 : vector<16x1xf32>
    %c0_65 = arith.constant 0 : index
    %c0_66 = arith.constant 0 : index
    %c0_67 = arith.constant 0 : index
    %71 = vector.load %arg6[%c0_65, %c0_66, %c0_67] : memref<4x16x640xf32, #tpu.memory_space<vmem>>, vector<1x16x512xf32>
    %72 = vector.shape_cast %71 : vector<1x16x512xf32> to vector<16x512xf32>
    %73 = vector.shape_cast %63 : vector<16x512xf32> to vector<1x16x512xf32>
    tpu.vector_store %arg6[%c0_65, %c0_66, %c0_67], %73 {strides = array<i32>} : memref<4x16x640xf32, #tpu.memory_space<vmem>>, vector<1x16x512xf32>,
    %c2_68 = arith.constant 2 : index
    %c0_69 = arith.constant 0 : index
    %c0_70 = arith.constant 0 : index
    %74 = vector.load %arg0[%c2_68, %c0_69, %c0_70] : memref<8x6x640xbf16, #tpu.memory_space<vmem>>, vector<1x6x512xbf16>
    %75 = vector.shape_cast %74 : vector<1x6x512xbf16> to vector<6x512xbf16>
    %c0_71 = arith.constant 0 : index
    %c0_72 = arith.constant 0 : index
    %76 = vector.load %arg5[%c0_71, %c0_72] : memref<160x512xbf16, #tpu.memory_space<vmem>>, vector<6x512xbf16>
    tpu.vector_store %arg5[%c0_71, %c0_72], %75 {strides = array<i32>} : memref<160x512xbf16, #tpu.memory_space<vmem>>, vector<6x512xbf16>,
    %c3_73 = arith.constant 3 : index
    %c0_74 = arith.constant 0 : index
    %c0_75 = arith.constant 0 : index
    %77 = vector.load %arg0[%c3_73, %c0_74, %c0_75] : memref<8x6x640xbf16, #tpu.memory_space<vmem>>, vector<1x6x512xbf16>
    %78 = vector.shape_cast %77 : vector<1x6x512xbf16> to vector<6x512xbf16>
    %c16_76 = arith.constant 16 : index
    %c0_77 = arith.constant 0 : index
    %79 = vector.load %arg5[%c16_76, %c0_77] : memref<160x512xbf16, #tpu.memory_space<vmem>>, vector<6x512xbf16>
    tpu.vector_store %arg5[%c16_76, %c0_77], %78 {strides = array<i32>} : memref<160x512xbf16, #tpu.memory_space<vmem>>, vector<6x512xbf16>,
    %c4_78 = arith.constant 4 : index
    %c0_79 = arith.constant 0 : index
    %c0_80 = arith.constant 0 : index
    %80 = vector.load %arg0[%c4_78, %c0_79, %c0_80] : memref<8x6x640xbf16, #tpu.memory_space<vmem>>, vector<1x6x512xbf16>
    %81 = vector.shape_cast %80 : vector<1x6x512xbf16> to vector<6x512xbf16>
    %c32_81 = arith.constant 32 : index
    %c0_82 = arith.constant 0 : index
    %82 = vector.load %arg5[%c32_81, %c0_82] : memref<160x512xbf16, #tpu.memory_space<vmem>>, vector<6x512xbf16>
    tpu.vector_store %arg5[%c32_81, %c0_82], %81 {strides = array<i32>} : memref<160x512xbf16, #tpu.memory_space<vmem>>, vector<6x512xbf16>,
    %c5_83 = arith.constant 5 : index
    %c0_84 = arith.constant 0 : index
    %c0_85 = arith.constant 0 : index
    %83 = vector.load %arg0[%c5_83, %c0_84, %c0_85] : memref<8x6x640xbf16, #tpu.memory_space<vmem>>, vector<1x6x512xbf16>
    %84 = vector.shape_cast %83 : vector<1x6x512xbf16> to vector<6x512xbf16>
    %c48_86 = arith.constant 48 : index
    %c0_87 = arith.constant 0 : index
    %85 = vector.load %arg5[%c48_86, %c0_87] : memref<160x512xbf16, #tpu.memory_space<vmem>>, vector<6x512xbf16>
    tpu.vector_store %arg5[%c48_86, %c0_87], %84 {strides = array<i32>} : memref<160x512xbf16, #tpu.memory_space<vmem>>, vector<6x512xbf16>,
    %c6 = arith.constant 6 : index
    %c0_88 = arith.constant 0 : index
    %c0_89 = arith.constant 0 : index
    %86 = vector.load %arg0[%c6, %c0_88, %c0_89] : memref<8x6x640xbf16, #tpu.memory_space<vmem>>, vector<1x6x512xbf16>
    %87 = vector.shape_cast %86 : vector<1x6x512xbf16> to vector<6x512xbf16>
    %c64_90 = arith.constant 64 : index
    %c0_91 = arith.constant 0 : index
    %88 = vector.load %arg5[%c64_90, %c0_91] : memref<160x512xbf16, #tpu.memory_space<vmem>>, vector<6x512xbf16>
    tpu.vector_store %arg5[%c64_90, %c0_91], %87 {strides = array<i32>} : memref<160x512xbf16, #tpu.memory_space<vmem>>, vector<6x512xbf16>,
    %c0_92 = arith.constant 0 : index
    %c0_93 = arith.constant 0 : index
    %89 = vector.load %arg5[%c0_92, %c0_93] : memref<160x512xbf16, #tpu.memory_space<vmem>>, vector<80x512xbf16>
    %cst_94 = arith.constant dense<0.000000e+00> : vector<16x512xf32>
    %90 = tpu.matmul %26, %89, %cst_94 {dimension_numbers = #tpu.dot_dimension_numbers<[1], [0], [0], [1], [0, 0, 1, 1], [], []>} : vector<16x80xbf16>, vector<80x512xbf16>, vector<16x512xf32> -> vector<16x512xf32>
    %91 = vector.broadcast %42 : vector<1x512xf32> to vector<16x512xf32>
    %92 = arith.mulf %90, %91 : vector<16x512xf32>
    %cst_95 = arith.constant dense<0.000000e+00> : vector<16xf32>
    %93 = vector.multi_reduction <add>, %92, %cst_95 [1] : vector<16x512xf32> to vector<16xf32>
    %94 = vector.shape_cast %93 : vector<16xf32> to vector<16x1xf32>
    %95 = arith.addf %66, %94 : vector<16x1xf32>
    %96 = arith.mulf %92, %92 : vector<16x512xf32>
    %cst_96 = arith.constant dense<0.000000e+00> : vector<16xf32>
    %97 = vector.multi_reduction <add>, %96, %cst_96 [1] : vector<16x512xf32> to vector<16xf32>
    %98 = vector.shape_cast %97 : vector<16xf32> to vector<16x1xf32>
    %99 = arith.addf %70, %98 : vector<16x1xf32>
    %c1_97 = arith.constant 1 : index
    %c0_98 = arith.constant 0 : index
    %c0_99 = arith.constant 0 : index
    %100 = vector.load %arg6[%c1_97, %c0_98, %c0_99] : memref<4x16x640xf32, #tpu.memory_space<vmem>>, vector<1x16x512xf32>
    %101 = vector.shape_cast %100 : vector<1x16x512xf32> to vector<16x512xf32>
    %102 = vector.shape_cast %92 : vector<16x512xf32> to vector<1x16x512xf32>
    tpu.vector_store %arg6[%c1_97, %c0_98, %c0_99], %102 {strides = array<i32>} : memref<4x16x640xf32, #tpu.memory_space<vmem>>, vector<1x16x512xf32>,
    %c4_100 = arith.constant 4 : index
    %c0_101 = arith.constant 0 : index
    %c0_102 = arith.constant 0 : index
    %103 = vector.load %arg0[%c4_100, %c0_101, %c0_102] : memref<8x6x640xbf16, #tpu.memory_space<vmem>>, vector<1x6x512xbf16>
    %104 = vector.shape_cast %103 : vector<1x6x512xbf16> to vector<6x512xbf16>
    %c0_103 = arith.constant 0 : index
    %c0_104 = arith.constant 0 : index
    %105 = vector.load %arg5[%c0_103, %c0_104] : memref<160x512xbf16, #tpu.memory_space<vmem>>, vector<6x512xbf16>
    tpu.vector_store %arg5[%c0_103, %c0_104], %104 {strides = array<i32>} : memref<160x512xbf16, #tpu.memory_space<vmem>>, vector<6x512xbf16>,
    %c5_105 = arith.constant 5 : index
    %c0_106 = arith.constant 0 : index
    %c0_107 = arith.constant 0 : index
    %106 = vector.load %arg0[%c5_105, %c0_106, %c0_107] : memref<8x6x640xbf16, #tpu.memory_space<vmem>>, vector<1x6x512xbf16>
    %107 = vector.shape_cast %106 : vector<1x6x512xbf16> to vector<6x512xbf16>
    %c16_108 = arith.constant 16 : index
    %c0_109 = arith.constant 0 : index
    %108 = vector.load %arg5[%c16_108, %c0_109] : memref<160x512xbf16, #tpu.memory_space<vmem>>, vector<6x512xbf16>
    tpu.vector_store %arg5[%c16_108, %c0_109], %107 {strides = array<i32>} : memref<160x512xbf16, #tpu.memory_space<vmem>>, vector<6x512xbf16>,
    %c6_110 = arith.constant 6 : index
    %c0_111 = arith.constant 0 : index
    %c0_112 = arith.constant 0 : index
    %109 = vector.load %arg0[%c6_110, %c0_111, %c0_112] : memref<8x6x640xbf16, #tpu.memory_space<vmem>>, vector<1x6x512xbf16>
    %110 = vector.shape_cast %109 : vector<1x6x512xbf16> to vector<6x512xbf16>
    %c32_113 = arith.constant 32 : index
    %c0_114 = arith.constant 0 : index
    %111 = vector.load %arg5[%c32_113, %c0_114] : memref<160x512xbf16, #tpu.memory_space<vmem>>, vector<6x512xbf16>
    tpu.vector_store %arg5[%c32_113, %c0_114], %110 {strides = array<i32>} : memref<160x512xbf16, #tpu.memory_space<vmem>>, vector<6x512xbf16>,
    %c7 = arith.constant 7 : index
    %c0_115 = arith.constant 0 : index
    %c0_116 = arith.constant 0 : index
    %112 = vector.load %arg0[%c7, %c0_115, %c0_116] : memref<8x6x640xbf16, #tpu.memory_space<vmem>>, vector<1x6x512xbf16>
    %113 = vector.shape_cast %112 : vector<1x6x512xbf16> to vector<6x512xbf16>
    %c48_117 = arith.constant 48 : index
    %c0_118 = arith.constant 0 : index
    %114 = vector.load %arg5[%c48_117, %c0_118] : memref<160x512xbf16, #tpu.memory_space<vmem>>, vector<6x512xbf16>
    tpu.vector_store %arg5[%c48_117, %c0_118], %113 {strides = array<i32>} : memref<160x512xbf16, #tpu.memory_space<vmem>>, vector<6x512xbf16>,
    %c0_119 = arith.constant 0 : index
    %c0_120 = arith.constant 0 : index
    %c1_121 = arith.constant 1 : index
    %115 = vector.load %arg0[%c0_119, %c0_120, %c1_121] : memref<8x6x640xbf16, #tpu.memory_space<vmem>>, vector<1x6x512xbf16>
    %116 = vector.shape_cast %115 : vector<1x6x512xbf16> to vector<6x512xbf16>
    %c64_122 = arith.constant 64 : index
    %c0_123 = arith.constant 0 : index
    %117 = vector.load %arg5[%c64_122, %c0_123] : memref<160x512xbf16, #tpu.memory_space<vmem>>, vector<6x512xbf16>
    tpu.vector_store %arg5[%c64_122, %c0_123], %116 {strides = array<i32>} : memref<160x512xbf16, #tpu.memory_space<vmem>>, vector<6x512xbf16>,
    %c0_124 = arith.constant 0 : index
    %c0_125 = arith.constant 0 : index
    %118 = vector.load %arg5[%c0_124, %c0_125] : memref<160x512xbf16, #tpu.memory_space<vmem>>, vector<80x512xbf16>
    %cst_126 = arith.constant dense<0.000000e+00> : vector<16x512xf32>
    %119 = tpu.matmul %26, %118, %cst_126 {dimension_numbers = #tpu.dot_dimension_numbers<[1], [0], [0], [1], [0, 0, 1, 1], [], []>} : vector<16x80xbf16>, vector<80x512xbf16>, vector<16x512xf32> -> vector<16x512xf32>
    %120 = vector.broadcast %42 : vector<1x512xf32> to vector<16x512xf32>
    %121 = arith.mulf %119, %120 : vector<16x512xf32>
    %cst_127 = arith.constant dense<0.000000e+00> : vector<16xf32>
    %122 = vector.multi_reduction <add>, %121, %cst_127 [1] : vector<16x512xf32> to vector<16xf32>
    %123 = vector.shape_cast %122 : vector<16xf32> to vector<16x1xf32>
    %124 = arith.addf %95, %123 : vector<16x1xf32>
    %125 = arith.mulf %121, %121 : vector<16x512xf32>
    %cst_128 = arith.constant dense<0.000000e+00> : vector<16xf32>
    %126 = vector.multi_reduction <add>, %125, %cst_128 [1] : vector<16x512xf32> to vector<16xf32>
    %127 = vector.shape_cast %126 : vector<16xf32> to vector<16x1xf32>
    %128 = arith.addf %99, %127 : vector<16x1xf32>
    %c2_129 = arith.constant 2 : index
    %c0_130 = arith.constant 0 : index
    %c0_131 = arith.constant 0 : index
    %129 = vector.load %arg6[%c2_129, %c0_130, %c0_131] : memref<4x16x640xf32, #tpu.memory_space<vmem>>, vector<1x16x512xf32>
    %130 = vector.shape_cast %129 : vector<1x16x512xf32> to vector<16x512xf32>
    %131 = vector.shape_cast %121 : vector<16x512xf32> to vector<1x16x512xf32>
    tpu.vector_store %arg6[%c2_129, %c0_130, %c0_131], %131 {strides = array<i32>} : memref<4x16x640xf32, #tpu.memory_space<vmem>>, vector<1x16x512xf32>,
    %c6_132 = arith.constant 6 : index
    %c0_133 = arith.constant 0 : index
    %c0_134 = arith.constant 0 : index
    %132 = vector.load %arg0[%c6_132, %c0_133, %c0_134] : memref<8x6x640xbf16, #tpu.memory_space<vmem>>, vector<1x6x512xbf16>
    %133 = vector.shape_cast %132 : vector<1x6x512xbf16> to vector<6x512xbf16>
    %c0_135 = arith.constant 0 : index
    %c0_136 = arith.constant 0 : index
    %134 = vector.load %arg5[%c0_135, %c0_136] : memref<160x512xbf16, #tpu.memory_space<vmem>>, vector<6x512xbf16>
    tpu.vector_store %arg5[%c0_135, %c0_136], %133 {strides = array<i32>} : memref<160x512xbf16, #tpu.memory_space<vmem>>, vector<6x512xbf16>,
    %c7_137 = arith.constant 7 : index
    %c0_138 = arith.constant 0 : index
    %c0_139 = arith.constant 0 : index
    %135 = vector.load %arg0[%c7_137, %c0_138, %c0_139] : memref<8x6x640xbf16, #tpu.memory_space<vmem>>, vector<1x6x512xbf16>
    %136 = vector.shape_cast %135 : vector<1x6x512xbf16> to vector<6x512xbf16>
    %c16_140 = arith.constant 16 : index
    %c0_141 = arith.constant 0 : index
    %137 = vector.load %arg5[%c16_140, %c0_141] : memref<160x512xbf16, #tpu.memory_space<vmem>>, vector<6x512xbf16>
    tpu.vector_store %arg5[%c16_140, %c0_141], %136 {strides = array<i32>} : memref<160x512xbf16, #tpu.memory_space<vmem>>, vector<6x512xbf16>,
    %c0_142 = arith.constant 0 : index
    %c0_143 = arith.constant 0 : index
    %c1_144 = arith.constant 1 : index
    %138 = vector.load %arg0[%c0_142, %c0_143, %c1_144] : memref<8x6x640xbf16, #tpu.memory_space<vmem>>, vector<1x6x512xbf16>
    %139 = vector.shape_cast %138 : vector<1x6x512xbf16> to vector<6x512xbf16>
    %c32_145 = arith.constant 32 : index
    %c0_146 = arith.constant 0 : index
    %140 = vector.load %arg5[%c32_145, %c0_146] : memref<160x512xbf16, #tpu.memory_space<vmem>>, vector<6x512xbf16>
    tpu.vector_store %arg5[%c32_145, %c0_146], %139 {strides = array<i32>} : memref<160x512xbf16, #tpu.memory_space<vmem>>, vector<6x512xbf16>,
    %c1_147 = arith.constant 1 : index
    %c0_148 = arith.constant 0 : index
    %c1_149 = arith.constant 1 : index
    %141 = vector.load %arg0[%c1_147, %c0_148, %c1_149] : memref<8x6x640xbf16, #tpu.memory_space<vmem>>, vector<1x6x512xbf16>
    %142 = vector.shape_cast %141 : vector<1x6x512xbf16> to vector<6x512xbf16>
    %c48_150 = arith.constant 48 : index
    %c0_151 = arith.constant 0 : index
    %143 = vector.load %arg5[%c48_150, %c0_151] : memref<160x512xbf16, #tpu.memory_space<vmem>>, vector<6x512xbf16>
    tpu.vector_store %arg5[%c48_150, %c0_151], %142 {strides = array<i32>} : memref<160x512xbf16, #tpu.memory_space<vmem>>, vector<6x512xbf16>,
    %c2_152 = arith.constant 2 : index
    %c0_153 = arith.constant 0 : index
    %c1_154 = arith.constant 1 : index
    %144 = vector.load %arg0[%c2_152, %c0_153, %c1_154] : memref<8x6x640xbf16, #tpu.memory_space<vmem>>, vector<1x6x512xbf16>
    %145 = vector.shape_cast %144 : vector<1x6x512xbf16> to vector<6x512xbf16>
    %c64_155 = arith.constant 64 : index
    %c0_156 = arith.constant 0 : index
    %146 = vector.load %arg5[%c64_155, %c0_156] : memref<160x512xbf16, #tpu.memory_space<vmem>>, vector<6x512xbf16>
    tpu.vector_store %arg5[%c64_155, %c0_156], %145 {strides = array<i32>} : memref<160x512xbf16, #tpu.memory_space<vmem>>, vector<6x512xbf16>,
    %c0_157 = arith.constant 0 : index
    %c0_158 = arith.constant 0 : index
    %147 = vector.load %arg5[%c0_157, %c0_158] : memref<160x512xbf16, #tpu.memory_space<vmem>>, vector<80x512xbf16>
    %cst_159 = arith.constant dense<0.000000e+00> : vector<16x512xf32>
    %148 = tpu.matmul %26, %147, %cst_159 {dimension_numbers = #tpu.dot_dimension_numbers<[1], [0], [0], [1], [0, 0, 1, 1], [], []>} : vector<16x80xbf16>, vector<80x512xbf16>, vector<16x512xf32> -> vector<16x512xf32>
    %149 = vector.broadcast %42 : vector<1x512xf32> to vector<16x512xf32>
    %150 = arith.mulf %148, %149 : vector<16x512xf32>
    %cst_160 = arith.constant dense<0.000000e+00> : vector<16xf32>
    %151 = vector.multi_reduction <add>, %150, %cst_160 [1] : vector<16x512xf32> to vector<16xf32>
    %152 = vector.shape_cast %151 : vector<16xf32> to vector<16x1xf32>
    %153 = arith.addf %124, %152 : vector<16x1xf32>
    %154 = arith.mulf %150, %150 : vector<16x512xf32>
    %cst_161 = arith.constant dense<0.000000e+00> : vector<16xf32>
    %155 = vector.multi_reduction <add>, %154, %cst_161 [1] : vector<16x512xf32> to vector<16xf32>
    %156 = vector.shape_cast %155 : vector<16xf32> to vector<16x1xf32>
    %157 = arith.addf %128, %156 : vector<16x1xf32>
    %c3_162 = arith.constant 3 : index
    %c0_163 = arith.constant 0 : index
    %c0_164 = arith.constant 0 : index
    %158 = vector.load %arg6[%c3_162, %c0_163, %c0_164] : memref<4x16x640xf32, #tpu.memory_space<vmem>>, vector<1x16x512xf32>
    %159 = vector.shape_cast %158 : vector<1x16x512xf32> to vector<16x512xf32>
    %160 = vector.shape_cast %150 : vector<16x512xf32> to vector<1x16x512xf32>
    tpu.vector_store %arg6[%c3_162, %c0_163, %c0_164], %160 {strides = array<i32>} : memref<4x16x640xf32, #tpu.memory_space<vmem>>, vector<1x16x512xf32>,
    %cst_165 = arith.constant 5.55555569E-4 : f32
    %161 = vector.broadcast %cst_165 : f32 to vector<16x1xf32>
    %162 = arith.mulf %153, %161 : vector<16x1xf32>
    %cst_166 = arith.constant 5.55555569E-4 : f32
    %163 = vector.broadcast %cst_166 : f32 to vector<16x1xf32>
    %164 = arith.mulf %157, %163 : vector<16x1xf32>
    %165 = arith.mulf %162, %162 : vector<16x1xf32>
    %166 = arith.subf %164, %165 : vector<16x1xf32>
    %cst_167 = arith.constant 9.99999974E-6 : f32
    %167 = vector.broadcast %cst_167 : f32 to vector<16x1xf32>
    %168 = arith.addf %166, %167 : vector<16x1xf32>
    %169 = math.rsqrt %168 : vector<16x1xf32>
    %170 = arith.mulf %29, %169 : vector<16x1xf32>
    %171 = arith.mulf %162, %170 : vector<16x1xf32>
    %172 = arith.subf %30, %171 : vector<16x1xf32>
    %173 = tpu.iota {dimensions = array<i32: 1>} : vector<1x512xi32>
    %c255_i32_168 = arith.constant 255 : i32
    %174 = vector.broadcast %c255_i32_168 : i32 to vector<1x512xi32>
    %175 = arith.andi %173, %174 : vector<1x512xi32>
    %c224_i32 = arith.constant 224 : i32
    %176 = vector.broadcast %c224_i32 : i32 to vector<1x512xi32>
    %177 = arith.cmpi slt, %175, %176 : vector<1x512xi32>
    %cst_169 = arith.constant 1.000000e+00 : f32
    %cst_170 = arith.constant 0.000000e+00 : f32
    %178 = vector.broadcast %cst_169 : f32 to vector<1x512xf32>
    %179 = vector.broadcast %cst_170 : f32 to vector<1x512xf32>
    %180 = arith.select %177, %178, %179 : vector<1x512xi1>, vector<1x512xf32>
    %cst_171 = arith.constant 0.000000e+00 : f32
    %181 = vector.broadcast %cst_171 : f32 to vector<32x1xf32>
    %cst_172 = arith.constant 0.000000e+00 : f32
    %182 = vector.broadcast %cst_172 : f32 to vector<32x1xf32>
    %c0_173 = arith.constant 0 : index
    %c0_174 = arith.constant 0 : index
    %c0_175 = arith.constant 0 : index
    %183 = vector.load %arg6[%c0_173, %c0_174, %c0_175] : memref<4x16x640xf32, #tpu.memory_space<vmem>>, vector<1x16x512xf32>
    %184 = vector.shape_cast %183 : vector<1x16x512xf32> to vector<16x512xf32>
    %185 = vector.broadcast %170 : vector<16x1xf32> to vector<16x512xf32>
    %186 = arith.mulf %184, %185 : vector<16x512xf32>
    %187 = vector.broadcast %172 : vector<16x1xf32> to vector<16x512xf32>
    %188 = arith.addf %186, %187 : vector<16x512xf32>
    %cst_176 = arith.constant 0.000000e+00 : f32
    %189 = vector.broadcast %cst_176 : f32 to vector<16x512xf32>
    %190 = arith.maximumf %188, %189 : vector<16x512xf32>
    %191 = arith.truncf %190 : vector<16x512xf32> to vector<16x512xbf16>
    %c0_177 = arith.constant 0 : index
    %c0_178 = arith.constant 0 : index
    %192 = vector.load %arg5[%c0_177, %c0_178] : memref<160x512xbf16, #tpu.memory_space<vmem>>, vector<16x512xbf16>
    tpu.vector_store %arg5[%c0_177, %c0_178], %191 {strides = array<i32>} : memref<160x512xbf16, #tpu.memory_space<vmem>>, vector<16x512xbf16>,
    %c1_179 = arith.constant 1 : index
    %c0_180 = arith.constant 0 : index
    %c0_181 = arith.constant 0 : index
    %193 = vector.load %arg6[%c1_179, %c0_180, %c0_181] : memref<4x16x640xf32, #tpu.memory_space<vmem>>, vector<1x16x512xf32>
    %194 = vector.shape_cast %193 : vector<1x16x512xf32> to vector<16x512xf32>
    %195 = vector.broadcast %170 : vector<16x1xf32> to vector<16x512xf32>
    %196 = arith.mulf %194, %195 : vector<16x512xf32>
    %197 = vector.broadcast %172 : vector<16x1xf32> to vector<16x512xf32>
    %198 = arith.addf %196, %197 : vector<16x512xf32>
    %cst_182 = arith.constant 0.000000e+00 : f32
    %199 = vector.broadcast %cst_182 : f32 to vector<16x512xf32>
    %200 = arith.maximumf %198, %199 : vector<16x512xf32>
    %201 = arith.truncf %200 : vector<16x512xf32> to vector<16x512xbf16>
    %c16_183 = arith.constant 16 : index
    %c0_184 = arith.constant 0 : index
    %202 = vector.load %arg5[%c16_183, %c0_184] : memref<160x512xbf16, #tpu.memory_space<vmem>>, vector<16x512xbf16>
    tpu.vector_store %arg5[%c16_183, %c0_184], %201 {strides = array<i32>} : memref<160x512xbf16, #tpu.memory_space<vmem>>, vector<16x512xbf16>,
    %c2_185 = arith.constant 2 : index
    %c0_186 = arith.constant 0 : index
    %c0_187 = arith.constant 0 : index
    %203 = vector.load %arg6[%c2_185, %c0_186, %c0_187] : memref<4x16x640xf32, #tpu.memory_space<vmem>>, vector<1x16x512xf32>
    %204 = vector.shape_cast %203 : vector<1x16x512xf32> to vector<16x512xf32>
    %205 = vector.broadcast %170 : vector<16x1xf32> to vector<16x512xf32>
    %206 = arith.mulf %204, %205 : vector<16x512xf32>
    %207 = vector.broadcast %172 : vector<16x1xf32> to vector<16x512xf32>
    %208 = arith.addf %206, %207 : vector<16x512xf32>
    %cst_188 = arith.constant 0.000000e+00 : f32
    %209 = vector.broadcast %cst_188 : f32 to vector<16x512xf32>
    %210 = arith.maximumf %208, %209 : vector<16x512xf32>
    %211 = arith.truncf %210 : vector<16x512xf32> to vector<16x512xbf16>
    %c32_189 = arith.constant 32 : index
    %c0_190 = arith.constant 0 : index
    %212 = vector.load %arg5[%c32_189, %c0_190] : memref<160x512xbf16, #tpu.memory_space<vmem>>, vector<16x512xbf16>
    tpu.vector_store %arg5[%c32_189, %c0_190], %211 {strides = array<i32>} : memref<160x512xbf16, #tpu.memory_space<vmem>>, vector<16x512xbf16>,
    %c3_191 = arith.constant 3 : index
    %c0_192 = arith.constant 0 : index
    %c0_193 = arith.constant 0 : index
    %213 = vector.load %arg6[%c3_191, %c0_192, %c0_193] : memref<4x16x640xf32, #tpu.memory_space<vmem>>, vector<1x16x512xf32>
    %214 = vector.shape_cast %213 : vector<1x16x512xf32> to vector<16x512xf32>
    %215 = vector.broadcast %170 : vector<16x1xf32> to vector<16x512xf32>
    %216 = arith.mulf %214, %215 : vector<16x512xf32>
    %217 = vector.broadcast %172 : vector<16x1xf32> to vector<16x512xf32>
    %218 = arith.addf %216, %217 : vector<16x512xf32>
    %cst_194 = arith.constant 0.000000e+00 : f32
    %219 = vector.broadcast %cst_194 : f32 to vector<16x512xf32>
    %220 = arith.maximumf %218, %219 : vector<16x512xf32>
    %221 = arith.truncf %220 : vector<16x512xf32> to vector<16x512xbf16>
    %c48_195 = arith.constant 48 : index
    %c0_196 = arith.constant 0 : index
    %222 = vector.load %arg5[%c48_195, %c0_196] : memref<160x512xbf16, #tpu.memory_space<vmem>>, vector<16x512xbf16>
    tpu.vector_store %arg5[%c48_195, %c0_196], %221 {strides = array<i32>} : memref<160x512xbf16, #tpu.memory_space<vmem>>, vector<16x512xbf16>,
    %c0_197 = arith.constant 0 : index
    %c0_198 = arith.constant 0 : index
    %c1_199 = arith.constant 1 : index
    %223 = vector.load %arg6[%c0_197, %c0_198, %c1_199] : memref<4x16x640xf32, #tpu.memory_space<vmem>>, vector<1x16x512xf32>
    %224 = vector.shape_cast %223 : vector<1x16x512xf32> to vector<16x512xf32>
    %225 = vector.broadcast %170 : vector<16x1xf32> to vector<16x512xf32>
    %226 = arith.mulf %224, %225 : vector<16x512xf32>
    %227 = vector.broadcast %172 : vector<16x1xf32> to vector<16x512xf32>
    %228 = arith.addf %226, %227 : vector<16x512xf32>
    %cst_200 = arith.constant 0.000000e+00 : f32
    %229 = vector.broadcast %cst_200 : f32 to vector<16x512xf32>
    %230 = arith.maximumf %228, %229 : vector<16x512xf32>
    %231 = arith.truncf %230 : vector<16x512xf32> to vector<16x512xbf16>
    %c64_201 = arith.constant 64 : index
    %c0_202 = arith.constant 0 : index
    %232 = vector.load %arg5[%c64_201, %c0_202] : memref<160x512xbf16, #tpu.memory_space<vmem>>, vector<16x512xbf16>
    tpu.vector_store %arg5[%c64_201, %c0_202], %231 {strides = array<i32>} : memref<160x512xbf16, #tpu.memory_space<vmem>>, vector<16x512xbf16>,
    %c0_203 = arith.constant 0 : index
    %c0_204 = arith.constant 0 : index
    %233 = vector.load %arg5[%c0_203, %c0_204] : memref<160x512xbf16, #tpu.memory_space<vmem>>, vector<80x512xbf16>
    %cst_205 = arith.constant dense<0.000000e+00> : vector<32x512xf32>
    %234 = tpu.matmul %27, %233, %cst_205 {dimension_numbers = #tpu.dot_dimension_numbers<[1], [0], [0], [1], [0, 0, 1, 1], [], []>} : vector<32x80xbf16>, vector<80x512xbf16>, vector<32x512xf32> -> vector<32x512xf32>
    %235 = vector.broadcast %180 : vector<1x512xf32> to vector<32x512xf32>
    %236 = arith.mulf %234, %235 : vector<32x512xf32>
    %cst_206 = arith.constant dense<0.000000e+00> : vector<32xf32>
    %237 = vector.multi_reduction <add>, %236, %cst_206 [1] : vector<32x512xf32> to vector<32xf32>
    %238 = vector.shape_cast %237 : vector<32xf32> to vector<32x1xf32>
    %239 = arith.addf %181, %238 : vector<32x1xf32>
    %240 = arith.mulf %236, %236 : vector<32x512xf32>
    %cst_207 = arith.constant dense<0.000000e+00> : vector<32xf32>
    %241 = vector.multi_reduction <add>, %240, %cst_207 [1] : vector<32x512xf32> to vector<32xf32>
    %242 = vector.shape_cast %241 : vector<32xf32> to vector<32x1xf32>
    %243 = arith.addf %182, %242 : vector<32x1xf32>
    %c0_208 = arith.constant 0 : index
    %c0_209 = arith.constant 0 : index
    %c0_210 = arith.constant 0 : index
    %244 = vector.load %arg7[%c0_208, %c0_209, %c0_210] : memref<2x32x640xf32, #tpu.memory_space<vmem>>, vector<1x32x512xf32>
    %245 = vector.shape_cast %244 : vector<1x32x512xf32> to vector<32x512xf32>
    %246 = vector.shape_cast %236 : vector<32x512xf32> to vector<1x32x512xf32>
    tpu.vector_store %arg7[%c0_208, %c0_209, %c0_210], %246 {strides = array<i32>} : memref<2x32x640xf32, #tpu.memory_space<vmem>>, vector<1x32x512xf32>,
    %c2_211 = arith.constant 2 : index
    %c0_212 = arith.constant 0 : index
    %c0_213 = arith.constant 0 : index
    %247 = vector.load %arg6[%c2_211, %c0_212, %c0_213] : memref<4x16x640xf32, #tpu.memory_space<vmem>>, vector<1x16x512xf32>
    %248 = vector.shape_cast %247 : vector<1x16x512xf32> to vector<16x512xf32>
    %249 = vector.broadcast %170 : vector<16x1xf32> to vector<16x512xf32>
    %250 = arith.mulf %248, %249 : vector<16x512xf32>
    %251 = vector.broadcast %172 : vector<16x1xf32> to vector<16x512xf32>
    %252 = arith.addf %250, %251 : vector<16x512xf32>
    %cst_214 = arith.constant 0.000000e+00 : f32
    %253 = vector.broadcast %cst_214 : f32 to vector<16x512xf32>
    %254 = arith.maximumf %252, %253 : vector<16x512xf32>
    %255 = arith.truncf %254 : vector<16x512xf32> to vector<16x512xbf16>
    %c0_215 = arith.constant 0 : index
    %c0_216 = arith.constant 0 : index
    %256 = vector.load %arg5[%c0_215, %c0_216] : memref<160x512xbf16, #tpu.memory_space<vmem>>, vector<16x512xbf16>
    tpu.vector_store %arg5[%c0_215, %c0_216], %255 {strides = array<i32>} : memref<160x512xbf16, #tpu.memory_space<vmem>>, vector<16x512xbf16>,
    %c3_217 = arith.constant 3 : index
    %c0_218 = arith.constant 0 : index
    %c0_219 = arith.constant 0 : index
    %257 = vector.load %arg6[%c3_217, %c0_218, %c0_219] : memref<4x16x640xf32, #tpu.memory_space<vmem>>, vector<1x16x512xf32>
    %258 = vector.shape_cast %257 : vector<1x16x512xf32> to vector<16x512xf32>
    %259 = vector.broadcast %170 : vector<16x1xf32> to vector<16x512xf32>
    %260 = arith.mulf %258, %259 : vector<16x512xf32>
    %261 = vector.broadcast %172 : vector<16x1xf32> to vector<16x512xf32>
    %262 = arith.addf %260, %261 : vector<16x512xf32>
    %cst_220 = arith.constant 0.000000e+00 : f32
    %263 = vector.broadcast %cst_220 : f32 to vector<16x512xf32>
    %264 = arith.maximumf %262, %263 : vector<16x512xf32>
    %265 = arith.truncf %264 : vector<16x512xf32> to vector<16x512xbf16>
    %c16_221 = arith.constant 16 : index
    %c0_222 = arith.constant 0 : index
    %266 = vector.load %arg5[%c16_221, %c0_222] : memref<160x512xbf16, #tpu.memory_space<vmem>>, vector<16x512xbf16>
    tpu.vector_store %arg5[%c16_221, %c0_222], %265 {strides = array<i32>} : memref<160x512xbf16, #tpu.memory_space<vmem>>, vector<16x512xbf16>,
    %c0_223 = arith.constant 0 : index
    %c0_224 = arith.constant 0 : index
    %c1_225 = arith.constant 1 : index
    %267 = vector.load %arg6[%c0_223, %c0_224, %c1_225] : memref<4x16x640xf32, #tpu.memory_space<vmem>>, vector<1x16x512xf32>
    %268 = vector.shape_cast %267 : vector<1x16x512xf32> to vector<16x512xf32>
    %269 = vector.broadcast %170 : vector<16x1xf32> to vector<16x512xf32>
    %270 = arith.mulf %268, %269 : vector<16x512xf32>
    %271 = vector.broadcast %172 : vector<16x1xf32> to vector<16x512xf32>
    %272 = arith.addf %270, %271 : vector<16x512xf32>
    %cst_226 = arith.constant 0.000000e+00 : f32
    %273 = vector.broadcast %cst_226 : f32 to vector<16x512xf32>
    %274 = arith.maximumf %272, %273 : vector<16x512xf32>
    %275 = arith.truncf %274 : vector<16x512xf32> to vector<16x512xbf16>
    %c32_227 = arith.constant 32 : index
    %c0_228 = arith.constant 0 : index
    %276 = vector.load %arg5[%c32_227, %c0_228] : memref<160x512xbf16, #tpu.memory_space<vmem>>, vector<16x512xbf16>
    tpu.vector_store %arg5[%c32_227, %c0_228], %275 {strides = array<i32>} : memref<160x512xbf16, #tpu.memory_space<vmem>>, vector<16x512xbf16>,
    %c1_229 = arith.constant 1 : index
    %c0_230 = arith.constant 0 : index
    %c1_231 = arith.constant 1 : index
    %277 = vector.load %arg6[%c1_229, %c0_230, %c1_231] : memref<4x16x640xf32, #tpu.memory_space<vmem>>, vector<1x16x512xf32>
    %278 = vector.shape_cast %277 : vector<1x16x512xf32> to vector<16x512xf32>
    %279 = vector.broadcast %170 : vector<16x1xf32> to vector<16x512xf32>
    %280 = arith.mulf %278, %279 : vector<16x512xf32>
    %281 = vector.broadcast %172 : vector<16x1xf32> to vector<16x512xf32>
    %282 = arith.addf %280, %281 : vector<16x512xf32>
    %cst_232 = arith.constant 0.000000e+00 : f32
    %283 = vector.broadcast %cst_232 : f32 to vector<16x512xf32>
    %284 = arith.maximumf %282, %283 : vector<16x512xf32>
    %285 = arith.truncf %284 : vector<16x512xf32> to vector<16x512xbf16>
    %c48_233 = arith.constant 48 : index
    %c0_234 = arith.constant 0 : index
    %286 = vector.load %arg5[%c48_233, %c0_234] : memref<160x512xbf16, #tpu.memory_space<vmem>>, vector<16x512xbf16>
    tpu.vector_store %arg5[%c48_233, %c0_234], %285 {strides = array<i32>} : memref<160x512xbf16, #tpu.memory_space<vmem>>, vector<16x512xbf16>,
    %c2_235 = arith.constant 2 : index
    %c0_236 = arith.constant 0 : index
    %c1_237 = arith.constant 1 : index
    %287 = vector.load %arg6[%c2_235, %c0_236, %c1_237] : memref<4x16x640xf32, #tpu.memory_space<vmem>>, vector<1x16x512xf32>
    %288 = vector.shape_cast %287 : vector<1x16x512xf32> to vector<16x512xf32>
    %289 = vector.broadcast %170 : vector<16x1xf32> to vector<16x512xf32>
    %290 = arith.mulf %288, %289 : vector<16x512xf32>
    %291 = vector.broadcast %172 : vector<16x1xf32> to vector<16x512xf32>
    %292 = arith.addf %290, %291 : vector<16x512xf32>
    %cst_238 = arith.constant 0.000000e+00 : f32
    %293 = vector.broadcast %cst_238 : f32 to vector<16x512xf32>
    %294 = arith.maximumf %292, %293 : vector<16x512xf32>
    %295 = arith.truncf %294 : vector<16x512xf32> to vector<16x512xbf16>
    %c64_239 = arith.constant 64 : index
    %c0_240 = arith.constant 0 : index
    %296 = vector.load %arg5[%c64_239, %c0_240] : memref<160x512xbf16, #tpu.memory_space<vmem>>, vector<16x512xbf16>
    tpu.vector_store %arg5[%c64_239, %c0_240], %295 {strides = array<i32>} : memref<160x512xbf16, #tpu.memory_space<vmem>>, vector<16x512xbf16>,
    %c0_241 = arith.constant 0 : index
    %c0_242 = arith.constant 0 : index
    %297 = vector.load %arg5[%c0_241, %c0_242] : memref<160x512xbf16, #tpu.memory_space<vmem>>, vector<80x512xbf16>
    %cst_243 = arith.constant dense<0.000000e+00> : vector<32x512xf32>
    %298 = tpu.matmul %27, %297, %cst_243 {dimension_numbers = #tpu.dot_dimension_numbers<[1], [0], [0], [1], [0, 0, 1, 1], [], []>} : vector<32x80xbf16>, vector<80x512xbf16>, vector<32x512xf32> -> vector<32x512xf32>
    %299 = vector.broadcast %180 : vector<1x512xf32> to vector<32x512xf32>
    %300 = arith.mulf %298, %299 : vector<32x512xf32>
    %cst_244 = arith.constant dense<0.000000e+00> : vector<32xf32>
    %301 = vector.multi_reduction <add>, %300, %cst_244 [1] : vector<32x512xf32> to vector<32xf32>
    %302 = vector.shape_cast %301 : vector<32xf32> to vector<32x1xf32>
    %303 = arith.addf %239, %302 : vector<32x1xf32>
    %304 = arith.mulf %300, %300 : vector<32x512xf32>
    %cst_245 = arith.constant dense<0.000000e+00> : vector<32xf32>
    %305 = vector.multi_reduction <add>, %304, %cst_245 [1] : vector<32x512xf32> to vector<32xf32>
    %306 = vector.shape_cast %305 : vector<32xf32> to vector<32x1xf32>
    %307 = arith.addf %243, %306 : vector<32x1xf32>
    %c1_246 = arith.constant 1 : index
    %c0_247 = arith.constant 0 : index
    %c0_248 = arith.constant 0 : index
    %308 = vector.load %arg7[%c1_246, %c0_247, %c0_248] : memref<2x32x640xf32, #tpu.memory_space<vmem>>, vector<1x32x512xf32>
    %309 = vector.shape_cast %308 : vector<1x32x512xf32> to vector<32x512xf32>
    %310 = vector.shape_cast %300 : vector<32x512xf32> to vector<1x32x512xf32>
    tpu.vector_store %arg7[%c1_246, %c0_247, %c0_248], %310 {strides = array<i32>} : memref<2x32x640xf32, #tpu.memory_space<vmem>>, vector<1x32x512xf32>,
    %cst_249 = arith.constant 0.00111607148 : f32
    %311 = vector.broadcast %cst_249 : f32 to vector<32x1xf32>
    %312 = arith.mulf %303, %311 : vector<32x1xf32>
    %cst_250 = arith.constant 0.00111607148 : f32
    %313 = vector.broadcast %cst_250 : f32 to vector<32x1xf32>
    %314 = arith.mulf %307, %313 : vector<32x1xf32>
    %315 = arith.mulf %312, %312 : vector<32x1xf32>
    %316 = arith.subf %314, %315 : vector<32x1xf32>
    %cst_251 = arith.constant 9.99999974E-6 : f32
    %317 = vector.broadcast %cst_251 : f32 to vector<32x1xf32>
    %318 = arith.addf %316, %317 : vector<32x1xf32>
    %319 = math.rsqrt %318 : vector<32x1xf32>
    %320 = arith.mulf %31, %319 : vector<32x1xf32>
    %321 = arith.mulf %312, %320 : vector<32x1xf32>
    %322 = arith.subf %32, %321 : vector<32x1xf32>
    %323 = tpu.iota {dimensions = array<i32: 1>} : vector<1x512xi32>
    %c255_i32_252 = arith.constant 255 : i32
    %324 = vector.broadcast %c255_i32_252 : i32 to vector<1x512xi32>
    %325 = arith.andi %323, %324 : vector<1x512xi32>
    %c222_i32 = arith.constant 222 : i32
    %326 = vector.broadcast %c222_i32 : i32 to vector<1x512xi32>
    %327 = arith.cmpi slt, %325, %326 : vector<1x512xi32>
    %cst_253 = arith.constant 1.000000e+00 : f32
    %cst_254 = arith.constant 0.000000e+00 : f32
    %328 = vector.broadcast %cst_253 : f32 to vector<1x512xf32>
    %329 = vector.broadcast %cst_254 : f32 to vector<1x512xf32>
    %330 = arith.select %327, %328, %329 : vector<1x512xi1>, vector<1x512xf32>
    %c0_255 = arith.constant 0 : index
    %c0_256 = arith.constant 0 : index
    %c0_257 = arith.constant 0 : index
    %331 = vector.load %arg7[%c0_255, %c0_256, %c0_257] : memref<2x32x640xf32, #tpu.memory_space<vmem>>, vector<1x32x512xf32>
    %332 = vector.shape_cast %331 : vector<1x32x512xf32> to vector<32x512xf32>
    %333 = vector.broadcast %320 : vector<32x1xf32> to vector<32x512xf32>
    %334 = arith.mulf %332, %333 : vector<32x512xf32>
    %335 = vector.broadcast %322 : vector<32x1xf32> to vector<32x512xf32>
    %336 = arith.addf %334, %335 : vector<32x512xf32>
    %cst_258 = arith.constant 0.000000e+00 : f32
    %337 = vector.broadcast %cst_258 : f32 to vector<32x512xf32>
    %338 = arith.maximumf %336, %337 : vector<32x512xf32>
    %339 = arith.truncf %338 : vector<32x512xf32> to vector<32x512xbf16>
    %c0_259 = arith.constant 0 : index
    %c0_260 = arith.constant 0 : index
    %340 = vector.load %arg5[%c0_259, %c0_260] : memref<160x512xbf16, #tpu.memory_space<vmem>>, vector<32x512xbf16>
    tpu.vector_store %arg5[%c0_259, %c0_260], %339 {strides = array<i32>} : memref<160x512xbf16, #tpu.memory_space<vmem>>, vector<32x512xbf16>,
    %c1_261 = arith.constant 1 : index
    %c0_262 = arith.constant 0 : index
    %c0_263 = arith.constant 0 : index
    %341 = vector.load %arg7[%c1_261, %c0_262, %c0_263] : memref<2x32x640xf32, #tpu.memory_space<vmem>>, vector<1x32x512xf32>
    %342 = vector.shape_cast %341 : vector<1x32x512xf32> to vector<32x512xf32>
    %343 = vector.broadcast %320 : vector<32x1xf32> to vector<32x512xf32>
    %344 = arith.mulf %342, %343 : vector<32x512xf32>
    %345 = vector.broadcast %322 : vector<32x1xf32> to vector<32x512xf32>
    %346 = arith.addf %344, %345 : vector<32x512xf32>
    %cst_264 = arith.constant 0.000000e+00 : f32
    %347 = vector.broadcast %cst_264 : f32 to vector<32x512xf32>
    %348 = arith.maximumf %346, %347 : vector<32x512xf32>
    %349 = arith.truncf %348 : vector<32x512xf32> to vector<32x512xbf16>
    %c32_265 = arith.constant 32 : index
    %c0_266 = arith.constant 0 : index
    %350 = vector.load %arg5[%c32_265, %c0_266] : memref<160x512xbf16, #tpu.memory_space<vmem>>, vector<32x512xbf16>
    tpu.vector_store %arg5[%c32_265, %c0_266], %349 {strides = array<i32>} : memref<160x512xbf16, #tpu.memory_space<vmem>>, vector<32x512xbf16>,
    %c0_267 = arith.constant 0 : index
    %c0_268 = arith.constant 0 : index
    %c1_269 = arith.constant 1 : index
    %351 = vector.load %arg7[%c0_267, %c0_268, %c1_269] : memref<2x32x640xf32, #tpu.memory_space<vmem>>, vector<1x32x512xf32>
    %352 = vector.shape_cast %351 : vector<1x32x512xf32> to vector<32x512xf32>
    %353 = vector.broadcast %320 : vector<32x1xf32> to vector<32x512xf32>
    %354 = arith.mulf %352, %353 : vector<32x512xf32>
    %355 = vector.broadcast %322 : vector<32x1xf32> to vector<32x512xf32>
    %356 = arith.addf %354, %355 : vector<32x512xf32>
    %cst_270 = arith.constant 0.000000e+00 : f32
    %357 = vector.broadcast %cst_270 : f32 to vector<32x512xf32>
    %358 = arith.maximumf %356, %357 : vector<32x512xf32>
    %359 = arith.truncf %358 : vector<32x512xf32> to vector<32x512xbf16>
    %c64_271 = arith.constant 64 : index
    %c0_272 = arith.constant 0 : index
    %360 = vector.load %arg5[%c64_271, %c0_272] : memref<160x512xbf16, #tpu.memory_space<vmem>>, vector<32x512xbf16>
    tpu.vector_store %arg5[%c64_271, %c0_272], %359 {strides = array<i32>} : memref<160x512xbf16, #tpu.memory_space<vmem>>, vector<32x512xbf16>,
    %c1_273 = arith.constant 1 : index
    %c0_274 = arith.constant 0 : index
    %c1_275 = arith.constant 1 : index
    %361 = vector.load %arg7[%c1_273, %c0_274, %c1_275] : memref<2x32x640xf32, #tpu.memory_space<vmem>>, vector<1x32x512xf32>
    %362 = vector.shape_cast %361 : vector<1x32x512xf32> to vector<32x512xf32>
    %363 = vector.broadcast %320 : vector<32x1xf32> to vector<32x512xf32>
    %364 = arith.mulf %362, %363 : vector<32x512xf32>
    %365 = vector.broadcast %322 : vector<32x1xf32> to vector<32x512xf32>
    %366 = arith.addf %364, %365 : vector<32x512xf32>
    %cst_276 = arith.constant 0.000000e+00 : f32
    %367 = vector.broadcast %cst_276 : f32 to vector<32x512xf32>
    %368 = arith.maximumf %366, %367 : vector<32x512xf32>
    %369 = arith.truncf %368 : vector<32x512xf32> to vector<32x512xbf16>
    %c96 = arith.constant 96 : index
    %c0_277 = arith.constant 0 : index
    %370 = vector.load %arg5[%c96, %c0_277] : memref<160x512xbf16, #tpu.memory_space<vmem>>, vector<32x512xbf16>
    tpu.vector_store %arg5[%c96, %c0_277], %369 {strides = array<i32>} : memref<160x512xbf16, #tpu.memory_space<vmem>>, vector<32x512xbf16>,
    %c0_278 = arith.constant 0 : index
    %c0_279 = arith.constant 0 : index
    %c2_280 = arith.constant 2 : index
    %371 = vector.load %arg7[%c0_278, %c0_279, %c2_280] : memref<2x32x640xf32, #tpu.memory_space<vmem>>, vector<1x32x512xf32>
    %372 = vector.shape_cast %371 : vector<1x32x512xf32> to vector<32x512xf32>
    %373 = vector.broadcast %320 : vector<32x1xf32> to vector<32x512xf32>
    %374 = arith.mulf %372, %373 : vector<32x512xf32>
    %375 = vector.broadcast %322 : vector<32x1xf32> to vector<32x512xf32>
    %376 = arith.addf %374, %375 : vector<32x512xf32>
    %cst_281 = arith.constant 0.000000e+00 : f32
    %377 = vector.broadcast %cst_281 : f32 to vector<32x512xf32>
    %378 = arith.maximumf %376, %377 : vector<32x512xf32>
    %379 = arith.truncf %378 : vector<32x512xf32> to vector<32x512xbf16>
    %c128_282 = arith.constant 128 : index
    %c0_283 = arith.constant 0 : index
    %380 = vector.load %arg5[%c128_282, %c0_283] : memref<160x512xbf16, #tpu.memory_space<vmem>>, vector<32x512xbf16>
    tpu.vector_store %arg5[%c128_282, %c0_283], %379 {strides = array<i32>} : memref<160x512xbf16, #tpu.memory_space<vmem>>, vector<32x512xbf16>,
    %c0_284 = arith.constant 0 : index
    %c0_285 = arith.constant 0 : index
    %381 = vector.load %arg5[%c0_284, %c0_285] : memref<160x512xbf16, #tpu.memory_space<vmem>>, vector<160x512xbf16>
    %cst_286 = arith.constant dense<0.000000e+00> : vector<32x512xf32>
    %382 = tpu.matmul %28, %381, %cst_286 {dimension_numbers = #tpu.dot_dimension_numbers<[1], [0], [0], [1], [0, 0, 1, 1], [], []>} : vector<32x160xbf16>, vector<160x512xbf16>, vector<32x512xf32> -> vector<32x512xf32>
    %383 = vector.broadcast %330 : vector<1x512xf32> to vector<32x512xf32>
    %384 = arith.mulf %382, %383 : vector<32x512xf32>
    %cst_287 = arith.constant dense<0.000000e+00> : vector<32xf32>
    %385 = vector.multi_reduction <add>, %384, %cst_287 [1] : vector<32x512xf32> to vector<32xf32>
    %386 = vector.shape_cast %385 : vector<32xf32> to vector<32x1xf32>
    %387 = arith.mulf %384, %384 : vector<32x512xf32>
    %cst_288 = arith.constant dense<0.000000e+00> : vector<32xf32>
    %388 = vector.multi_reduction <add>, %387, %cst_288 [1] : vector<32x512xf32> to vector<32xf32>
    %389 = vector.shape_cast %388 : vector<32xf32> to vector<32x1xf32>
    %cst_289 = arith.constant 0.00225225231 : f32
    %390 = vector.broadcast %cst_289 : f32 to vector<32x1xf32>
    %391 = arith.mulf %386, %390 : vector<32x1xf32>
    %cst_290 = arith.constant 0.00225225231 : f32
    %392 = vector.broadcast %cst_290 : f32 to vector<32x1xf32>
    %393 = arith.mulf %389, %392 : vector<32x1xf32>
    %394 = arith.mulf %391, %391 : vector<32x1xf32>
    %395 = arith.subf %393, %394 : vector<32x1xf32>
    %cst_291 = arith.constant 9.99999974E-6 : f32
    %396 = vector.broadcast %cst_291 : f32 to vector<32x1xf32>
    %397 = arith.addf %395, %396 : vector<32x1xf32>
    %398 = math.rsqrt %397 : vector<32x1xf32>
    %399 = arith.mulf %33, %398 : vector<32x1xf32>
    %400 = arith.mulf %391, %399 : vector<32x1xf32>
    %401 = arith.subf %34, %400 : vector<32x1xf32>
    %402 = vector.broadcast %399 : vector<32x1xf32> to vector<32x512xf32>
    %403 = arith.mulf %384, %402 : vector<32x512xf32>
    %404 = vector.broadcast %401 : vector<32x1xf32> to vector<32x512xf32>
    %405 = arith.addf %403, %404 : vector<32x512xf32>
    %cst_292 = arith.constant 0.000000e+00 : f32
    %406 = vector.broadcast %cst_292 : f32 to vector<32x512xf32>
    %407 = arith.maximumf %405, %406 : vector<32x512xf32>
    %c0_293 = arith.constant 0 : index
    %c0_294 = arith.constant 0 : index
    %c0_295 = arith.constant 0 : index
    %408 = vector.load %arg3[%c0_293, %c0_294, %c0_295] : memref<3x32x256xf32, #tpu.memory_space<vmem>>, vector<1x32x256xf32>
    %409 = vector.shape_cast %408 : vector<1x32x256xf32> to vector<32x256xf32>
    %c0_296 = arith.constant 0 : index
    %c6_297 = arith.constant 6 : index
    %410 = vector.load %arg2[%c0_296, %c6_297] : memref<32x8xf32, #tpu.memory_space<vmem>>, vector<1x1xf32>
    %411 = vector.extract_strided_slice %407 {offsets = [0, 0], sizes = [32, 256], strides = [1, 1]} : vector<32x512xf32> to vector<32x256xf32>
    %412 = arith.mulf %411, %409 : vector<32x256xf32>
    %cst_298 = arith.constant dense<0.000000e+00> : vector<32xf32>
    %413 = vector.multi_reduction <add>, %412, %cst_298 [1] : vector<32x256xf32> to vector<32xf32>
    %414 = vector.shape_cast %413 : vector<32xf32> to vector<32x1xf32>
    %cst_299 = arith.constant dense<0.000000e+00> : vector<1xf32>
    %415 = vector.multi_reduction <add>, %414, %cst_299 [0] : vector<32x1xf32> to vector<1xf32>
    %416 = vector.shape_cast %415 : vector<1xf32> to vector<1x1xf32>
    %417 = arith.addf %416, %410 : vector<1x1xf32>
    %c0_300 = arith.constant 0 : index
    %c0_301 = arith.constant 0 : index
    %418 = vector.load %arg4[%c0_300, %c0_301] : memref<2x3xf32, #tpu.memory_space<vmem>>, vector<1x1xf32>
    tpu.vector_store %arg4[%c0_300, %c0_301], %417 {strides = array<i32>} : memref<2x3xf32, #tpu.memory_space<vmem>>, vector<1x1xf32>,
    %419 = vector.extract_strided_slice %407 {offsets = [0, 256], sizes = [32, 256], strides = [1, 1]} : vector<32x512xf32> to vector<32x256xf32>
    %420 = arith.mulf %419, %409 : vector<32x256xf32>
    %cst_302 = arith.constant dense<0.000000e+00> : vector<32xf32>
    %421 = vector.multi_reduction <add>, %420, %cst_302 [1] : vector<32x256xf32> to vector<32xf32>
    %422 = vector.shape_cast %421 : vector<32xf32> to vector<32x1xf32>
    %cst_303 = arith.constant dense<0.000000e+00> : vector<1xf32>
    %423 = vector.multi_reduction <add>, %422, %cst_303 [0] : vector<32x1xf32> to vector<1xf32>
    %424 = vector.shape_cast %423 : vector<1xf32> to vector<1x1xf32>
    %425 = arith.addf %424, %410 : vector<1x1xf32>
    %c1_304 = arith.constant 1 : index
    %c0_305 = arith.constant 0 : index
    %426 = vector.load %arg4[%c1_304, %c0_305] : memref<2x3xf32, #tpu.memory_space<vmem>>, vector<1x1xf32>
    tpu.vector_store %arg4[%c1_304, %c0_305], %425 {strides = array<i32>} : memref<2x3xf32, #tpu.memory_space<vmem>>, vector<1x1xf32>,
    %c1_306 = arith.constant 1 : index
    %c0_307 = arith.constant 0 : index
    %c0_308 = arith.constant 0 : index
    %427 = vector.load %arg3[%c1_306, %c0_307, %c0_308] : memref<3x32x256xf32, #tpu.memory_space<vmem>>, vector<1x32x256xf32>
    %428 = vector.shape_cast %427 : vector<1x32x256xf32> to vector<32x256xf32>
    %c1_309 = arith.constant 1 : index
    %c6_310 = arith.constant 6 : index
    %429 = vector.load %arg2[%c1_309, %c6_310] : memref<32x8xf32, #tpu.memory_space<vmem>>, vector<1x1xf32>
    %430 = vector.extract_strided_slice %407 {offsets = [0, 0], sizes = [32, 256], strides = [1, 1]} : vector<32x512xf32> to vector<32x256xf32>
    %431 = arith.mulf %430, %428 : vector<32x256xf32>
    %cst_311 = arith.constant dense<0.000000e+00> : vector<32xf32>
    %432 = vector.multi_reduction <add>, %431, %cst_311 [1] : vector<32x256xf32> to vector<32xf32>
    %433 = vector.shape_cast %432 : vector<32xf32> to vector<32x1xf32>
    %cst_312 = arith.constant dense<0.000000e+00> : vector<1xf32>
    %434 = vector.multi_reduction <add>, %433, %cst_312 [0] : vector<32x1xf32> to vector<1xf32>
    %435 = vector.shape_cast %434 : vector<1xf32> to vector<1x1xf32>
    %436 = arith.addf %435, %429 : vector<1x1xf32>
    %c0_313 = arith.constant 0 : index
    %c1_314 = arith.constant 1 : index
    %437 = vector.load %arg4[%c0_313, %c1_314] : memref<2x3xf32, #tpu.memory_space<vmem>>, vector<1x1xf32>
    tpu.vector_store %arg4[%c0_313, %c1_314], %436 {strides = array<i32>} : memref<2x3xf32, #tpu.memory_space<vmem>>, vector<1x1xf32>,
    %438 = vector.extract_strided_slice %407 {offsets = [0, 256], sizes = [32, 256], strides = [1, 1]} : vector<32x512xf32> to vector<32x256xf32>
    %439 = arith.mulf %438, %428 : vector<32x256xf32>
    %cst_315 = arith.constant dense<0.000000e+00> : vector<32xf32>
    %440 = vector.multi_reduction <add>, %439, %cst_315 [1] : vector<32x256xf32> to vector<32xf32>
    %441 = vector.shape_cast %440 : vector<32xf32> to vector<32x1xf32>
    %cst_316 = arith.constant dense<0.000000e+00> : vector<1xf32>
    %442 = vector.multi_reduction <add>, %441, %cst_316 [0] : vector<32x1xf32> to vector<1xf32>
    %443 = vector.shape_cast %442 : vector<1xf32> to vector<1x1xf32>
    %444 = arith.addf %443, %429 : vector<1x1xf32>
    %c1_317 = arith.constant 1 : index
    %c1_318 = arith.constant 1 : index
    %445 = vector.load %arg4[%c1_317, %c1_318] : memref<2x3xf32, #tpu.memory_space<vmem>>, vector<1x1xf32>
    tpu.vector_store %arg4[%c1_317, %c1_318], %444 {strides = array<i32>} : memref<2x3xf32, #tpu.memory_space<vmem>>, vector<1x1xf32>,
    %c2_319 = arith.constant 2 : index
    %c0_320 = arith.constant 0 : index
    %c0_321 = arith.constant 0 : index
    %446 = vector.load %arg3[%c2_319, %c0_320, %c0_321] : memref<3x32x256xf32, #tpu.memory_space<vmem>>, vector<1x32x256xf32>
    %447 = vector.shape_cast %446 : vector<1x32x256xf32> to vector<32x256xf32>
    %c2_322 = arith.constant 2 : index
    %c6_323 = arith.constant 6 : index
    %448 = vector.load %arg2[%c2_322, %c6_323] : memref<32x8xf32, #tpu.memory_space<vmem>>, vector<1x1xf32>
    %449 = vector.extract_strided_slice %407 {offsets = [0, 0], sizes = [32, 256], strides = [1, 1]} : vector<32x512xf32> to vector<32x256xf32>
    %450 = arith.mulf %449, %447 : vector<32x256xf32>
    %cst_324 = arith.constant dense<0.000000e+00> : vector<32xf32>
    %451 = vector.multi_reduction <add>, %450, %cst_324 [1] : vector<32x256xf32> to vector<32xf32>
    %452 = vector.shape_cast %451 : vector<32xf32> to vector<32x1xf32>
    %cst_325 = arith.constant dense<0.000000e+00> : vector<1xf32>
    %453 = vector.multi_reduction <add>, %452, %cst_325 [0] : vector<32x1xf32> to vector<1xf32>
    %454 = vector.shape_cast %453 : vector<1xf32> to vector<1x1xf32>
    %455 = arith.addf %454, %448 : vector<1x1xf32>
    %c0_326 = arith.constant 0 : index
    %c2_327 = arith.constant 2 : index
    %456 = vector.load %arg4[%c0_326, %c2_327] : memref<2x3xf32, #tpu.memory_space<vmem>>, vector<1x1xf32>
    tpu.vector_store %arg4[%c0_326, %c2_327], %455 {strides = array<i32>} : memref<2x3xf32, #tpu.memory_space<vmem>>, vector<1x1xf32>,
    %457 = vector.extract_strided_slice %407 {offsets = [0, 256], sizes = [32, 256], strides = [1, 1]} : vector<32x512xf32> to vector<32x256xf32>
    %458 = arith.mulf %457, %447 : vector<32x256xf32>
    %cst_328 = arith.constant dense<0.000000e+00> : vector<32xf32>
    %459 = vector.multi_reduction <add>, %458, %cst_328 [1] : vector<32x256xf32> to vector<32xf32>
    %460 = vector.shape_cast %459 : vector<32xf32> to vector<32x1xf32>
    %cst_329 = arith.constant dense<0.000000e+00> : vector<1xf32>
    %461 = vector.multi_reduction <add>, %460, %cst_329 [0] : vector<32x1xf32> to vector<1xf32>
    %462 = vector.shape_cast %461 : vector<1xf32> to vector<1x1xf32>
    %463 = arith.addf %462, %448 : vector<1x1xf32>
    %c1_330 = arith.constant 1 : index
    %c2_331 = arith.constant 2 : index
    %464 = vector.load %arg4[%c1_330, %c2_331] : memref<2x3xf32, #tpu.memory_space<vmem>>, vector<1x1xf32>
    tpu.vector_store %arg4[%c1_330, %c2_331], %463 {strides = array<i32>} : memref<2x3xf32, #tpu.memory_space<vmem>>, vector<1x1xf32>,
    return
  }
}

</mosaic_0001>

<bundles_post_ra>
// kernel: dqn_forward.1
= control target key start
LH: loop header
LB: loop body
LE: loop exit
PB: predicated region body
PF: predicated region fallthrough
CT: control target
= control target key end

     0   :  { %v5548_v4 = vmov 0   ;;  %s3897_s19 = smov 127   ;;  %vm219_vm0 = vcmask 654336   ;;  %s5541_s0 = inlined_call_operand.vmem [shape: bf16[8,6,640], index: 0, kind: input, shape index: {}]   ;;  %s5542_s1 = inlined_call_operand.vmem [shape: bf16[32,512], index: 1, kind: input, shape index: {}]   ;;  %s5543_s2 = inlined_call_operand.vmem [shape: f32[32,8], index: 2, kind: input, shape index: {}]   ;;  %s5544_s3 = inlined_call_operand.vmem [shape: f32[3,32,256], index: 3, kind: input, shape index: {}]   ;;  %s5545_s4 = inlined_call_operand.hbm [shape: f32[2,3], index: 4, kind: output, shape index: {}]  }
   0x1   :  { %v694_v0 = vld [vmem:[%s5541_s0] sm:$0x77]  ;;  %v695_v1 = vld [vmem:[%s5541_s0 + $0x8] sm:$0x77]  ;;  %20 = vst [vmem:[#allocation2 + $0x8] sm:$0xff] %v5548_v4  ;;  %19 = vst [vmem:[#allocation2] sm:$0xff] %v5548_v4  ;;  %255 = vmatprep.mubr.bf16.mxu0 %v5548_v4  ;;  %298 = vmatprep.mubr.bf16.mxu1 %v5548_v4 }
   0x2   :  { %v3657_v2 = vcombine.high %v694_v0, %v694_v0  ;;  %v3656_v3 = vcombine.low %v694_v0, %v694_v0  ;;  %21 = vst [vmem:[#allocation2 + $0x10] sm:$0xff] %v5548_v4  ;;  %22 = vst [vmem:[#allocation2 + $0x18] sm:$0xff] %v5548_v4  ;;  %3746 = vset.pattern.permute.xlu1 %v5548_v4  ;;  %v3658_v5 = vcombine.low %v695_v1, %v695_v1  ;;  %v3969_v7 = vld [vmem:[%s5541_s0] sm:$0x77]  ;;  %v3974_v8 = vld [vmem:[%s5541_s0 + $0x8] sm:$0x77] }
   0x3   :  { %23 = vst [vmem:[#allocation2 + $0x20] sm:$0xff] %v5548_v4  ;;  %24 = vst [vmem:[#allocation2 + $0x28] sm:$0xff] %v5548_v4  ;;  %v3659_v6 = vcombine.high %v695_v1, %v695_v1  ;;  %v3761_v9 = vld [vmem:[%s5541_s0 + $0x10] ss:$0 sps:$4 sm:$0x77]   ;;  %v3676_v10 = vcombine.high %v3969_v7, %v3969_v7  ;;  %v3677_v11 = vcombine.low %v3974_v8, %v3974_v8 }
   0x4   :  { %25 = vst [vmem:[#allocation2 + $0x30] sm:$0xff] %v5548_v4  ;;  %26 = vst [vmem:[#allocation2 + $0x38] sm:$0xff] %v5548_v4  ;;  %712 = vrot.lane.b32.xlu0 %v3657_v2, %s3897_s19  ;;  %710 = vrot.lane.b32.xlu1 %v3656_v3, %s3897_s19  ;;  %v3675_v12 = vcombine.low %v3969_v7, %v3969_v7  ;;  %v90_v13 = vld [vmem:[%s5541_s0] sm:$0x77]  ;;  %v3573_v14 = vld [vmem:[%s5541_s0 + $0x14] sm:$0x77]  ;;  %v3678_v52 = vcombine.high %v3974_v8, %v3974_v8 }
   0x5   :  { %27 = vst [vmem:[#allocation2 + $0x40] sm:$0xff] %v5548_v4  ;;  %28 = vst [vmem:[#allocation2 + $0x48] sm:$0xff] %v5548_v4  ;;  %v3570_v15 = vcombine.high %v90_v13, %v90_v13  ;;  %v3569_v16 = vcombine.low %v90_v13, %v90_v13  ;;  %v3576_v17 = vcombine.high %v3573_v14, %v3573_v14  ;;  %v91_v18 = vld [vmem:[%s5541_s0 + $0x8] sm:$0x77]  ;;  %v3574_v21 = vld [vmem:[%s5541_s0 + $0x1c] sm:$0x77] }
   0x6   :  { %29 = vst [vmem:[#allocation2 + $0x50] sm:$0xff] %v5548_v4  ;;  %30 = vst [vmem:[#allocation2 + $0x58] sm:$0xff] %v5548_v4  ;;  %v3575_v19 = vcombine.low %v3573_v14, %v3573_v14  ;;  %v3579_v20 = vld [vmem:[%s5541_s0 + $0x28] sm:$0x77]  ;;  %v3572_v22 = vcombine.high %v91_v18, %v91_v18  ;;  %v3571_v23 = vcombine.low %v91_v18, %v91_v18  ;;  %v3585_v26 = vld [vmem:[%s5541_s0 + $0x3c] sm:$0x77] }
   0x7   :  { %31 = vst [vmem:[#allocation2 + $0x60] sm:$0xff] %v5548_v4  ;;  %32 = vst [vmem:[#allocation2 + $0x68] sm:$0xff] %v5548_v4  ;;  %v3582_v24 = vcombine.high %v3579_v20, %v3579_v20  ;;  %v3578_v25 = vcombine.high %v3574_v21, %v3574_v21  ;;  %v3580_v27 = vld [vmem:[%s5541_s0 + $0x30] sm:$0x77]  ;;  %v3581_v29 = vcombine.low %v3579_v20, %v3579_v20  ;;  %v3586_v33 = vld [vmem:[%s5541_s0 + $0x44] sm:$0x77] }
   0x8   :  { %33 = vst [vmem:[#allocation2 + $0x70] sm:$0xff] %v5548_v4  ;;  %34 = vst [vmem:[#allocation2 + $0x78] sm:$0xff] %v5548_v4  ;;  %714 = vrot.lane.b32.xlu0 %v3658_v5, %s3897_s19  ;;  %716 = vrot.lane.b32.xlu1 %v3659_v6, %s3897_s19  ;;  %v3591_v28 = vld [vmem:[%s5541_s0 + $0x50] sm:$0x77]  ;;  %v3577_v30 = vcombine.low %v3574_v21, %v3574_v21  ;;  %v3588_v31 = vcombine.high %v3585_v26, %v3585_v26  ;;  %v3592_v34 = vld [vmem:[%s5541_s0 + $0x58] sm:$0x77] }
   0x9   :  { %35 = vst [vmem:[#allocation2 + $0x80] sm:$0xff] %v5548_v4  ;;  %36 = vst [vmem:[#allocation2 + $0x88] sm:$0xff] %v5548_v4  ;;  %v3584_v32 = vcombine.high %v3580_v27, %v3580_v27  ;;  %v3587_v35 = vcombine.low %v3585_v26, %v3585_v26  ;;  %v3583_v36 = vcombine.low %v3580_v27, %v3580_v27  ;;  %v3600_v38 = vld [vmem:[%s5541_s0 + $0x28] sm:$0x77]  ;;  %v4028_v42 = vld [vmem:[%s5541_s0 + $0x14] sm:$0x77] }
   0xa   :  { %37 = vst [vmem:[#allocation2 + $0x90] sm:$0xff] %v5548_v4  ;;  %38 = vst [vmem:[#allocation2 + $0x98] sm:$0xff] %v5548_v4  ;;  %v3594_v37 = vcombine.high %v3591_v28, %v3591_v28  ;;  %v3590_v39 = vcombine.high %v3586_v33, %v3586_v33  ;;  %v3593_v40 = vcombine.low %v3591_v28, %v3591_v28  ;;  %v3766_v41 = vld [vmem:[%s5541_s0 + $0x10] ss:$0 sps:$4 sm:$0x77]  }
   0xb   :  { %107 = vst [vmem:[#allocation2 + $0x8] sm:$0x7] %v3570_v15  ;;  %106 = vst [vmem:[#allocation2] sm:$0x7] %v3569_v16  ;;  %v3589_v43 = vcombine.low %v3586_v33, %v3586_v33  ;;  %v3596_v44 = vcombine.high %v3592_v34, %v3592_v34  ;;  %v3606_v45 = vld [vmem:[%s5541_s0 + $0x3c] sm:$0x77]  ;;  %v3603_v47 = vcombine.high %v3600_v38, %v3600_v38 }
   0xc   :  { %128 = vst [vmem:[#allocation2 + $0x28] sm:$0x7] %v3576_v17  ;;  %127 = vst [vmem:[#allocation2 + $0x20] sm:$0x7] %v3575_v19  ;;  %718 = vrot.lane.b32.xlu0 %v3761_v9, %s3897_s19  ;;  %945 = vrot.lane.b32.xlu1 %v3676_v10, %s3897_s19  ;;  %v4036_v46 = vld [vmem:[%s5541_s0 + $0x1c] sm:$0x77]  ;;  %v3595_v48 = vcombine.low %v3592_v34, %v3592_v34  ;;  %v3602_v49 = vcombine.low %v3600_v38, %v3600_v38 }
   0xd   :  { %109 = vst [vmem:[#allocation2 + $0x18] sm:$0x7] %v3572_v22  ;;  %108 = vst [vmem:[#allocation2 + $0x10] sm:$0x7] %v3571_v23  ;;  %v3601_v50 = vld [vmem:[%s5541_s0 + $0x30] sm:$0x77]  ;;  %v3609_v54 = vcombine.high %v3606_v45, %v3606_v45  ;;  %v3608_v58 = vcombine.low %v3606_v45, %v3606_v45  ;;  %v3684_v60 = vcombine.high %v4028_v42, %v4028_v42 }
   0xe   :  { %149 = vst [vmem:[#allocation2 + $0x48] sm:$0x7] %v3582_v24  ;;  %130 = vst [vmem:[#allocation2 + $0x38] sm:$0x7] %v3578_v25  ;;  %v3612_v51 = vld [vmem:[%s5541_s0 + $0x50] sm:$0x77]  ;;  %v3605_v57 = vcombine.high %v3601_v50, %v3601_v50  ;;  %v3604_v3 = vcombine.low %v3601_v50, %v3601_v50  ;;  %v3685_v6 = vcombine.low %v4036_v46, %v4036_v46 }
   0xf   :  { %148 = vst [vmem:[#allocation2 + $0x40] sm:$0x7] %v3581_v29  ;;  %129 = vst [vmem:[#allocation2 + $0x30] sm:$0x7] %v3577_v30  ;;  %v4051_v53 = vld [vmem:[%s5541_s0 + $0x78] sm:$0x77]  ;;  %v3615_v5 = vcombine.high %v3612_v51, %v3612_v51  ;;  %v3683_v25 = vcombine.low %v4028_v42, %v4028_v42  ;;  %v3686_v26 = vcombine.high %v4036_v46, %v4036_v46 }
  0x10   :  { %170 = vst [vmem:[#allocation2 + $0x68] sm:$0x7] %v3588_v31  ;;  %151 = vst [vmem:[#allocation2 + $0x58] sm:$0x7] %v3584_v32  ;;  %947 = vrot.lane.b32.xlu0 %v3677_v11, %s3897_s19  ;;  %943 = vrot.lane.b32.xlu1 %v3675_v12, %s3897_s19  ;;  %v3607_v55 = vld [vmem:[%s5541_s0 + $0x44] sm:$0x77]  ;;  %v3627_v10 = vcombine.high %v4051_v53, %v4051_v53  ;;  %v3614_v12 = vcombine.low %v3612_v51, %v3612_v51 }
  0x11   :  { %169 = vst [vmem:[#allocation2 + $0x60] sm:$0x7] %v3587_v35  ;;  %150 = vst [vmem:[#allocation2 + $0x50] sm:$0x7] %v3583_v36  ;;  %v4059_v56 = vld [vmem:[%s5541_s0 + $0x80] sm:$0x77]  ;;  %v3611_v11 = vcombine.high %v3607_v55, %v3607_v55  ;;  %v3626_v16 = vcombine.low %v4051_v53, %v4051_v53  ;;  %v3610_v17 = vcombine.low %v3607_v55, %v3607_v55 }
  0x12   :  { %191 = vst [vmem:[#allocation2 + $0x88] sm:$0x7] %v3594_v37  ;;  %172 = vst [vmem:[#allocation2 + $0x78] sm:$0x7] %v3590_v39  ;;  %v3618_v59 = vld [vmem:[%s5541_s0 + $0x64] sm:$0x77]  ;;  %v3629_v21 = vcombine.high %v4059_v56, %v4059_v56  ;;  %v3628_v22 = vcombine.low %v4059_v56, %v4059_v56 }
  0x13   :  { %190 = vst [vmem:[#allocation2 + $0x80] sm:$0x7] %v3593_v40  ;;  %171 = vst [vmem:[#allocation2 + $0x70] sm:$0x7] %v3589_v43  ;;  %v195_v61 = vld [vmem:[#allocation2 + $0x8] sm:$0xff]  ;;  %v194_v62 = vld [vmem:[#allocation2] sm:$0xff]  ;;  %v3621_v18 = vcombine.high %v3618_v59, %v3618_v59  ;;  %v3620_v24 = vcombine.low %v3618_v59, %v3618_v59 }
  0x14   :  { %193 = vst [vmem:[#allocation2 + $0x98] sm:$0x7] %v3596_v44  ;;  %192 = vst [vmem:[#allocation2 + $0x90] sm:$0x7] %v3595_v48  ;;  %v199_v63 = vld [vmem:[#allocation2 + $0x28] sm:$0xff]  ;;  %223 = vmatprep.subr.bf16.mxu0 %v195_v61  ;;  %v197_v7 = vld [vmem:[#allocation2 + $0x18] sm:$0xff]  ;;  %949 = vrot.lane.b32.xlu0 %v3678_v52, %s3897_s19 }
  0x15   :  { %v4069_v0 = vld [vmem:[%s5541_s0 + $0x50] sm:$0x77]  ;;  %v4074_v1 = vld [vmem:[%s5541_s0 + $0x64] sm:$0x77]  ;;  %v4079_v2 = vld [vmem:[%s5541_s0 + $0x58] sm:$0x77]  ;;  %951 = vrot.lane.b32.xlu1 %v3766_v41, %s3897_s19  ;;  %224 = vmatpush1.bf16.msra.mxu0 %v194_v62 }
  0x16   :  { %v198_v8 = vld [vmem:[#allocation2 + $0x20] sm:$0xff]  ;;  %v196_v9 = vld [vmem:[#allocation2 + $0x10] sm:$0xff]  ;;  %374 = vst [vmem:[#allocation2 + $0x8] sm:$0x7] %v3603_v47  ;;  %373 = vst [vmem:[#allocation2] sm:$0x7] %v3602_v49  ;;  %266 = vmatprep.subr.bf16.mxu1 %v197_v7  ;;  %225 = vmatprep.subr.bf16.mxu0 %v199_v63  ;;  %v3635_v33 = vcombine.high %v4069_v0, %v4069_v0  ;;  %v3634_v34 = vcombine.low %v4069_v0, %v4069_v0 }
  0x17   :  { %394 = vst [vmem:[#allocation2 + $0x28] sm:$0x7] %v3609_v54  ;;  %v203_v13 = vld [vmem:[#allocation2 + $0x48] sm:$0xff]  ;;  %v201_v14 = vld [vmem:[#allocation2 + $0x38] sm:$0xff]  ;;  %v4087_v15 = vld [vmem:[#allocation2 + $0x40] sm:$0xff]  ;;  %267 = vmatpush1.bf16.msra.mxu1 %v196_v9  ;;  %v3641_v35 = vcombine.high %v4074_v1, %v4074_v1  ;;  %v3637_v36 = vcombine.high %v4079_v2, %v4079_v2  ;;  %v3640_v40 = vcombine.low %v4074_v1, %v4074_v1 }
  0x18   :  { %376 = vst [vmem:[#allocation2 + $0x18] sm:$0x7] %v3605_v57  ;;  %393 = vst [vmem:[#allocation2 + $0x20] sm:$0x7] %v3608_v58  ;;  %v200_v19 = vld [vmem:[#allocation2 + $0x30] sm:$0xff]  ;;  %v4091_v20 = vld [vmem:[#allocation2 + $0x68] sm:$0xff]  ;;  %268 = vmatprep.subr.bf16.mxu1 %v201_v14  ;;  %983 = vrot.lane.b32.xlu0 %v3684_v60, %s3897_s19  ;;  %v3636_v41 = vcombine.low %v4079_v2, %v4079_v2 }
  0x19   :  { %375 = vst [vmem:[#allocation2 + $0x10] sm:$0x7] %v3604_v3  ;;  %414 = vst [vmem:[#allocation2 + $0x48] sm:$0x7] %v3615_v5  ;;  %v4100_v23 = vld [vmem:[%s5541_s0 + $0x78] sm:$0x77]  ;;  %985 = vrot.lane.b32.xlu1 %v3685_v6, %s3897_s19  ;;  %226 = vmatpush1.bf16.msra.mxu0 %v198_v8 }
  0x1a   :  { %396 = vst [vmem:[#allocation2 + $0x38] sm:$0x7] %v3611_v11  ;;  %413 = vst [vmem:[#allocation2 + $0x40] sm:$0x7] %v3614_v12  ;;  %v4106_v27 = vld [vmem:[#allocation2 + $0x60] sm:$0xff]  ;;  %v4108_v28 = vld [vmem:[#allocation2 + $0x88] sm:$0xff]  ;;  %v3647_v43 = vcombine.high %v4100_v23, %v4100_v23  ;;  %v3646_v48 = vcombine.low %v4100_v23, %v4100_v23  ;;  %227 = vmatprep.subr.bf16.mxu0 %v203_v13 }
  0x1b   :  { %v4113_v29 = vld [vmem:[%s5541_s0 + $0x6c] sm:$0x77]  ;;  %395 = vst [vmem:[#allocation2 + $0x30] sm:$0x7] %v3610_v17  ;;  %435 = vst [vmem:[#allocation2 + $0x68] sm:$0x7] %v3621_v18  ;;  %269 = vmatpush1.bf16.msra.mxu1 %v200_v19 }
  0x1c   :  { %v4118_v30 = vld [vmem:[%s5541_s0 + $0x28] sm:$0x77]  ;;  %v205_v31 = vld [vmem:[#allocation2 + $0x58] sm:$0xff]  ;;  %456 = vst [vmem:[#allocation2 + $0x88] sm:$0x7] %v3627_v10  ;;  %v4120_v32 = vld [vmem:[#allocation2 + $0x80] sm:$0xff]  ;;  %v3643_v47 = vcombine.high %v4113_v29, %v4113_v29  ;;  %v3642_v58 = vcombine.low %v4113_v29, %v4113_v29  ;;  %981 = vrot.lane.b32.xlu0 %v3683_v25, %s3897_s19 }
  0x1d   :  { %v4133_v37 = vld [vmem:[%s5541_s0 + $0x8c] sm:$0x77]  ;;  %434 = vst [vmem:[#allocation2 + $0x60] sm:$0x7] %v3620_v24  ;;  %455 = vst [vmem:[#allocation2 + $0x80] sm:$0x7] %v3626_v16  ;;  %270 = vmatprep.subr.bf16.mxu1 %v205_v31  ;;  %987 = vrot.lane.b32.xlu1 %v3686_v26, %s3897_s19  ;;  %v3692_v5 = vcombine.high %v4118_v30, %v4118_v30  ;;  %v3691_v11 = vcombine.low %v4118_v30, %v4118_v30 }
  0x1e   :  { %v4137_v38 = vld [vmem:[#allocation2 + $0x98] sm:$0xff]  ;;  %v4139_v39 = vld [vmem:[#allocation2 + $0x90] sm:$0xff]  ;;  %v3771_v52 = vld [vmem:[%s5541_s0 + $0x24] ss:$0 sps:$4 sm:$0x77]   ;;  %v3653_v59 = vcombine.high %v4133_v37, %v4133_v37  ;;  %v3652_v1 = vcombine.low %v4133_v37, %v4133_v37  ;;  %228 = vmatpush1.bf16.msra.mxu0 %v4087_v15 }
  0x1f   :  { %v3613_v44 = vld [vmem:[%s5541_s0 + $0x58] sm:$0x77]  ;;  %v204_v45 = vld [vmem:[#allocation2 + $0x50] sm:$0xff]  ;;  %458 = vst [vmem:[#allocation2 + $0x98] sm:$0x7] %v3629_v21  ;;  %v4167_v55 = vld [vmem:[#allocation2 + $0x8] sm:$0xff]  ;;  %229 = vmatprep.subr.bf16.mxu0 %v4091_v20 }
  0x20   :  { %v209_v46 = vld [vmem:[#allocation2 + $0x78] sm:$0xff]  ;;  %457 = vst [vmem:[#allocation2 + $0x90] sm:$0x7] %v3628_v22  ;;  %v3617_v49 = vcombine.high %v3613_v44, %v3613_v44  ;;  %v3616_v50 = vcombine.low %v3613_v44, %v3613_v44  ;;  %v3619_v51 = vld [vmem:[%s5541_s0 + $0x6c] sm:$0x77]  ;;  %v4169_v56 = vld [vmem:[#allocation2] sm:$0xff]  ;;  %271 = vmatpush1.bf16.msra.mxu1 %v204_v45  ;;  %989 = vrot.lane.b32.xlu0 %v3771_v52, %s3897_s19 }
  0x21   :  { %v4163_v53 = vld [vmem:[%s5541_s0 + $0x30] sm:$0x77]  ;;  %v4171_v57 = vld [vmem:[#allocation2 + $0x28] sm:$0xff]  ;;  %v4180_v60 = vld [vmem:[%s5541_s0 + $0x80] sm:$0x77]  ;;  %v3623_v61 = vcombine.high %v3619_v51, %v3619_v51  ;;  %v3622_v3 = vcombine.low %v3619_v51, %v3619_v51  ;;  %272 = vmatprep.subr.bf16.mxu1 %v209_v46  ;;  %1021 = vrot.lane.b32.xlu1 %v3692_v5, %s3897_s19 }
  0x22   :  { %v4165_v54 = vld [vmem:[#allocation2 + $0x70] sm:$0xff]  ;;  %630 = vst [vmem:[#allocation2 + $0x8] sm:$0x7] %v3635_v33  ;;  %629 = vst [vmem:[#allocation2] sm:$0x7] %v3634_v34  ;;  %v4182_v62 = vld [vmem:[#allocation2 + $0x18] sm:$0xff]  ;;  %v3693_v14 = vcombine.low %v4163_v53, %v4163_v53  ;;  %v3649_v15 = vcombine.high %v4180_v60, %v4180_v60  ;;  %v3648_v16 = vcombine.low %v4180_v60, %v4180_v60  ;;  %230 = vmatpush1.bf16.msra.mxu0 %v4106_v27 }
  0x23   :  { %650 = vst [vmem:[#allocation2 + $0x28] sm:$0x7] %v3641_v35  ;;  %v4184_v63 = vld [vmem:[#allocation2 + $0x20] sm:$0xff]  ;;  %v4186_v0 = vld [vmem:[#allocation2 + $0x10] sm:$0xff]  ;;  %416 = vst [vmem:[#allocation2 + $0x58] sm:$0x7] %v3617_v49  ;;  %231 = vmatprep.subr.bf16.mxu0 %v4108_v28  ;;  %v3694_v28 = vcombine.high %v4163_v53, %v4163_v53 }
  0x24   :  { %415 = vst [vmem:[#allocation2 + $0x50] sm:$0x7] %v3616_v50  ;;  %v4193_v2 = vld [vmem:[%s5541_s0 + $0x94] sm:$0x77]  ;;  %632 = vst [vmem:[#allocation2 + $0x18] sm:$0x7] %v3637_v36  ;;  %273 = vmatpush1.bf16.msra.mxu1 %v4165_v54  ;;  %1023 = vrot.lane.b32.xlu0 %v3693_v14, %s3897_s19 }
  0x25   :  { %649 = vst [vmem:[#allocation2 + $0x20] sm:$0x7] %v3640_v40  ;;  %631 = vst [vmem:[#allocation2 + $0x10] sm:$0x7] %v3636_v41  ;;  %v4202_v6 = vld [vmem:[#allocation2 + $0x48] sm:$0xff]  ;;  %v4204_v7 = vld [vmem:[#allocation2 + $0x38] sm:$0xff]  ;;  %v3655_v20 = vcombine.high %v4193_v2, %v4193_v2  ;;  %v3654_v23 = vcombine.low %v4193_v2, %v4193_v2  ;;  %274 = vmatprep.subr.bf16.mxu1 %v4137_v38  ;;  %1019 = vrot.lane.b32.xlu1 %v3691_v11, %s3897_s19 }
  0x26   :  { %v4206_v8 = vld [vmem:[#allocation2 + $0x40] sm:$0xff]  ;;  %437 = vst [vmem:[#allocation2 + $0x78] sm:$0x7] %v3623_v61  ;;  %670 = vst [vmem:[#allocation2 + $0x48] sm:$0x7] %v3647_v43  ;;  %v4209_v42 = vld [vmem:[#allocation2 + $0x30] sm:$0xff]  ;;  %232 = vmatpush1.bf16.msra.mxu0 %v4120_v32 }
  0x27   :  { %652 = vst [vmem:[#allocation2 + $0x38] sm:$0x7] %v3643_v47  ;;  %669 = vst [vmem:[#allocation2 + $0x40] sm:$0x7] %v3646_v48  ;;  %v4211_v9 = vld [vmem:[#allocation2 + $0x68] sm:$0xff]  ;;  %v4219_v12 = vld [vmem:[#allocation2 + $0x60] sm:$0xff]  ;;  %479 = vmatprep.subr.bf16.mxu0 %v4167_v55 }
  0x28   :  { %436 = vst [vmem:[#allocation2 + $0x70] sm:$0x7] %v3622_v3  ;;  %v3663_v10 = vld [vmem:[%s5541_s0 + $0x78] sm:$0x77]  ;;  %651 = vst [vmem:[#allocation2 + $0x30] sm:$0x7] %v3642_v58  ;;  %275 = vmatpush1.bf16.msra.mxu1 %v4139_v39  ;;  %1025 = vrot.lane.b32.xlu0 %v3694_v28, %s3897_s19 }
  0x29   :  { %691 = vst [vmem:[#allocation2 + $0x68] sm:$0x7] %v3653_v59  ;;  %v3669_v13 = vld [vmem:[%s5541_s0 + $0x8c] sm:$0x77]  ;;  %690 = vst [vmem:[#allocation2 + $0x60] sm:$0x7] %v3652_v1  ;;  %v3666_v17 = vcombine.high %v3663_v10, %v3663_v10  ;;  %v3665_v21 = vcombine.low %v3663_v10, %v3663_v10  ;;  %522 = vmatprep.subr.bf16.mxu1 %v4182_v62 }
  0x2a   :  { %v3664_v18 = vld [vmem:[%s5541_s0 + $0x80] sm:$0x77]  ;;  %v3670_v19 = vld [vmem:[%s5541_s0 + $0x94] sm:$0x77]  ;;  %v3672_v22 = vcombine.high %v3669_v13, %v3669_v13  ;;  %v3671_v25 = vcombine.low %v3669_v13, %v3669_v13  ;;  %v4248_v31 = vld [vmem:[#allocation2 + $0x8] sm:$0xff] }
  0x2b   :  { %v3668_v24 = vcombine.high %v3664_v18, %v3664_v18  ;;  %v3776_v26 = vld [vmem:[%s5541_s0 + $0x38] ss:$0 sps:$4 sm:$0x77]   ;;  %v469_v30 = vld [vmem:[#allocation2 + $0x50] sm:$0xff]  ;;  %v3667_v33 = vcombine.low %v3664_v18, %v3664_v18  ;;  %v3674_v34 = vcombine.high %v3670_v19, %v3670_v19  ;;  %904 = vst [vmem:[#allocation2 + $0x8] sm:$0x7] %v3666_v17  ;;  %v3673_v37 = vcombine.low %v3670_v19, %v3670_v19 }
  0x2c   :  { %v470_v29 = vld [vmem:[#allocation2 + $0x58] sm:$0xff]  ;;  %671 = vst [vmem:[#allocation2 + $0x50] sm:$0x7] %v3648_v16  ;;  %v733_v35 = vld [vmem:[#allocation2] sm:$0xff]  ;;  %v738_v36 = vld [vmem:[#allocation2 + $0x28] sm:$0xff]  ;;  %1027 = vrot.lane.b32.xlu1 %v3776_v26, %s3897_s19 }
  0x2d   :  { %672 = vst [vmem:[#allocation2 + $0x58] sm:$0x7] %v3649_v15  ;;  %v474_v27 = vld [vmem:[#allocation2 + $0x78] sm:$0xff]  ;;  %903 = vst [vmem:[#allocation2] sm:$0x7] %v3665_v21  ;;  %v737_v38 = vld [vmem:[#allocation2 + $0x20] sm:$0xff] }
  0x2e   :  { %693 = vst [vmem:[#allocation2 + $0x78] sm:$0x7] %v3655_v20  ;;  %924 = vst [vmem:[#allocation2 + $0x28] sm:$0x7] %v3672_v22  ;;  %v736_v41 = vld [vmem:[#allocation2 + $0x18] sm:$0xff]  ;;  %v735_v44 = vld [vmem:[#allocation2 + $0x10] sm:$0xff] }
  0x2f   :  { %v473_v40 = vld [vmem:[#allocation2 + $0x70] sm:$0xff]  ;;  %906 = vst [vmem:[#allocation2 + $0x18] sm:$0x7] %v3668_v24  ;;  %923 = vst [vmem:[#allocation2 + $0x20] sm:$0x7] %v3671_v25  ;;  %v740_v45 = vld [vmem:[#allocation2 + $0x38] sm:$0xff] }
  0x30   :  { %v4259_v43 = vld [vmem:[%s5542_s1] ss:$16 sps:$4 sm:$0xff]   ;;  %692 = vst [vmem:[#allocation2 + $0x70] sm:$0x7] %v3654_v23  ;;  %905 = vst [vmem:[#allocation2 + $0x10] sm:$0x7] %v3667_v33 }
  0x31   :  { %926 = vst [vmem:[#allocation2 + $0x38] sm:$0x7] %v3674_v34  ;;  %v739_v46 = vld [vmem:[#allocation2 + $0x30] sm:$0xff] }
  0x32   :  { %925 = vst [vmem:[#allocation2 + $0x30] sm:$0x7] %v3673_v37 }
  0x33   :  { %9 = vsyncpa [#allocation6], 0  ;;  %3598 = vmatmul.mubr.msk.bf16.vlgmr.msra.gmra.mrb[0].mxu0 %vm219_vm0, %v4259_v43  ;;  %3599 = vmatmul.mubr.msk.bf16.vlgmr.msra.gmra.mrb[0].mxu1 %vm219_vm0, %v4259_v43  ;;  %v476_v32 = vld [vmem:[#allocation2 + $0x88] sm:$0xff]  ;;  %v478_v39 = vld [vmem:[#allocation2 + $0x98] sm:$0xff]  ;;  %vm720_vm1 = vcmask 1039360   ;;  %s3900_s8 = smov 1  }
  0x34   :  { %480 = vmatpush1.bf16.msra.mxu0 %v4169_v56  ;;  %523 = vmatpush1.bf16.msra.mxu1 %v4186_v0  ;;  %v475_v47 = vld [vmem:[#allocation2 + $0x80] sm:$0xff]  ;;  %v477_v48 = vld [vmem:[#allocation2 + $0x90] sm:$0xff]  ;;  %v742_v49 = vld [vmem:[#allocation2 + $0x48] sm:$0xff]  ;;  %s3903_s17 = smov 126   ;;  %vm2988_vm6 = vcmask 261120   ;;  %vm2905_vm7 = vcmask 1031168  }
  0x35   :  { %481 = vmatprep.subr.bf16.mxu0 %v4171_v57  ;;  %524 = vmatprep.subr.bf16.mxu1 %v4204_v7  ;;  %v744_v50 = vld [vmem:[#allocation2 + $0x58] sm:$0xff]  ;;  %v741_v51 = vld [vmem:[#allocation2 + $0x40] sm:$0xff]  ;;  %v743_v52 = vld [vmem:[#allocation2 + $0x50] sm:$0xff]  ;;  %s3906_s25 = smov 122   ;;  %s3908_s28 = smov 124   ;;  %vm3356_vm10 = vcmask 0  }
  0x36   :  { %511 = vmatprep.mubr.bf16.mxu0 %v5548_v4  ;;  %554 = vmatprep.mubr.bf16.mxu1 %v5548_v4  ;;  %v746_v53 = vld [vmem:[#allocation2 + $0x68] sm:$0xff]  ;;  %v748_v54 = vld [vmem:[#allocation2 + $0x78] sm:$0xff]  ;;  %v745_v55 = vld [vmem:[#allocation2 + $0x60] sm:$0xff]  ;;  %vm3437_vm11 = vcmask 8200   ;;  %vm3518_vm12 = vcmask 16400  }
  0x37   :  { %v747_v56 = vld [vmem:[#allocation2 + $0x70] sm:$0xff]  ;;  %v1046_v16 = vld [vmem:[#allocation2 + $0x28] sm:$0xff]  ;;  %v1044_v17 = vld [vmem:[#allocation2 + $0x18] sm:$0xff] }
  0x38   :  { %482 = vmatpush1.bf16.msra.mxu0 %v4184_v63  ;;  %525 = vmatpush1.bf16.msra.mxu1 %v4209_v42  ;;  %v1042_v42 = vld [vmem:[#allocation2 + $0x8] sm:$0xff]  ;;  %v1045_v21 = vld [vmem:[#allocation2 + $0x20] sm:$0xff]  ;;  %v1043_v22 = vld [vmem:[#allocation2 + $0x10] sm:$0xff] }
  0x39   :  { %483 = vmatprep.subr.bf16.mxu0 %v4202_v6  ;;  %526 = vmatprep.subr.bf16.mxu1 %v470_v29  ;;  %v1048_v24 = vld [vmem:[#allocation2 + $0x38] sm:$0xff] }
  0x3c   :  { %484 = vmatpush1.bf16.msra.mxu0 %v4206_v8  ;;  %527 = vmatpush1.bf16.msra.mxu1 %v469_v30  ;;  %v1047_v30 = vld [vmem:[#allocation2 + $0x30] sm:$0xff] }
  0x3d   :  { %485 = vmatprep.subr.bf16.mxu0 %v4211_v9  ;;  %528 = vmatprep.subr.bf16.mxu1 %v474_v27 }
  0x40   :  { %486 = vmatpush1.bf16.msra.mxu0 %v4219_v12  ;;  %529 = vmatpush1.bf16.msra.mxu1 %v473_v40  ;;  %v1041_v12 = vld [vmem:[#allocation2] sm:$0xff] }
  0x41   :  { %487 = vmatprep.subr.bf16.mxu0 %v476_v32  ;;  %530 = vmatprep.subr.bf16.mxu1 %v478_v39 }
  0x44   :  { %488 = vmatpush1.bf16.msra.mxu0 %v475_v47  ;;  %531 = vmatpush1.bf16.msra.mxu1 %v477_v48 }
  0x45   :  { %753 = vmatprep.subr.bf16.mxu0 %v4248_v31  ;;  %796 = vmatprep.subr.bf16.mxu1 %v736_v41 }
  0x47   :  { %3630 = vmatmul.mubr.msk.bf16.vlgmr.msra.gmra.mrb[4].mxu0 %vm219_vm0, %v4259_v43  ;;  %3631 = vmatmul.mubr.msk.bf16.vlgmr.msra.gmra.mrb[4].mxu1 %vm219_vm0, %v4259_v43 }
  0x48   :  { %754 = vmatpush1.bf16.msra.mxu0 %v733_v35  ;;  %797 = vmatpush1.bf16.msra.mxu1 %v735_v44 }
  0x49   :  { %755 = vmatprep.subr.bf16.mxu0 %v738_v36  ;;  %798 = vmatprep.subr.bf16.mxu1 %v740_v45 }
  0x4a   :  { %785 = vmatprep.mubr.bf16.mxu0 %v5548_v4  ;;  %828 = vmatprep.mubr.bf16.mxu1 %v5548_v4 }
  0x4c   :  { %756 = vmatpush1.bf16.msra.mxu0 %v737_v38  ;;  %799 = vmatpush1.bf16.msra.mxu1 %v739_v46 }
  0x4d   :  { %757 = vmatprep.subr.bf16.mxu0 %v742_v49  ;;  %800 = vmatprep.subr.bf16.mxu1 %v744_v50 }
  0x50   :  { %758 = vmatpush1.bf16.msra.mxu0 %v741_v51  ;;  %801 = vmatpush1.bf16.msra.mxu1 %v743_v52 }
  0x51   :  { %759 = vmatprep.subr.bf16.mxu0 %v746_v53  ;;  %802 = vmatprep.subr.bf16.mxu1 %v748_v54 }
  0x54   :  { %760 = vmatpush1.bf16.msra.mxu0 %v745_v55  ;;  %803 = vmatpush1.bf16.msra.mxu1 %v747_v56  ;;  %v73_v55 = vlaneseq }
  0x56   :  { %v74_v56 = vand.u32 127, %v73_v55 }
  0x76   :  { %v713_v57 = vpop.permute.xlu0 %712  ;;  %v711_v58 = vpop.permute.xlu1 %710 }
  0x77   :  { %v721_v59 = vsel %vm720_vm1, %v711_v58, %v713_v57  ;;  %v77_v58 = vadd.s32 384, %v74_v56 }
  0x78   :  { %729 = vst [vmem:[#allocation2 + $0x80] sm:$0x7] %v721_v59 }
  0x7a   :  { %v715_v60 = vpop.permute.xlu0 %714  ;;  %v717_v61 = vpop.permute.xlu1 %716 }
  0x7b   :  { %v722_v62 = vsel %vm720_vm1, %v713_v57, %v715_v60  ;;  %v723_v63 = vsel %vm720_vm1, %v715_v60, %v717_v61  ;;  %v75_v57 = vadd.s32 128, %v74_v56  ;;  %v4319_v60 = vand.u32 255, %v77_v58 }
  0x7c   :  { %730 = vst [vmem:[#allocation2 + $0x88] sm:$0x7] %v722_v62  ;;  %731 = vst [vmem:[#allocation2 + $0x90] sm:$0x7] %v723_v63 }
  0x7d   :  { %v4317_v59 = vand.u32 255, %v75_v57  ;;  %5553 = vst [vmem:[#allocation8_spill] sm:$0xff] %v4319_v60  ;;  %vm85_vm3 = vcmp.lt.s32.totalorder %v4319_v60, 225 }
  0x7e   :  { %v719_v0 = vpop.permute.xlu0 %718  ;;  %v946_v1 = vpop.permute.xlu1 %945 }
  0x7f   :  { %v724_v2 = vsel %vm720_vm1, %v717_v61, %v719_v0  ;;  %v749_v9 = vld [vmem:[#allocation2 + $0x80] sm:$0xff]  ;;  %vm83_vm2 = vcmp.lt.s32.totalorder %v4317_v59, 225  ;;  %v5546_v61 = vmov 0.0   ;;  %vm1222_vm4 = vcmp.lt.s32.totalorder %v4317_v59, 224 }
  0x80   :  { %732 = vst [vmem:[#allocation2 + $0x98] sm:$0x7] %v724_v2  ;;  %v4324_v62 = vsel %vm83_vm2, 1.0, %v5546_v61  ;;  %v4331_v0 = vsel %vm85_vm3, 1.0, %v5546_v61  ;;  %vm2290_vm8 = vcmp.lt.s32.totalorder %v4317_v59, 222 }
  0x82   :  { %v948_v3 = vpop.permute.xlu0 %947  ;;  %v944_v5 = vpop.permute.xlu1 %943 }
  0x83   :  { %v954_v6 = vsel %vm720_vm1, %v946_v1, %v948_v3  ;;  %v953_v7 = vsel %vm720_vm1, %v944_v5, %v946_v1  ;;  %v750_v8 = vld [vmem:[#allocation2 + $0x88] sm:$0xff]  ;;  %v751_v18 = vld [vmem:[#allocation2 + $0x90] sm:$0xff] }
  0x84   :  { %962 = vst [vmem:[#allocation2 + $0x48] sm:$0x7] %v954_v6  ;;  %961 = vst [vmem:[#allocation2 + $0x40] sm:$0x7] %v953_v7  ;;  %761 = vmatprep.subr.bf16.mxu0 %v750_v8 }
  0x85   :  { %762 = vmatpush1.bf16.msra.mxu0 %v749_v9 }
  0x86   :  { %v950_v10 = vpop.permute.xlu0 %949  ;;  %1061 = vmatprep.subr.bf16.mxu0 %v1042_v42 }
  0x87   :  { %v952_v11 = vpop.permute.xlu1 %951  ;;  %v955_v13 = vsel %vm720_vm1, %v948_v3, %v950_v10  ;;  %v752_v15 = vld [vmem:[#allocation2 + $0x98] sm:$0xff] }
  0x88   :  { %v956_v14 = vsel %vm720_vm1, %v950_v10, %v952_v11  ;;  %963 = vst [vmem:[#allocation2 + $0x50] sm:$0x7] %v955_v13  ;;  %3661 = vmatmul.mubr.msk.bf16.vlgmr.msra.gmra.mrb[8].mxu0 %vm219_vm0, %v4259_v43  ;;  %804 = vmatprep.subr.bf16.mxu1 %v752_v15 }
  0x89   :  { %964 = vst [vmem:[#allocation2 + $0x58] sm:$0x7] %v956_v14  ;;  %805 = vmatpush1.bf16.msra.mxu1 %v751_v18  ;;  %1062 = vmatpush1.bf16.msra.mxu0 %v1041_v12 }
  0x8a   :  { %v984_v19 = vpop.permute.xlu0 %983  ;;  %1063 = vmatprep.subr.bf16.mxu0 %v1046_v16  ;;  %1104 = vmatprep.subr.bf16.mxu1 %v1044_v17 }
  0x8b   :  { %v986_v20 = vpop.permute.xlu1 %985  ;;  %1093 = vmatprep.mubr.bf16.mxu0 %v5548_v4  ;;  %v1050_v25 = vld [vmem:[#allocation2 + $0x48] sm:$0xff]  ;;  %v1049_v34 = vld [vmem:[#allocation2 + $0x40] sm:$0xff] }
  0x8c   :  { %v992_v23 = vsel %vm720_vm1, %v984_v19, %v986_v20  ;;  %3662 = vmatmul.mubr.msk.bf16.vlgmr.msra.gmra.mrb[8].mxu1 %vm219_vm0, %v4259_v43 }
  0x8d   :  { %1000 = vst [vmem:[#allocation2 + $0x68] sm:$0x7] %v992_v23  ;;  %1064 = vmatpush1.bf16.msra.mxu0 %v1045_v21  ;;  %1105 = vmatpush1.bf16.msra.mxu1 %v1043_v22 }
  0x8e   :  { %v982_v26 = vpop.permute.xlu0 %981  ;;  %1065 = vmatprep.subr.bf16.mxu0 %v1050_v25  ;;  %1106 = vmatprep.subr.bf16.mxu1 %v1048_v24 }
  0x8f   :  { %v988_v29 = vpop.permute.xlu1 %987  ;;  %v991_v31 = vsel %vm720_vm1, %v982_v26, %v984_v19  ;;  %1136 = vmatprep.mubr.bf16.mxu1 %v5548_v4  ;;  %v1051_v40 = vld [vmem:[#allocation2 + $0x50] sm:$0xff] }
  0x90   :  { %v993_v33 = vsel %vm720_vm1, %v986_v20, %v988_v29  ;;  %999 = vst [vmem:[#allocation2 + $0x60] sm:$0x7] %v991_v31  ;;  %v1052_v27 = vld [vmem:[#allocation2 + $0x58] sm:$0xff] }
  0x91   :  { %1001 = vst [vmem:[#allocation2 + $0x70] sm:$0x7] %v993_v33  ;;  %1066 = vmatpush1.bf16.msra.mxu0 %v1049_v34  ;;  %1107 = vmatpush1.bf16.msra.mxu1 %v1047_v30 }
  0x92   :  { %v990_v35 = vpop.permute.xlu0 %989  ;;  %1108 = vmatprep.subr.bf16.mxu1 %v1052_v27 }
  0x93   :  { %v1022_v36 = vpop.permute.xlu1 %1021  ;;  %v994_v37 = vsel %vm720_vm1, %v988_v29, %v990_v35 }
  0x94   :  { %v1054_v28 = vld [vmem:[#allocation2 + $0x68] sm:$0xff]  ;;  %1002 = vst [vmem:[#allocation2 + $0x78] sm:$0x7] %v994_v37 }
  0x95   :  { %1067 = vmatprep.subr.bf16.mxu0 %v1054_v28  ;;  %1109 = vmatpush1.bf16.msra.mxu1 %v1051_v40 }
  0x96   :  { %v1024_v41 = vpop.permute.xlu0 %1023 }
  0x97   :  { %v1020_v38 = vpop.permute.xlu1 %1019  ;;  %v1030_v44 = vsel %vm720_vm1, %v1022_v36, %v1024_v41  ;;  %v1053_v46 = vld [vmem:[#allocation2 + $0x60] sm:$0xff] }
  0x98   :  { %v1029_v45 = vsel %vm720_vm1, %v1020_v38, %v1022_v36  ;;  %1038 = vst [vmem:[#allocation2 + $0x88] sm:$0x7] %v1030_v44  ;;  %1068 = vmatpush1.bf16.msra.mxu0 %v1053_v46  ;;  %v1055_v50 = vld [vmem:[#allocation2 + $0x70] sm:$0xff] }
  0x99   :  { %1037 = vst [vmem:[#allocation2 + $0x80] sm:$0x7] %v1029_v45 }
  0x9a   :  { %v1026_v32 = vpop.permute.xlu0 %1025 }
  0x9b   :  { %v1031_v47 = vsel %vm720_vm1, %v1024_v41, %v1026_v32  ;;  %v1056_v49 = vld [vmem:[#allocation2 + $0x78] sm:$0xff] }
  0x9c   :  { %1039 = vst [vmem:[#allocation2 + $0x90] sm:$0x7] %v1031_v47  ;;  %1110 = vmatprep.subr.bf16.mxu1 %v1056_v49 }
  0x9d   :  { %1111 = vmatpush1.bf16.msra.mxu1 %v1055_v50 }
  0x9e   :  { %v1028_v39 = vpop.permute.xlu1 %1027 }
  0x9f   :  { %v1032_v48 = vsel %vm720_vm1, %v1026_v32, %v1028_v39  ;;  %v1058_v51 = vld [vmem:[#allocation2 + $0x88] sm:$0xff] }
  0xa0   :  { %1040 = vst [vmem:[#allocation2 + $0x98] sm:$0x7] %v1032_v48  ;;  %v1057_v52 = vld [vmem:[#allocation2 + $0x80] sm:$0xff]  ;;  %1069 = vmatprep.subr.bf16.mxu0 %v1058_v51 }
  0xa1   :  { %1070 = vmatpush1.bf16.msra.mxu0 %v1057_v52 }
  0xa3   :  { %v1059_v54 = vld [vmem:[#allocation2 + $0x90] sm:$0xff] }
  0xa4   :  { %3696 = vmatmul.mubr.msk.bf16.vlgmr.msra.gmra.mrb[12].mxu0 %vm219_vm0, %v4259_v43 }
  0xa5   :  { %1549 = vmatprep.mubr.bf16.mxu0 %v5548_v4 }
  0xa7   :  { %v1060_v53 = vld [vmem:[#allocation2 + $0x98] sm:$0xff] }
  0xa8   :  { %1112 = vmatprep.subr.bf16.mxu1 %v1060_v53 }
  0xa9   :  { %1113 = vmatpush1.bf16.msra.mxu1 %v1059_v54 }
  0xac   :  { %3697 = vmatmul.mubr.msk.bf16.vlgmr.msra.gmra.mrb[12].mxu1 %vm219_vm0, %v4259_v43 }
  0xad   :  { %1602 = vmatprep.mubr.bf16.mxu1 %v5548_v4 }
 0x106   :  { %v4326_v63 = vpop.f32.mrb[0].mxu0  ;;  %v4328_v43 = vpop.f32.mrb[0].mxu1 }
 0x107   :  { %v259_v1 = vpop.f32.mrb[1].mxu0  ;;  %v302_v2 = vpop.f32.mrb[1].mxu1  ;;  %v329_v7 = vmul.f32 %v4326_v63, %v4326_v63  ;;  %v331_v15 = vmul.f32 %v4328_v43, %v4328_v43 }
 0x108   :  { %v4334_v3 = vmul.f32 %v259_v1, %v4324_v62  ;;  %v4336_v5 = vpop.f32.mrb[2].mxu0  ;;  %v4338_v6 = vpop.f32.mrb[2].mxu1  ;;  %v4345_v9 = vmul.f32 %v302_v2, %v4331_v0 }
 0x109   :  { %v333_v8 = vmul.f32 %v4336_v5, %v4336_v5  ;;  %v263_v42 = vpop.f32.mrb[3].mxu0  ;;  %v306_v10 = vpop.f32.mrb[3].mxu1  ;;  %v335_v18 = vmul.f32 %v4338_v6, %v4338_v6 }
 0x10a   :  { %v317_v11 = vadd.f32 %v4334_v3, %v4326_v63  ;;  %v330_v12 = vmul.f32 %v4334_v3, %v4334_v3  ;;  %v4352_v13 = vmul.f32 %v263_v42, %v4324_v62  ;;  %v4355_v14 = vmul.f32 %v306_v10, %v4331_v0 }
 0x10b   :  { %v332_v20 = vmul.f32 %v4345_v9, %v4345_v9 }
 0x10c   :  { %v322_v16 = vadd.f32 %v4352_v13, %v4336_v5  ;;  %v334_v17 = vmul.f32 %v4352_v13, %v4352_v13  ;;  %v318_v19 = vadd.f32 %v317_v11, %v4328_v43  ;;  %v337_v21 = vadd.f32 %v330_v12, %v329_v7 }
 0x10d   :  { %v336_v23 = vmul.f32 %v4355_v14, %v4355_v14 }
 0x10e   :  { %v319_v22 = vadd.f32 %v318_v19, %v4345_v9  ;;  %v342_v24 = vadd.f32 %v334_v17, %v333_v8  ;;  %v323_v25 = vadd.f32 %v322_v16, %v4338_v6  ;;  %v338_v26 = vadd.f32 %v337_v21, %v331_v15 }
 0x110   :  { %320 = vadd.xlane.f32.xlu0 %v319_v22  ;;  %v343_v29 = vadd.f32 %v342_v24, %v335_v18  ;;  %v324_v30 = vadd.f32 %v323_v25, %v4355_v14  ;;  %v339_v33 = vadd.f32 %v338_v26, %v332_v20 }
 0x112   :  { %v344_v31 = vadd.f32 %v343_v29, %v336_v23  ;;  %325 = vadd.xlane.f32.xlu1 %v324_v30 }
 0x114   :  { %345 = vadd.xlane.f32.xlu0 %v344_v31 }
 0x116   :  { %340 = vadd.xlane.f32.xlu1 %v339_v33 }
 0x11a   :  { %v4373_v34 = vpop.f32.mrb[4].mxu0  ;;  %v4375_v27 = vpop.f32.mrb[4].mxu1 }
 0x11b   :  { %v515_v35 = vpop.f32.mrb[5].mxu0  ;;  %v558_v36 = vpop.f32.mrb[5].mxu1  ;;  %v585_v41 = vmul.f32 %v4373_v34, %v4373_v34  ;;  %v587_v48 = vmul.f32 %v4375_v27, %v4375_v27 }
 0x11c   :  { %v4378_v37 = vmul.f32 %v515_v35, %v4324_v62  ;;  %v4380_v28 = vpop.f32.mrb[6].mxu0  ;;  %v4382_v40 = vpop.f32.mrb[6].mxu1  ;;  %v4387_v44 = vmul.f32 %v558_v36, %v4331_v0 }
 0x11d   :  { %v519_v38 = vpop.f32.mrb[7].mxu0  ;;  %v562_v45 = vpop.f32.mrb[7].mxu1  ;;  %v589_v39 = vmul.f32 %v4380_v28, %v4380_v28  ;;  %v591_v49 = vmul.f32 %v4382_v40, %v4382_v40 }
 0x11e   :  { %v573_v46 = vadd.f32 %v4378_v37, %v4373_v34  ;;  %v586_v32 = vmul.f32 %v4378_v37, %v4378_v37  ;;  %v4396_v47 = vmul.f32 %v519_v38, %v4324_v62  ;;  %v4407_v52 = vmul.f32 %v562_v45, %v4331_v0 }
 0x11f   :  { %v588_v54 = vmul.f32 %v4387_v44, %v4387_v44 }
 0x120   :  { %v578_v50 = vadd.f32 %v4396_v47, %v4380_v28  ;;  %v590_v51 = vmul.f32 %v4396_v47, %v4396_v47  ;;  %v574_v53 = vadd.f32 %v573_v46, %v4375_v27  ;;  %v593_v55 = vadd.f32 %v586_v32, %v585_v41 }
 0x121   :  { %v592_v7 = vmul.f32 %v4407_v52, %v4407_v52 }
 0x122   :  { %v575_v56 = vadd.f32 %v574_v53, %v4387_v44  ;;  %v579_v57 = vadd.f32 %v578_v50, %v4382_v40  ;;  %v598_v58 = vadd.f32 %v590_v51, %v589_v39  ;;  %v594_v1 = vadd.f32 %v593_v55, %v587_v48 }
 0x124   :  { %576 = vadd.xlane.f32.xlu0 %v575_v56  ;;  %v580_v2 = vadd.f32 %v579_v57, %v4407_v52  ;;  %v599_v8 = vadd.f32 %v598_v58, %v591_v49  ;;  %v595_v42 = vadd.f32 %v594_v1, %v588_v54 }
 0x126   :  { %596 = vadd.xlane.f32.xlu1 %v595_v42  ;;  %v600_v10 = vadd.f32 %v599_v8, %v592_v7 }
 0x128   :  { %581 = vadd.xlane.f32.xlu0 %v580_v2 }
 0x12c   :  { %601 = vadd.xlane.f32.xlu0 %v600_v10 }
 0x15b   :  { %v4417_v11 = vpop.f32.mrb[8].mxu0 }
 0x15c   :  { %v789_v12 = vpop.f32.mrb[9].mxu0  ;;  %v859_v17 = vmul.f32 %v4417_v11, %v4417_v11 }
 0x15d   :  { %v4420_v15 = vmul.f32 %v789_v12, %v4324_v62  ;;  %v4422_v16 = vpop.f32.mrb[10].mxu0 }
 0x15e   :  { %v793_v18 = vpop.f32.mrb[11].mxu0  ;;  %v863_v23 = vmul.f32 %v4422_v16, %v4422_v16 }
 0x15f   :  { %v847_v19 = vadd.f32 %v4420_v15, %v4417_v11  ;;  %v860_v20 = vmul.f32 %v4420_v15, %v4420_v15  ;;  %v4431_v21 = vmul.f32 %v793_v18, %v4324_v62  ;;  %v4433_v22 = vpop.f32.mrb[8].mxu1 }
 0x160   :  { %v861_v24 = vmul.f32 %v4433_v22, %v4433_v22  ;;  %v832_v25 = vpop.f32.mrb[9].mxu1 }
 0x161   :  { %v852_v26 = vadd.f32 %v4431_v21, %v4422_v16  ;;  %v864_v29 = vmul.f32 %v4431_v21, %v4431_v21  ;;  %v4444_v30 = vmul.f32 %v832_v25, %v4331_v0  ;;  %v4446_v31 = vpop.f32.mrb[10].mxu1  ;;  %v848_v33 = vadd.f32 %v847_v19, %v4433_v22 }
 0x162   :  { %v865_v35 = vmul.f32 %v4446_v31, %v4446_v31  ;;  %v836_v36 = vpop.f32.mrb[11].mxu1  ;;  %v867_v41 = vadd.f32 %v860_v20, %v859_v17 }
 0x163   :  { %v4452_v38 = vmul.f32 %v836_v36, %v4331_v0  ;;  %v849_v45 = vadd.f32 %v848_v33, %v4444_v30  ;;  %v853_v46 = vadd.f32 %v852_v26, %v4446_v31  ;;  %v862_v32 = vmul.f32 %v4444_v30, %v4444_v30 }
 0x164   :  { %v868_v39 = vadd.f32 %v867_v41, %v861_v24  ;;  %v872_v48 = vadd.f32 %v864_v29, %v863_v23 }
 0x165   :  { %850 = vadd.xlane.f32.xlu1 %v849_v45  ;;  %v854_v49 = vadd.f32 %v853_v46, %v4452_v38  ;;  %v866_v50 = vmul.f32 %v4452_v38, %v4452_v38 }
 0x166   :  { %v869_v51 = vadd.f32 %v868_v39, %v862_v32  ;;  %v873_v53 = vadd.f32 %v872_v48, %v865_v35 }
 0x167   :  { %855 = vadd.xlane.f32.xlu0 %v854_v49 }
 0x168   :  { %v874_v54 = vadd.f32 %v873_v53, %v866_v50 }
 0x169   :  { %870 = vadd.xlane.f32.xlu1 %v869_v51 }
 0x16b   :  { %875 = vadd.xlane.f32.xlu0 %v874_v54 }
 0x177   :  { %v4461_v55 = vpop.f32.mrb[12].mxu0 }
 0x178   :  { %v1097_v56 = vpop.f32.mrb[13].mxu0  ;;  %v1167_v10 = vmul.f32 %v4461_v55, %v4461_v55 }
 0x179   :  { %v4464_v57 = vmul.f32 %v1097_v56, %v4324_v62  ;;  %v4466_v58 = vpop.f32.mrb[14].mxu0 }
 0x17a   :  { %v1101_v1 = vpop.f32.mrb[15].mxu0  ;;  %v1171_v24 = vmul.f32 %v4466_v58, %v4466_v58 }
 0x17b   :  { %v1155_v2 = vadd.f32 %v4464_v57, %v4461_v55  ;;  %v1168_v7 = vmul.f32 %v4464_v57, %v4464_v57  ;;  %v4473_v8 = vmul.f32 %v1101_v1, %v4324_v62 }
 0x17d   :  { %v1160_v18 = vadd.f32 %v4473_v8, %v4466_v58  ;;  %v1172_v19 = vmul.f32 %v4473_v8, %v4473_v8  ;;  %v1175_v29 = vadd.f32 %v1168_v7, %v1167_v10 }
 0x17f   :  { %v4475_v42 = vpop.f32.mrb[12].mxu1  ;;  %v1180_v46 = vadd.f32 %v1172_v19, %v1171_v24 }
 0x180   :  { %v1169_v12 = vmul.f32 %v4475_v42, %v4475_v42  ;;  %v1140_v17 = vpop.f32.mrb[13].mxu1  ;;  %v1156_v23 = vadd.f32 %v1155_v2, %v4475_v42 }
 0x181   :  { %v4486_v20 = vmul.f32 %v1140_v17, %v4331_v0  ;;  %v4488_v62 = vpop.f32.mrb[14].mxu1 }
 0x182   :  { %v1173_v25 = vmul.f32 %v4488_v62, %v4488_v62  ;;  %v1144_v26 = vpop.f32.mrb[15].mxu1  ;;  %v1161_v36 = vadd.f32 %v1160_v18, %v4488_v62  ;;  %v1176_v45 = vadd.f32 %v1175_v29, %v1169_v12 }
 0x183   :  { %v4496_v33 = vmul.f32 %v1144_v26, %v4331_v0  ;;  %v1157_v35 = vadd.f32 %v1156_v23, %v4486_v20  ;;  %v1170_v41 = vmul.f32 %v4486_v20, %v4486_v20 }
 0x184   :  { %v1181_v48 = vadd.f32 %v1180_v46, %v1173_v25 }
 0x185   :  { %1158 = vadd.xlane.f32.xlu1 %v1157_v35  ;;  %v1162_v32 = vadd.f32 %v1161_v36, %v4496_v33  ;;  %v1174_v39 = vmul.f32 %v4496_v33, %v4496_v33  ;;  %v1177_v49 = vadd.f32 %v1176_v45, %v1170_v41 }
 0x187   :  { %1163 = vadd.xlane.f32.xlu0 %v1162_v32  ;;  %v1182_v0 = vadd.f32 %v1181_v48, %v1174_v39 }
 0x189   :  { %1178 = vadd.xlane.f32.xlu1 %v1177_v49 }
 0x18b   :  { %1183 = vadd.xlane.f32.xlu0 %v1182_v0 }
 0x19d   :  { %v321_v50 = vpop.xlane.xlu0 %320 }
 0x19f   :  { %v326_v53 = vpop.xlane.xlu1 %325 }
 0x1a1   :  { %v346_v51 = vpop.xlane.xlu0 %345 }
 0x1a3   :  { %v341_v56 = vpop.xlane.xlu1 %340 }
 0x1b1   :  { %v577_v54 = vpop.xlane.xlu0 %576 }
 0x1b2   :  { %v583_v18 = vadd.f32 %v577_v54, %v321_v50 }
 0x1b3   :  { %v597_v2 = vpop.xlane.xlu1 %596 }
 0x1b4   :  { %v603_v26 = vadd.f32 %v597_v2, %v341_v56 }
 0x1b5   :  { %v582_v1 = vpop.xlane.xlu0 %581 }
 0x1b6   :  { %v584_v23 = vadd.f32 %v582_v1, %v326_v53 }
 0x1b9   :  { %v602_v7 = vpop.xlane.xlu0 %601 }
 0x1ba   :  { %v604_v41 = vadd.f32 %v602_v7, %v346_v51  ;;  %v3899_v51 = vmov 1   ;;  %v4508_v7 = vld [vmem:[%s5543_s2] sm:$0xff] }
 0x1bb   :  { %3747 = vset.pattern.permute.xlu0 %v3899_v51 }
 0x1f2   :  { %v851_v10 = vpop.xlane.xlu1 %850 }
 0x1f3   :  { %v857_v24 = vadd.f32 %v851_v10, %v583_v18 }
 0x1f4   :  { %v856_v12 = vpop.xlane.xlu0 %855 }
 0x1f5   :  { %v858_v29 = vadd.f32 %v856_v12, %v584_v23 }
 0x1f6   :  { %v871_v17 = vpop.xlane.xlu1 %870 }
 0x1f7   :  { %v877_v45 = vadd.f32 %v871_v17, %v603_v26 }
 0x1f8   :  { %v876_v19 = vpop.xlane.xlu0 %875 }
 0x1f9   :  { %v878_v48 = vadd.f32 %v876_v19, %v604_v41 }
 0x212   :  { %v1159_v25 = vpop.xlane.xlu1 %1158 }
 0x213   :  { %v1165_v35 = vadd.f32 %v1159_v25, %v857_v24 }
 0x214   :  { %v1164_v36 = vpop.xlane.xlu0 %1163 }
 0x215   :  { %v1195_v46 = vmul.f32 0.00055555557, %v1165_v35  ;;  %v1166_v32 = vadd.f32 %v1164_v36, %v858_v29 }
 0x216   :  { %v1179_v39 = vpop.xlane.xlu1 %1178 }
 0x217   :  { %v1196_v49 = vmul.f32 0.00055555557, %v1166_v32  ;;  %v1185_v0 = vadd.f32 %v1179_v39, %v877_v45  ;;  %v1199_v4 = vmul.f32 %v1195_v46, %v1195_v46 }
 0x218   :  { %v1184_v61 = vpop.xlane.xlu0 %1183 }
 0x219   :  { %v1197_v60 = vmul.f32 0.00055555557, %v1185_v0  ;;  %v1186_v50 = vadd.f32 %v1184_v61, %v878_v48  ;;  %v1200_v54 = vmul.f32 %v1196_v49, %v1196_v49  ;;  %v4513_v61 = vld [vmem:[%s5543_s2 + $0x8] sm:$0xff] }
 0x21b   :  { %v1201_v53 = vsub.f32 %v1197_v60, %v1199_v4  ;;  %v1198_v1 = vmul.f32 0.00055555557, %v1186_v50 }
 0x21d   :  { %v1203_v10 = vadd.f32 1e-05, %v1201_v53  ;;  %v1202_v56 = vsub.f32 %v1198_v1, %v1200_v54 }
 0x21f   :  { %3850 = vrsqrt.f32 %v1203_v10  ;;  %v1204_v2 = vadd.f32 1e-05, %v1202_v56 }
 0x221   :  { %3852 = vrsqrt.f32 %v1204_v2 }
 0x229   :  { %v3851_v12 = vpop.eup %3850 }
 0x22a   :  { %v1207_v4 = vmul.f32 %v3851_v12, %v4508_v7 }
 0x22b   :  { %v3853_v60 = vpop.eup %3852 }
 0x22c   :  { %v1209_v17 = vmul.f32 %v1207_v4, %v1195_v46  ;;  %v1208_v18 = vmul.f32 %v3853_v60, %v4513_v61 }
 0x22e   :  { %1213 = vrot.lane.b32.xlu1 %v1209_v17, %s3900_s8  ;;  %v1210_v19 = vmul.f32 %v1208_v18, %v1196_v49 }
 0x230   :  { %1215 = vrot.lane.b32.xlu0 %v1210_v19, %s3900_s8 }
 0x232   :  { %1239 = vperm.xlu1 %3746, %v1207_v4  }
 0x236   :  { %1244 = vperm.xlu1 %3746, %v1208_v18  }
 0x23a   :  { %3748 = vset.pattern.permute.xlu1 %v3899_v51 }
 0x2a0   :  { %v1214_v23 = vpop.permute.xlu1 %1213 }
 0x2a1   :  { %v1219_v24 = vsub.f32 %v4508_v7, %v1214_v23 }
 0x2a2   :  { %v1216_v25 = vpop.permute.xlu0 %1215 }
 0x2a3   :  { %v1220_v26 = vsub.f32 %v4513_v61, %v1216_v25  ;;  %1257 = vperm.xlu0 %3747, %v1219_v24  }
 0x2a5   :  { %1262 = vperm.xlu1 %3748, %v1220_v26  }
 0x2b1   :  { %v1240_v29 = vpop.permute.xlu1 %1239 }
 0x2b2   :  { %v1249_v35 = vmul.f32 %v1240_v29, %v4328_v43  ;;  %v1248_v36 = vmul.f32 %v1240_v29, %v4334_v3  ;;  %v1250_v41 = vmul.f32 %v1240_v29, %v4345_v9  ;;  %v1247_v45 = vmul.f32 %v1240_v29, %v4326_v63 }
 0x2b3   :  { %v1340_v32 = vmul.f32 %v1240_v29, %v4444_v30  ;;  %v1338_v39 = vmul.f32 %v1240_v29, %v4420_v15  ;;  %v1423_v48 = vmul.f32 0.0, %v1240_v29  ;;  %v1337_v49 = vmul.f32 %v1240_v29, %v4417_v11 }
 0x2b4   :  { %v1339_v0 = vmul.f32 %v1240_v29, %v4433_v22  ;;  %v4532_v50 = vmul.f32 %v1240_v29, %v4378_v37  ;;  %v4535_v43 = vmul.f32 %v1240_v29, %v4464_v57  ;;  %v4538_v3 = vmul.f32 %v1240_v29, %v4387_v44 }
 0x2b5   :  { %v4525_v46 = vpop.permute.xlu1 %1244  ;;  %v4541_v63 = vmul.f32 %v1240_v29, %v4486_v20  ;;  %v4544_v9 = vmul.f32 %v1240_v29, %v4373_v34  ;;  %v4547_v15 = vmul.f32 %v1240_v29, %v4461_v55  ;;  %v4550_v11 = vmul.f32 %v1240_v29, %v4375_v27 }
 0x2b6   :  { %v1253_v37 = vmul.f32 %v4525_v46, %v4338_v6  ;;  %v1252_v22 = vmul.f32 %v4525_v46, %v4352_v13  ;;  %v1254_v44 = vmul.f32 %v4525_v46, %v4355_v14  ;;  %v1251_v30 = vmul.f32 %v4525_v46, %v4336_v5 }
 0x2b7   :  { %v1344_v55 = vmul.f32 %v4525_v46, %v4452_v38  ;;  %v1342_v27 = vmul.f32 %v4525_v46, %v4431_v21  ;;  %v1428_v57 = vmul.f32 0.0, %v4525_v46  ;;  %v1341_v6 = vmul.f32 %v4525_v46, %v4422_v16 }
 0x2b8   :  { %v1343_v5 = vmul.f32 %v4525_v46, %v4446_v31  ;;  %v1302_v20 = vmul.f32 %v4525_v46, %v4396_v47  ;;  %v4581_v53 = vmul.f32 %v4525_v46, %v4473_v8  ;;  %v1304_v16 = vmul.f32 %v4525_v46, %v4407_v52 }
 0x2b9   :  { %v4589_v47 = vmul.f32 %v4525_v46, %v4496_v33  ;;  %v1301_v10 = vmul.f32 %v4525_v46, %v4380_v28  ;;  %v1381_v8 = vmul.f32 %v4525_v46, %v4466_v58  ;;  %v4599_v52 = vmul.f32 %v4525_v46, %v4382_v40 }
 0x322   :  { %v4560_v34 = vpop.permute.xlu0 %1257 }
 0x323   :  { %v1267_v13 = vadd.f32 %v4560_v34, %v1249_v35  ;;  %v1266_v14 = vadd.f32 %v4560_v34, %v1248_v36  ;;  %v1268_v38 = vadd.f32 %v4560_v34, %v1250_v41  ;;  %v1265_v21 = vadd.f32 %v4560_v34, %v1247_v45 }
 0x324   :  { %v4575_v54 = vpop.permute.xlu1 %1262  ;;  %v1345_v25 = vadd.f32 %v1337_v49, %v4560_v34  ;;  %v1433_v40 = vadd.f32 %v1423_v48, %v4560_v34  ;;  %v1379_v35 = vmul.f32 %v1240_v29, %v4475_v42  ;;  %v4615_v36 = vadd.f32 %v1340_v32, %v4560_v34 }
 0x325   :  { %v1271_v1 = vadd.f32 %v4575_v54, %v1253_v37  ;;  %v1270_v31 = vadd.f32 %v4575_v54, %v1252_v22  ;;  %v1272_v56 = vadd.f32 %v4575_v54, %v1254_v44  ;;  %v1269_v2 = vadd.f32 %v4575_v54, %v1251_v30 }
 0x326   :  { %v1275_v51 = vmax.f32 %v1267_v13, 0.0  ;;  %v1274_v4 = vmax.f32 %v1266_v14, 0.0  ;;  %v1276_v33 = vmax.f32 %v1268_v38, 0.0  ;;  %v1273_v18 = vmax.f32 %v1265_v21, 0.0 }
 0x327   :  { %v1279_v12 = vmax.f32 %v1271_v1, 0.0  ;;  %v1278_v60 = vmax.f32 %v1270_v31, 0.0  ;;  %v1280_v17 = vmax.f32 %v1272_v56, 0.0  ;;  %v1277_v19 = vmax.f32 %v1269_v2, 0.0 }
 0x328   :  { %v1438_v24 = vadd.f32 %v1428_v57, %v4575_v54  ;;  %v1346_v41 = vadd.f32 %v1338_v39, %v4560_v34  ;;  %v1349_v45 = vadd.f32 %v1341_v6, %v4575_v54  ;;  %v4620_v49 = vadd.f32 %v1344_v55, %v4575_v54 }
 0x329   :  { %v4601_v28 = vpack.c.bf16 %v1279_v12, %v1275_v51  ;;  %v1282_v23 = vpack.c.bf16 %v1278_v60, %v1274_v4  ;;  %v4605_v58 = vpack.c.bf16 %v1280_v17, %v1276_v33  ;;  %v4607_v26 = vpack.c.bf16 %v1277_v19, %v1273_v18 }
 0x32a   :  { %v1448_v48 = vmax.f32 %v1438_v24, 0.0  ;;  %v1347_v42 = vadd.f32 %v1339_v0, %v4560_v34  ;;  %v1351_v29 = vadd.f32 %v1343_v5, %v4575_v54  ;;  %v1353_v37 = vmax.f32 %v1345_v25, 0.0 }
 0x32b   :  { %1463 = vrot.lane.b32.xlu0 %v4601_v28, %s3897_s19  ;;  %1461 = vrot.lane.b32.xlu1 %v1282_v23, %s3897_s19  ;;  %v1357_v22 = vmax.f32 %v1349_v45, 0.0  ;;  %v1306_v32 = vadd.f32 %v4532_v50, %v4560_v34  ;;  %v1310_v39 = vadd.f32 %v1302_v20, %v4575_v54  ;;  %v1350_v44 = vadd.f32 %v1342_v27, %v4575_v54 }
 0x32c   :  { %1570 = vmatprep.subr.bf16.mxu1 %v4605_v58  ;;  %1517 = vmatprep.subr.bf16.mxu0 %v1282_v23  ;;  %v1443_v30 = vmax.f32 %v1433_v40, 0.0  ;;  %v1355_v55 = vmax.f32 %v1347_v42, 0.0  ;;  %v1359_v57 = vmax.f32 %v1351_v29, 0.0  ;;  %v1308_v50 = vadd.f32 %v4538_v3, %v4560_v34 }
 0x32d   :  { %1518 = vmatpush1.bf16.msra.mxu0 %v4607_v26  ;;  %1571 = vmatpush1.bf16.msra.mxu1 %v4601_v28  ;;  %v4635_v0 = vpack.c.bf16 %v1357_v22, %v1353_v37  ;;  %v1314_v6 = vmax.f32 %v1306_v32, 0.0  ;;  %v1318_v13 = vmax.f32 %v1310_v39, 0.0  ;;  %v1356_v14 = vmax.f32 %v4615_v36, 0.0  ;;  %v4703_v22 = vld [vmem:[%s5542_s1 + $0x4] ss:$16 sps:$4 sm:$0xff]  }
 0x32e   :  { %v4640_v5 = vpack.c.bf16 %v1359_v57, %v1355_v55  ;;  %v1312_v27 = vadd.f32 %v1304_v16, %v4575_v54  ;;  %v1383_v20 = vmul.f32 %v4525_v46, %v4488_v62  ;;  %v1360_v38 = vmax.f32 %v4620_v49, 0.0 }
 0x32f   :  { %1465 = vrot.lane.b32.xlu0 %v4605_v58, %s3897_s19  ;;  %1459 = vrot.lane.b32.xlu1 %v4607_v26, %s3897_s19  ;;  %v1354_v21 = vmax.f32 %v1346_v41, 0.0  ;;  %v4646_v1 = vpack.c.bf16 %v1448_v48, %v1443_v30  ;;  %v1322_v31 = vpack.c.bf16 %v1318_v13, %v1314_v6  ;;  %v1316_v56 = vmax.f32 %v1308_v50, 0.0  ;;  %v3843_v50 = vld [vmem:[%s5542_s1 + $0x24] ss:$16 sps:$4 sm:$0xff]  }
 0x330   :  { %v1320_v2 = vmax.f32 %v1312_v27, 0.0  ;;  %v1305_v3 = vadd.f32 %v4544_v9, %v4560_v34  ;;  %v1309_v51 = vadd.f32 %v1301_v10, %v4575_v54  ;;  %v1358_v12 = vmax.f32 %v1350_v44, 0.0 }
 0x331   :  { %v1390_v62 = vadd.f32 %v4581_v53, %v4575_v54  ;;  %v1385_v46 = vadd.f32 %v4547_v15, %v4560_v34  ;;  %v1389_v16 = vadd.f32 %v1381_v8, %v4575_v54  ;;  %1519 = vmatprep.subr.bf16.mxu0 %v1322_v31  ;;  %v1307_v10 = vadd.f32 %v4550_v11, %v4560_v34 }
 0x332   :  { %v1324_v4 = vpack.c.bf16 %v1320_v2, %v1316_v56  ;;  %v1313_v60 = vmax.f32 %v1305_v3, 0.0  ;;  %v1317_v9 = vmax.f32 %v1309_v51, 0.0  ;;  %v1386_v33 = vadd.f32 %v4535_v43, %v4560_v34 }
 0x333   :  { %1851 = vrot.lane.b32.xlu0 %v1282_v23, %s3897_s19  ;;  %1467 = vrot.lane.b32.xlu1 %v4646_v1, %s3897_s19  ;;  %v1393_v17 = vmax.f32 %v1385_v46, 0.0  ;;  %v1397_v18 = vmax.f32 %v1389_v16, 0.0  ;;  %v1311_v53 = vadd.f32 %v4599_v52, %v4575_v54  ;;  %v1392_v15 = vadd.f32 %v4589_v47, %v4575_v54 }
 0x334   :  { %1572 = vmatprep.subr.bf16.mxu1 %v1324_v4  ;;  %v1321_v8 = vpack.c.bf16 %v1317_v9, %v1313_v60  ;;  %v1387_v19 = vadd.f32 %v1379_v35, %v4560_v34  ;;  %v1391_v23 = vadd.f32 %v1383_v20, %v4575_v54  ;;  %v1362_v24 = vpack.c.bf16 %v1358_v12, %v1354_v21 }
 0x335   :  { %v1401_v43 = vpack.c.bf16 %v1397_v18, %v1393_v17  ;;  %v1315_v11 = vmax.f32 %v1307_v10, 0.0  ;;  %v1319_v25 = vmax.f32 %v1311_v53, 0.0  ;;  %v1398_v52 = vmax.f32 %v1390_v62, 0.0 }
 0x336   :  { %v1388_v47 = vadd.f32 %v4541_v63, %v4560_v34  ;;  %1520 = vmatpush1.bf16.msra.mxu0 %v1321_v8  ;;  %v1395_v40 = vmax.f32 %v1387_v19, 0.0  ;;  %v1399_v36 = vmax.f32 %v1391_v23, 0.0  ;;  %v1364_v54 = vpack.c.bf16 %v1360_v38, %v1356_v14 }
 0x337   :  { %1849 = vrot.lane.b32.xlu0 %v4607_v26, %s3897_s19  ;;  %1853 = vrot.lane.b32.xlu1 %v4601_v28, %s3897_s19  ;;  %v1323_v35 = vpack.c.bf16 %v1319_v25, %v1315_v11  ;;  %v1394_v41 = vmax.f32 %v1386_v33, 0.0  ;;  %v1400_v45 = vmax.f32 %v1392_v15, 0.0  ;;  %v5554_v6 = vmov 0  }
 0x338   :  { %1521 = vmatprep.subr.bf16.mxu0 %v1362_v24  ;;  %v4675_v49 = vpack.c.bf16 %v1399_v36, %v1395_v40  ;;  %v1396_v26 = vmax.f32 %v1388_v47, 0.0  ;;  %v5555_v18 = vmov 0.0  }
 0x339   :  { %1573 = vmatpush1.bf16.msra.mxu1 %v1323_v35  ;;  %v1402_v28 = vpack.c.bf16 %v1398_v52, %v1394_v41  ;;  %v4745_v53 = vsel %vm1222_vm4, 1.0, %v5555_v18 }
 0x33a   :  { %1574 = vmatprep.subr.bf16.mxu1 %v1364_v54  ;;  %1522 = vmatpush1.bf16.msra.mxu0 %v4635_v0  ;;  %v1404_v63 = vpack.c.bf16 %v1400_v45, %v1396_v26 }
 0x33b   :  { %1857 = vrot.lane.b32.xlu0 %v4646_v1, %s3897_s19  ;;  %1855 = vrot.lane.b32.xlu1 %v4605_v58, %s3897_s19 }
 0x33c   :  { %1523 = vmatprep.subr.bf16.mxu0 %v1402_v28 }
 0x33d   :  { %1575 = vmatpush1.bf16.msra.mxu1 %v4640_v5 }
 0x33e   :  { %1576 = vmatprep.subr.bf16.mxu1 %v1404_v63  ;;  %1524 = vmatpush1.bf16.msra.mxu0 %v1401_v43 }
 0x33f   :  { %1925 = vrot.lane.b32.xlu0 %v1323_v35, %s3897_s19  ;;  %1923 = vrot.lane.b32.xlu1 %v1322_v31, %s3897_s19 }
 0x341   :  { %1577 = vmatpush1.bf16.msra.mxu1 %v4675_v49 }
 0x343   :  { %1927 = vrot.lane.b32.xlu0 %v1324_v4, %s3897_s19  ;;  %1921 = vrot.lane.b32.xlu1 %v1321_v8, %s3897_s19  ;;  %v5556_v8 = vld [vmem:[#allocation8_spill] sm:$0xff] }
 0x344   :  { %vm1224_vm5 = vcmp.lt.s32.totalorder %v5556_v8, 224 }
 0x345   :  { %v4758_v25 = vsel %vm1224_vm5, 1.0, %v5555_v18 }
 0x347   :  { %1995 = vrot.lane.b32.xlu0 %v1362_v24, %s3897_s19  ;;  %1929 = vrot.lane.b32.xlu1 %v4646_v1, %s3897_s19 }
 0x34b   :  { %1993 = vrot.lane.b32.xlu0 %v4635_v0, %s3897_s19  ;;  %1997 = vrot.lane.b32.xlu1 %v4640_v5, %s3897_s19 }
 0x34f   :  { %2001 = vrot.lane.b32.xlu0 %v4646_v1, %s3897_s19  ;;  %1999 = vrot.lane.b32.xlu1 %v1364_v54, %s3897_s19 }
 0x39d   :  { %v1464_v34 = vpop.permute.xlu0 %1463  ;;  %v1462_v58 = vpop.permute.xlu1 %1461 }
 0x39e   :  { %v1470_v48 = vsel %vm720_vm1, %v1462_v58, %v1464_v34 }
 0x39f   :  { %1525 = vmatprep.subr.bf16.mxu0 %v1470_v48 }
 0x3a1   :  { %v1466_v42 = vpop.permute.xlu0 %1465  ;;  %v1460_v29 = vpop.permute.xlu1 %1459 }
 0x3a2   :  { %v1469_v37 = vsel %vm720_vm1, %v1460_v29, %v1462_v58  ;;  %v1471_v30 = vsel %vm720_vm1, %v1464_v34, %v1466_v42 }
 0x3a3   :  { %1526 = vmatpush1.bf16.msra.mxu0 %v1469_v37 }
 0x3a4   :  { %2035 = vmatprep.subr.bf16.mxu0 %v1362_v24 }
 0x3a5   :  { %v1852_v32 = vpop.permute.xlu0 %1851  ;;  %v1468_v39 = vpop.permute.xlu1 %1467 }
 0x3a6   :  { %v1472_v44 = vsel %vm720_vm1, %v1466_v42, %v1468_v39  ;;  %3700 = vmatmul.mubr.msk.bf16.vlgmr.msra.gmra.mrb[16].mxu0 %vm219_vm0, %v4703_v22 }
 0x3a7   :  { %1578 = vmatprep.subr.bf16.mxu1 %v1472_v44  ;;  %2036 = vmatpush1.bf16.msra.mxu0 %v4635_v0 }
 0x3a8   :  { %1579 = vmatpush1.bf16.msra.mxu1 %v1471_v30  ;;  %2037 = vmatprep.subr.bf16.mxu0 %v1402_v28 }
 0x3a9   :  { %v1850_v55 = vpop.permute.xlu0 %1849  ;;  %v1854_v57 = vpop.permute.xlu1 %1853  ;;  %2088 = vmatprep.subr.bf16.mxu1 %v1364_v54  ;;  %1559 = vmatprep.mubr.bf16.mxu0 %v5554_v6 }
 0x3aa   :  { %v1860_v13 = vsel %vm720_vm1, %v1852_v32, %v1854_v57  ;;  %v1859_v14 = vsel %vm720_vm1, %v1850_v55, %v1852_v32 }
 0x3ab   :  { %2038 = vmatpush1.bf16.msra.mxu0 %v1401_v43  ;;  %3702 = vmatmul.mubr.msk.bf16.vlgmr.msra.gmra.mrb[16].mxu1 %vm219_vm0, %v4703_v22 }
 0x3ac   :  { %2039 = vmatprep.subr.bf16.mxu0 %v1860_v13  ;;  %2089 = vmatpush1.bf16.msra.mxu1 %v4640_v5 }
 0x3ad   :  { %v1858_v0 = vpop.permute.xlu0 %1857  ;;  %2090 = vmatprep.subr.bf16.mxu1 %v1404_v63  ;;  %1612 = vmatprep.mubr.bf16.mxu1 %v5554_v6  ;;  %v1856_v27 = vpop.permute.xlu1 %1855 }
 0x3ae   :  { %3701 = vmatmul.mubr.msk.bf16.gmra.mrb[20].mxu0 %vm219_vm0, %v3843_v50  ;;  %v1862_v20 = vsel %vm720_vm1, %v1856_v27, %v1858_v0  ;;  %v1861_v5 = vsel %vm720_vm1, %v1854_v57, %v1856_v27 }
 0x3af   :  { %2040 = vmatpush1.bf16.msra.mxu0 %v1859_v14  ;;  %2067 = vmatprep.mubr.bf16.mxu0 %v5554_v6 }
 0x3b0   :  { %2091 = vmatpush1.bf16.msra.mxu1 %v4675_v49 }
 0x3b1   :  { %v1926_v38 = vpop.permute.xlu0 %1925  ;;  %2092 = vmatprep.subr.bf16.mxu1 %v1862_v20  ;;  %v1924_v21 = vpop.permute.xlu1 %1923 }
 0x3b2   :  { %v1932_v1 = vsel %vm720_vm1, %v1924_v21, %v1926_v38 }
 0x3b3   :  { %3703 = vmatmul.mubr.msk.bf16.gmra.mrb[20].mxu1 %vm219_vm0, %v3843_v50  ;;  %2041 = vmatprep.subr.bf16.mxu0 %v1932_v1 }
 0x3b4   :  { %2093 = vmatpush1.bf16.msra.mxu1 %v1861_v5  ;;  %2120 = vmatprep.mubr.bf16.mxu1 %v5554_v6 }
 0x3b5   :  { %v1928_v31 = vpop.permute.xlu0 %1927  ;;  %v1922_v56 = vpop.permute.xlu1 %1921 }
 0x3b6   :  { %v1931_v2 = vsel %vm720_vm1, %v1922_v56, %v1924_v21  ;;  %v1933_v62 = vsel %vm720_vm1, %v1926_v38, %v1928_v31 }
 0x3b7   :  { %2042 = vmatpush1.bf16.msra.mxu0 %v1931_v2 }
 0x3b9   :  { %v1996_v3 = vpop.permute.xlu0 %1995  ;;  %v1930_v51 = vpop.permute.xlu1 %1929 }
 0x3ba   :  { %v1934_v12 = vsel %vm720_vm1, %v1928_v31, %v1930_v51 }
 0x3bb   :  { %2094 = vmatprep.subr.bf16.mxu1 %v1934_v12 }
 0x3bc   :  { %2095 = vmatpush1.bf16.msra.mxu1 %v1933_v62 }
 0x3bd   :  { %v1994_v46 = vpop.permute.xlu0 %1993  ;;  %v1998_v4 = vpop.permute.xlu1 %1997 }
 0x3be   :  { %v2003_v16 = vsel %vm720_vm1, %v1994_v46, %v1996_v3  ;;  %v2004_v60 = vsel %vm720_vm1, %v1996_v3, %v1998_v4 }
 0x3bf   :  { %2043 = vmatprep.subr.bf16.mxu0 %v2004_v60 }
 0x3c0   :  { %2044 = vmatpush1.bf16.msra.mxu0 %v2003_v16 }
 0x3c1   :  { %v2002_v9 = vpop.permute.xlu0 %2001  ;;  %v2000_v10 = vpop.permute.xlu1 %1999 }
 0x3c2   :  { %v2005_v33 = vsel %vm720_vm1, %v1998_v4, %v2000_v10  ;;  %v2006_v17 = vsel %vm720_vm1, %v2000_v10, %v2002_v9 }
 0x3c3   :  { %3704 = vmatmul.mubr.msk.bf16.vlgmr.msra.gmra.mrb[24].mxu0 %vm219_vm0, %v4703_v22  ;;  %2096 = vmatprep.subr.bf16.mxu1 %v2006_v17 }
 0x3c4   :  { %2097 = vmatpush1.bf16.msra.mxu1 %v2005_v33  ;;  %2077 = vmatprep.mubr.bf16.mxu0 %v5554_v6 }
 0x3c7   :  { %3706 = vmatmul.mubr.msk.bf16.vlgmr.msra.gmra.mrb[24].mxu1 %vm219_vm0, %v4703_v22 }
 0x3c8   :  { %2130 = vmatprep.mubr.bf16.mxu1 %v5554_v6 }
 0x3cb   :  { %3705 = vmatmul.mubr.msk.bf16.gmra.mrb[28].mxu0 %vm219_vm0, %v3843_v50 }
 0x3cf   :  { %3707 = vmatmul.mubr.msk.bf16.gmra.mrb[28].mxu1 %vm219_vm0, %v3843_v50 }
 0x479   :  { %v4747_v15 = vpop.f32.mrb[16].mxu0 }
 0x47a   :  { %v1553_v19 = vpop.f32.mrb[17].mxu0  ;;  %v1663_v43 = vmul.f32 %v4747_v15, %v4747_v15 }
 0x47b   :  { %v4751_v23 = vmul.f32 %v1553_v19, %v4745_v53  ;;  %v4753_v24 = vpop.f32.mrb[18].mxu0 }
 0x47c   :  { %v1557_v11 = vpop.f32.mrb[19].mxu0  ;;  %v1667_v40 = vmul.f32 %v4753_v24, %v4753_v24 }
 0x47d   :  { %v1639_v52 = vadd.f32 %v4751_v23, %v4747_v15  ;;  %v1664_v47 = vmul.f32 %v4751_v23, %v4751_v23  ;;  %v4767_v36 = vmul.f32 %v1557_v11, %v4745_v53 }
 0x47e   :  { %v4769_v35 = vpop.f32.mrb[16].mxu1 }
 0x47f   :  { %v1644_v54 = vadd.f32 %v4767_v36, %v4753_v24  ;;  %v1668_v41 = vmul.f32 %v4767_v36, %v4767_v36  ;;  %v1665_v45 = vmul.f32 %v4769_v35, %v4769_v35  ;;  %v1606_v49 = vpop.f32.mrb[17].mxu1  ;;  %v1640_v28 = vadd.f32 %v1639_v52, %v4769_v35 }
 0x480   :  { %v4779_v26 = vmul.f32 %v1606_v49, %v4758_v25  ;;  %v4781_v63 = vpop.f32.mrb[18].mxu1  ;;  %v1679_v34 = vadd.f32 %v1664_v47, %v1663_v43 }
 0x481   :  { %v1669_v58 = vmul.f32 %v4781_v63, %v4781_v63  ;;  %v1610_v48 = vpop.f32.mrb[19].mxu1  ;;  %v4785_v42 = vpop.f32.mrb[20].mxu0  ;;  %v1645_v29 = vadd.f32 %v1644_v54, %v4781_v63  ;;  %v1684_v37 = vadd.f32 %v1668_v41, %v1667_v40 }
 0x482   :  { %v4789_v22 = vmul.f32 %v1610_v48, %v4758_v25  ;;  %v1641_v32 = vadd.f32 %v1640_v28, %v4779_v26  ;;  %v1563_v39 = vpop.f32.mrb[21].mxu0  ;;  %v1666_v44 = vmul.f32 %v4779_v26, %v4779_v26  ;;  %v1680_v6 = vadd.f32 %v1679_v34, %v1665_v45 }
 0x483   :  { %v4795_v30 = vmul.f32 %v1563_v39, %v4745_v53  ;;  %v4797_v55 = vpop.f32.mrb[22].mxu0  ;;  %v1685_v57 = vadd.f32 %v1684_v37, %v1669_v58  ;;  %v1671_v13 = vmul.f32 %v4785_v42, %v4785_v42 }
 0x484   :  { %1642 = vadd.xlane.f32.xlu1 %v1641_v32  ;;  %v1646_v50 = vadd.f32 %v1645_v29, %v4789_v22  ;;  %v1567_v0 = vpop.f32.mrb[23].mxu0  ;;  %v1670_v14 = vmul.f32 %v4789_v22, %v4789_v22  ;;  %v1675_v38 = vmul.f32 %v4797_v55, %v4797_v55  ;;  %v1681_v31 = vadd.f32 %v1680_v6, %v1666_v44 }
 0x485   :  { %v1649_v27 = vadd.f32 %v4795_v30, %v4785_v42  ;;  %v1672_v20 = vmul.f32 %v4795_v30, %v4795_v30  ;;  %v4811_v21 = vmul.f32 %v1567_v0, %v4745_v53 }
 0x486   :  { %1647 = vadd.xlane.f32.xlu0 %v1646_v50  ;;  %v4813_v5 = vpop.f32.mrb[20].mxu1  ;;  %v1686_v1 = vadd.f32 %v1685_v57, %v1670_v14 }
 0x487   :  { %v1654_v56 = vadd.f32 %v4811_v21, %v4797_v55  ;;  %v1676_v2 = vmul.f32 %v4811_v21, %v4811_v21  ;;  %v1673_v3 = vmul.f32 %v4813_v5, %v4813_v5  ;;  %v1616_v51 = vpop.f32.mrb[21].mxu1  ;;  %v1650_v12 = vadd.f32 %v1649_v27, %v4813_v5 }
 0x488   :  { %v4823_v62 = vmul.f32 %v1616_v51, %v4758_v25  ;;  %1687 = vadd.xlane.f32.xlu1 %v1686_v1  ;;  %v4825_v46 = vpop.f32.mrb[22].mxu1  ;;  %v1689_v16 = vadd.f32 %v1672_v20, %v1671_v13 }
 0x489   :  { %v1677_v4 = vmul.f32 %v4825_v46, %v4825_v46  ;;  %v1620_v60 = vpop.f32.mrb[23].mxu1  ;;  %v1655_v9 = vadd.f32 %v1654_v56, %v4825_v46  ;;  %v1694_v10 = vadd.f32 %v1676_v2, %v1675_v38 }
 0x48a   :  { %1682 = vadd.xlane.f32.xlu0 %v1681_v31  ;;  %v4831_v33 = vmul.f32 %v1620_v60, %v4758_v25  ;;  %v1651_v17 = vadd.f32 %v1650_v12, %v4823_v62  ;;  %v1674_v19 = vmul.f32 %v4823_v62, %v4823_v62  ;;  %v1690_v43 = vadd.f32 %v1689_v16, %v1673_v3 }
 0x48b   :  { %v1695_v11 = vadd.f32 %v1694_v10, %v1677_v4 }
 0x48c   :  { %v1656_v52 = vadd.f32 %v1655_v9, %v4831_v33  ;;  %v1678_v47 = vmul.f32 %v4831_v33, %v4831_v33  ;;  %v1691_v40 = vadd.f32 %v1690_v43, %v1674_v19 }
 0x48e   :  { %1652 = vadd.xlane.f32.xlu0 %v1651_v17  ;;  %1657 = vadd.xlane.f32.xlu1 %v1656_v52  ;;  %v1696_v54 = vadd.f32 %v1695_v11, %v1678_v47 }
 0x492   :  { %1692 = vadd.xlane.f32.xlu0 %v1691_v40  ;;  %1697 = vadd.xlane.f32.xlu1 %v1696_v54 }
 0x496   :  { %v4839_v41 = vpop.f32.mrb[24].mxu0 }
 0x497   :  { %v2071_v45 = vpop.f32.mrb[25].mxu0  ;;  %v2181_v32 = vmul.f32 %v4839_v41, %v4839_v41 }
 0x498   :  { %v4842_v49 = vmul.f32 %v2071_v45, %v4745_v53  ;;  %v4844_v28 = vpop.f32.mrb[26].mxu0 }
 0x499   :  { %v2075_v34 = vpop.f32.mrb[27].mxu0  ;;  %v2185_v14 = vmul.f32 %v4844_v28, %v4844_v28 }
 0x49a   :  { %v2157_v58 = vadd.f32 %v4842_v49, %v4839_v41  ;;  %v2182_v48 = vmul.f32 %v4842_v49, %v4842_v49  ;;  %v4851_v29 = vmul.f32 %v2075_v34, %v4745_v53  ;;  %v4853_v37 = vpop.f32.mrb[24].mxu1 }
 0x49b   :  { %v2183_v39 = vmul.f32 %v4853_v37, %v4853_v37  ;;  %v2124_v44 = vpop.f32.mrb[25].mxu1 }
 0x49c   :  { %v2162_v57 = vadd.f32 %v4851_v29, %v4844_v28  ;;  %v2186_v6 = vmul.f32 %v4851_v29, %v4851_v29  ;;  %v4864_v13 = vmul.f32 %v2124_v44, %v4758_v25  ;;  %v4866_v50 = vpop.f32.mrb[26].mxu1  ;;  %v2158_v0 = vadd.f32 %v2157_v58, %v4853_v37 }
 0x49d   :  { %v2187_v27 = vmul.f32 %v4866_v50, %v4866_v50  ;;  %v2128_v20 = vpop.f32.mrb[27].mxu1  ;;  %v2197_v38 = vadd.f32 %v2182_v48, %v2181_v32 }
 0x49e   :  { %v4874_v1 = vmul.f32 %v2128_v20, %v4758_v25  ;;  %v4876_v31 = vpop.f32.mrb[28].mxu0  ;;  %v2159_v56 = vadd.f32 %v2158_v0, %v4864_v13  ;;  %v2163_v2 = vadd.f32 %v2162_v57, %v4866_v50  ;;  %v2184_v3 = vmul.f32 %v4864_v13, %v4864_v13 }
 0x49f   :  { %v2081_v51 = vpop.f32.mrb[29].mxu0  ;;  %v2198_v12 = vadd.f32 %v2197_v38, %v2183_v39  ;;  %v2202_v16 = vadd.f32 %v2186_v6, %v2185_v14  ;;  %v2189_v17 = vmul.f32 %v4876_v31, %v4876_v31 }
 0x4a0   :  { %v4883_v4 = vmul.f32 %v2081_v51, %v4745_v53  ;;  %2160 = vadd.xlane.f32.xlu0 %v2159_v56  ;;  %v4885_v60 = vpop.f32.mrb[30].mxu0  ;;  %v2164_v9 = vadd.f32 %v2163_v2, %v4874_v1  ;;  %v2188_v10 = vmul.f32 %v4874_v1, %v4874_v1 }
 0x4a1   :  { %v2085_v19 = vpop.f32.mrb[31].mxu0  ;;  %v2203_v43 = vadd.f32 %v2202_v16, %v2187_v27  ;;  %v2199_v54 = vadd.f32 %v2198_v12, %v2184_v3  ;;  %v2193_v45 = vmul.f32 %v4885_v60, %v4885_v60 }
 0x4a2   :  { %v2167_v11 = vadd.f32 %v4883_v4, %v4876_v31  ;;  %v2190_v52 = vmul.f32 %v4883_v4, %v4883_v4  ;;  %v4897_v47 = vmul.f32 %v2085_v19, %v4745_v53  ;;  %v4899_v40 = vpop.f32.mrb[28].mxu1  ;;  %2165 = vadd.xlane.f32.xlu1 %v2164_v9 }
 0x4a3   :  { %v2191_v34 = vmul.f32 %v4899_v40, %v4899_v40  ;;  %v2134_v58 = vpop.f32.mrb[29].mxu1  ;;  %v2204_v48 = vadd.f32 %v2203_v43, %v2188_v10  ;;  %v3901_v10 = vmov 2  }
 0x4a4   :  { %v2172_v32 = vadd.f32 %v4897_v47, %v4885_v60  ;;  %v2194_v39 = vmul.f32 %v4897_v47, %v4897_v47  ;;  %v4910_v53 = vmul.f32 %v2134_v58, %v4758_v25  ;;  %v4912_v44 = vpop.f32.mrb[30].mxu1  ;;  %2200 = vadd.xlane.f32.xlu0 %v2199_v54  ;;  %v2168_v57 = vadd.f32 %v2167_v11, %v4899_v40 }
 0x4a5   :  { %v2195_v6 = vmul.f32 %v4912_v44, %v4912_v44  ;;  %v2138_v0 = vpop.f32.mrb[31].mxu1  ;;  %v2207_v14 = vadd.f32 %v2190_v52, %v2189_v17  ;;  %3749 = vset.pattern.permute.xlu1 %v3901_v10  ;;  %3750 = vset.pattern.permute.xlu0 %v3901_v10 }
 0x4a6   :  { %v4918_v27 = vmul.f32 %v2138_v0, %v4758_v25  ;;  %2205 = vadd.xlane.f32.xlu1 %v2204_v48  ;;  %v2169_v20 = vadd.f32 %v2168_v57, %v4910_v53  ;;  %v2173_v38 = vadd.f32 %v2172_v32, %v4912_v44  ;;  %v2192_v56 = vmul.f32 %v4910_v53, %v4910_v53 }
 0x4a7   :  { %v2208_v2 = vadd.f32 %v2207_v14, %v2191_v34  ;;  %v2212_v3 = vadd.f32 %v2194_v39, %v2193_v45 }
 0x4a8   :  { %2170 = vadd.xlane.f32.xlu0 %v2169_v20  ;;  %v2174_v51 = vadd.f32 %v2173_v38, %v4918_v27  ;;  %v2196_v12 = vmul.f32 %v4918_v27, %v4918_v27 }
 0x4a9   :  { %v2209_v16 = vadd.f32 %v2208_v2, %v2192_v56  ;;  %v2213_v9 = vadd.f32 %v2212_v3, %v2195_v6 }
 0x4aa   :  { %2175 = vadd.xlane.f32.xlu1 %v2174_v51 }
 0x4ab   :  { %v2214_v25 = vadd.f32 %v2213_v9, %v2196_v12 }
 0x4ac   :  { %2210 = vadd.xlane.f32.xlu0 %v2209_v16 }
 0x4ae   :  { %2215 = vadd.xlane.f32.xlu1 %v2214_v25 }
 0x511   :  { %v1643_v19 = vpop.xlane.xlu1 %1642 }
 0x513   :  { %v1648_v17 = vpop.xlane.xlu0 %1647 }
 0x515   :  { %v1688_v11 = vpop.xlane.xlu1 %1687 }
 0x517   :  { %v1683_v43 = vpop.xlane.xlu0 %1682 }
 0x51b   :  { %v1653_v52 = vpop.xlane.xlu0 %1652  ;;  %v1658_v54 = vpop.xlane.xlu1 %1657 }
 0x51f   :  { %v1693_v45 = vpop.xlane.xlu0 %1692  ;;  %v1698_v34 = vpop.xlane.xlu1 %1697 }
 0x52d   :  { %v2161_v58 = vpop.xlane.xlu0 %2160 }
 0x52e   :  { %v2177_v48 = vadd.f32 %v2161_v58, %v1643_v19 }
 0x52f   :  { %v2166_v32 = vpop.xlane.xlu1 %2165 }
 0x530   :  { %v2237_v39 = vmul.f32 0.0011160715, %v2177_v48  ;;  %v2178_v57 = vadd.f32 %v2166_v32, %v1648_v17 }
 0x531   :  { %v2201_v6 = vpop.xlane.xlu0 %2200 }
 0x532   :  { %v2238_v0 = vmul.f32 0.0011160715, %v2178_v57  ;;  %v2217_v14 = vadd.f32 %v2201_v6, %v1683_v43  ;;  %v2245_v38 = vmul.f32 %v2237_v39, %v2237_v39 }
 0x533   :  { %v2206_v20 = vpop.xlane.xlu1 %2205 }
 0x534   :  { %v2241_v56 = vmul.f32 0.0011160715, %v2217_v14  ;;  %v2218_v2 = vadd.f32 %v2206_v20, %v1688_v11  ;;  %v2246_v51 = vmul.f32 %v2238_v0, %v2238_v0 }
 0x535   :  { %v2171_v3 = vpop.xlane.xlu0 %2170 }
 0x536   :  { %v2249_v12 = vsub.f32 %v2241_v56, %v2245_v38  ;;  %v2242_v16 = vmul.f32 0.0011160715, %v2218_v2  ;;  %v2179_v9 = vadd.f32 %v2171_v3, %v1653_v52 }
 0x537   :  { %v2176_v25 = vpop.xlane.xlu1 %2175 }
 0x538   :  { %v2253_v10 = vadd.f32 1e-05, %v2249_v12  ;;  %v2250_v8 = vsub.f32 %v2242_v16, %v2246_v51  ;;  %v2180_v18 = vadd.f32 %v2176_v25, %v1658_v54  ;;  %v2239_v19 = vmul.f32 0.0011160715, %v2179_v9  ;;  %v4939_v12 = vld [vmem:[%s5543_s2 + $0x18] sm:$0xff] }
 0x539   :  { %v2211_v58 = vpop.xlane.xlu0 %2210 }
 0x53a   :  { %3854 = vrsqrt.f32 %v2253_v10  ;;  %v2254_v17 = vadd.f32 1e-05, %v2250_v8  ;;  %v2240_v48 = vmul.f32 0.0011160715, %v2180_v18  ;;  %v2219_v32 = vadd.f32 %v2211_v58, %v1693_v45 }
 0x53b   :  { %v2216_v43 = vpop.xlane.xlu1 %2215  ;;  %v2247_v6 = vmul.f32 %v2239_v19, %v2239_v19  ;;  %v3902_v58 = vmov 3  }
 0x53c   :  { %3856 = vrsqrt.f32 %v2254_v17  ;;  %v2220_v57 = vadd.f32 %v2216_v43, %v1698_v34  ;;  %v2243_v11 = vmul.f32 0.0011160715, %v2219_v32  ;;  %v2248_v14 = vmul.f32 %v2240_v48, %v2240_v48  ;;  %v4934_v34 = vld [vmem:[%s5543_s2 + $0x10] sm:$0xff] }
 0x53e   :  { %v2244_v20 = vmul.f32 0.0011160715, %v2220_v57  ;;  %v2251_v38 = vsub.f32 %v2243_v11, %v2247_v6 }
 0x540   :  { %v2252_v56 = vsub.f32 %v2244_v20, %v2248_v14  ;;  %v2255_v52 = vadd.f32 1e-05, %v2251_v38 }
 0x542   :  { %v2256_v2 = vadd.f32 1e-05, %v2252_v56  ;;  %3858 = vrsqrt.f32 %v2255_v52 }
 0x544   :  { %v3855_v3 = vpop.eup %3854  ;;  %3860 = vrsqrt.f32 %v2256_v2 }
 0x545   :  { %v2261_v54 = vmul.f32 %v3855_v3, %v4508_v7 }
 0x546   :  { %v3857_v51 = vpop.eup %3856 }
 0x547   :  { %v2265_v8 = vmul.f32 %v2261_v54, %v2237_v39  ;;  %v2262_v18 = vmul.f32 %v3857_v51, %v4513_v61 }
 0x549   :  { %2273 = vrot.lane.b32.xlu0 %v2265_v8, %s3900_s8  ;;  %v2266_v45 = vmul.f32 %v2262_v18, %v2238_v0 }
 0x54b   :  { %2275 = vrot.lane.b32.xlu1 %v2266_v45, %s3900_s8 }
 0x54c   :  { %v3859_v16 = vpop.eup %3858 }
 0x54d   :  { %v2263_v39 = vmul.f32 %v3859_v16, %v4934_v34 }
 0x54e   :  { %v3861_v9 = vpop.eup %3860 }
 0x54f   :  { %v2264_v25 = vmul.f32 %v3861_v9, %v4939_v12  ;;  %v2267_v10 = vmul.f32 %v2263_v39, %v2239_v19 }
 0x551   :  { %v2268_v0 = vmul.f32 %v2264_v25, %v2240_v48  ;;  %2277 = vrot.lane.b32.xlu1 %v2267_v10, %s3900_s8 }
 0x553   :  { %2279 = vrot.lane.b32.xlu0 %v2268_v0, %s3900_s8 }
 0x555   :  { %2315 = vperm.xlu1 %3749, %v2261_v54  }
 0x557   :  { %2320 = vperm.xlu0 %3750, %v2262_v18  }
 0x559   :  { %2330 = vperm.xlu1 %3749, %v2264_v25  }
 0x55b   :  { %2325 = vperm.xlu0 %3750, %v2263_v39  }
 0x55d   :  { %3751 = vset.pattern.permute.xlu1 %v3902_v58 }
 0x55f   :  { %3752 = vset.pattern.permute.xlu0 %v3902_v58 }
 0x5bb   :  { %v2274_v17 = vpop.permute.xlu0 %2273 }
 0x5bc   :  { %v2285_v32 = vsub.f32 %v4508_v7, %v2274_v17 }
 0x5bd   :  { %v2276_v43 = vpop.permute.xlu1 %2275 }
 0x5be   :  { %2351 = vperm.xlu1 %3751, %v2285_v32   ;;  %v2286_v57 = vsub.f32 %v4513_v61, %v2276_v43 }
 0x5c2   :  { %2356 = vperm.xlu1 %3751, %v2286_v57  }
 0x5c3   :  { %v2278_v19 = vpop.permute.xlu1 %2277 }
 0x5c4   :  { %v2287_v48 = vsub.f32 %v4934_v34, %v2278_v19 }
 0x5c5   :  { %v2280_v6 = vpop.permute.xlu0 %2279 }
 0x5c6   :  { %v2288_v11 = vsub.f32 %v4939_v12, %v2280_v6  ;;  %2361 = vperm.xlu0 %3752, %v2287_v48  }
 0x5c8   :  { %2366 = vperm.xlu1 %3751, %v2288_v11  }
 0x5d4   :  { %v2316_v14 = vpop.permute.xlu1 %2315 }
 0x5d5   :  { %v2335_v38 = vmul.f32 %v2316_v14, %v4769_v35  ;;  %v2334_v56 = vmul.f32 %v2316_v14, %v4751_v23  ;;  %v2336_v2 = vmul.f32 %v2316_v14, %v4779_v26  ;;  %v2333_v3 = vmul.f32 %v2316_v14, %v4747_v15 }
 0x5d6   :  { %v2321_v20 = vpop.permute.xlu0 %2320  ;;  %v2521_v18 = vmul.f32 0.0, %v2316_v14  ;;  %v2435_v23 = vmul.f32 %v2316_v14, %v4853_v37 }
 0x5d7   :  { %v2339_v52 = vmul.f32 %v2321_v20, %v4781_v63  ;;  %v2338_v61 = vmul.f32 %v2321_v20, %v4767_v36  ;;  %v2340_v51 = vmul.f32 %v2321_v20, %v4789_v22  ;;  %v2337_v8 = vmul.f32 %v2321_v20, %v4753_v24 }
 0x5d8   :  { %v4951_v7 = vpop.permute.xlu1 %2330  ;;  %v2526_v35 = vmul.f32 0.0, %v2321_v20  ;;  %v2439_v45 = vmul.f32 %v2321_v20, %v4866_v50  ;;  %v2436_v63 = vmul.f32 %v2316_v14, %v4864_v13  ;;  %v2440_v36 = vmul.f32 %v2321_v20, %v4874_v1 }
 0x5d9   :  { %v4967_v26 = vmul.f32 %v4951_v7, %v4797_v55  ;;  %v4971_v15 = vmul.f32 %v4951_v7, %v4811_v21  ;;  %v2434_v24 = vmul.f32 %v2316_v14, %v4842_v49  ;;  %v2438_v22 = vmul.f32 %v2321_v20, %v4851_v29 }
 0x5da   :  { %v4957_v54 = vpop.permute.xlu0 %2325  ;;  %v4981_v50 = vmul.f32 %v4951_v7, %v4825_v46  ;;  %v4985_v55 = vmul.f32 %v4951_v7, %v4831_v33  ;;  %v5001_v33 = vmul.f32 %v4951_v7, %v4885_v60  ;;  %v5011_v1 = vmul.f32 %v4951_v7, %v4912_v44 }
 0x5db   :  { %v2341_v37 = vmul.f32 %v4957_v54, %v4785_v42  ;;  %v2342_v13 = vmul.f32 %v4957_v54, %v4795_v30  ;;  %v2343_v21 = vmul.f32 %v4957_v54, %v4813_v5  ;;  %v2344_v49 = vmul.f32 %v4957_v54, %v4823_v62 }
 0x5dc   :  { %v2441_v42 = vmul.f32 %v4957_v54, %v4876_v31  ;;  %v2442_v30 = vmul.f32 %v4957_v54, %v4883_v4  ;;  %v2443_v46 = vmul.f32 %v4957_v54, %v4899_v40  ;;  %v2444_v29 = vmul.f32 %v4957_v54, %v4910_v53 }
 0x5dd   :  { %v5005_v5 = vmul.f32 %v4951_v7, %v4897_v47  ;;  %v5015_v31 = vmul.f32 %v4951_v7, %v4918_v27  ;;  %v5018_v4 = vmul.f32 %v2316_v14, %v4839_v41  ;;  %v5021_v60 = vmul.f32 %v2321_v20, %v4844_v28 }
 0x63d   :  { %v5007_v62 = vpop.permute.xlu1 %2351 }
 0x63e   :  { %v2371_v40 = vadd.f32 %v5007_v62, %v2335_v38  ;;  %v2370_v47 = vadd.f32 %v5007_v62, %v2334_v56  ;;  %v2372_v53 = vadd.f32 %v5007_v62, %v2336_v2  ;;  %v2369_v16 = vadd.f32 %v5007_v62, %v2333_v3 }
 0x63f   :  { %v5028_v44 = vadd.f32 %v2521_v18, %v5007_v62  ;;  %v5031_v27 = vadd.f32 %v2435_v23, %v5007_v62  ;;  %v5034_v41 = vadd.f32 %v2436_v63, %v5007_v62  ;;  %v5037_v28 = vadd.f32 %v2434_v24, %v5007_v62 }
 0x640   :  { %v2387_v9 = vmax.f32 %v2371_v40, 0.0  ;;  %v2386_v39 = vmax.f32 %v2370_v47, 0.0  ;;  %v2388_v25 = vmax.f32 %v2372_v53, 0.0  ;;  %v2385_v10 = vmax.f32 %v2369_v16, 0.0 }
 0x641   :  { %v5039_v0 = vpop.permute.xlu1 %2356  ;;  %v2561_v58 = vmax.f32 %v5028_v44, 0.0  ;;  %v2467_v17 = vmax.f32 %v5031_v27, 0.0  ;;  %v2468_v32 = vmax.f32 %v5034_v41, 0.0  ;;  %v2466_v43 = vmax.f32 %v5037_v28, 0.0 }
 0x642   :  { %v2375_v57 = vadd.f32 %v5039_v0, %v2339_v52  ;;  %v2374_v19 = vadd.f32 %v5039_v0, %v2338_v61  ;;  %v2376_v48 = vadd.f32 %v5039_v0, %v2340_v51  ;;  %v2373_v6 = vadd.f32 %v5039_v0, %v2337_v8 }
 0x643   :  { %v5050_v11 = vadd.f32 %v2526_v35, %v5039_v0  ;;  %v5053_v14 = vadd.f32 %v2439_v45, %v5039_v0  ;;  %v5056_v20 = vadd.f32 %v2440_v36, %v5039_v0  ;;  %v5059_v38 = vadd.f32 %v2438_v22, %v5039_v0 }
 0x644   :  { %v2391_v56 = vmax.f32 %v2375_v57, 0.0  ;;  %v2390_v52 = vmax.f32 %v2374_v19, 0.0  ;;  %v2392_v2 = vmax.f32 %v2376_v48, 0.0  ;;  %v2389_v61 = vmax.f32 %v2373_v6, 0.0 }
 0x645   :  { %v2566_v3 = vmax.f32 %v5050_v11, 0.0  ;;  %v2471_v51 = vmax.f32 %v5053_v14, 0.0  ;;  %v2472_v8 = vmax.f32 %v5056_v20, 0.0  ;;  %v2470_v18 = vmax.f32 %v5059_v38, 0.0  ;;  %v5065_v35 = vpop.permute.xlu0 %2361 }
 0x646   :  { %v5067_v23 = vpack.c.bf16 %v2391_v56, %v2387_v9  ;;  %v5069_v45 = vpack.c.bf16 %v2390_v52, %v2386_v39  ;;  %v5071_v63 = vpack.c.bf16 %v2392_v2, %v2388_v25  ;;  %v5073_v36 = vpack.c.bf16 %v2389_v61, %v2385_v10 }
 0x647   :  { %v2377_v24 = vadd.f32 %v5065_v35, %v2341_v37  ;;  %v2378_v22 = vadd.f32 %v5065_v35, %v2342_v13  ;;  %v2379_v40 = vadd.f32 %v5065_v35, %v2343_v21  ;;  %v2380_v47 = vadd.f32 %v5065_v35, %v2344_v49  ;;  %v5083_v25 = vpop.permute.xlu1 %2366 }
 0x648   :  { %v2457_v53 = vadd.f32 %v2441_v42, %v5065_v35  ;;  %v2458_v16 = vadd.f32 %v2442_v30, %v5065_v35  ;;  %v2459_v9 = vadd.f32 %v2443_v46, %v5065_v35  ;;  %v2460_v39 = vadd.f32 %v2444_v29, %v5065_v35  ;;  %2601 = vrot.lane.b32.xlu0 %v5067_v23, %s3897_s19 }
 0x649   :  { %2411 = vst [vmem:[#allocation2 + $0x10] sm:$0xff] %v5067_v23  ;;  %2410 = vst [vmem:[#allocation2 + $0x8] sm:$0xff] %v5069_v45  ;;  %v2393_v37 = vmax.f32 %v2377_v24, 0.0  ;;  %v2394_v13 = vmax.f32 %v2378_v22, 0.0  ;;  %v2395_v21 = vmax.f32 %v2379_v40, 0.0  ;;  %v2396_v49 = vmax.f32 %v2380_v47, 0.0  ;;  %2599 = vrot.lane.b32.xlu1 %v5069_v45, %s3897_s19  ;;  %2995 = vmatprep.subr.bf16.mxu0 %v5069_v45 }
 0x64a   :  { %2412 = vst [vmem:[#allocation2 + $0x18] sm:$0xff] %v5071_v63  ;;  %2409 = vst [vmem:[#allocation2] sm:$0xff] %v5073_v36  ;;  %v2473_v42 = vmax.f32 %v2457_v53, 0.0  ;;  %v2474_v30 = vmax.f32 %v2458_v16, 0.0  ;;  %v2475_v46 = vmax.f32 %v2459_v9, 0.0  ;;  %v2476_v29 = vmax.f32 %v2460_v39, 0.0  ;;  %3048 = vmatprep.subr.bf16.mxu1 %v5071_v63  ;;  %2996 = vmatpush1.bf16.msra.mxu0 %v5073_v36 }
 0x64b   :  { %v2381_v10 = vadd.f32 %v5083_v25, %v4967_v26  ;;  %v2382_v57 = vadd.f32 %v5083_v25, %v4971_v15  ;;  %v2383_v19 = vadd.f32 %v5083_v25, %v4981_v50  ;;  %v2384_v48 = vadd.f32 %v5083_v25, %v4985_v55  ;;  %3049 = vmatpush1.bf16.msra.mxu1 %v5067_v23 }
 0x64c   :  { %v2461_v6 = vadd.f32 %v5001_v33, %v5083_v25  ;;  %v2462_v56 = vadd.f32 %v5005_v5, %v5083_v25  ;;  %v2463_v26 = vadd.f32 %v5011_v1, %v5083_v25  ;;  %v2464_v15 = vadd.f32 %v5015_v31, %v5083_v25  ;;  %2603 = vrot.lane.b32.xlu0 %v5071_v63, %s3897_s19 }
 0x64d   :  { %v2397_v50 = vmax.f32 %v2381_v10, 0.0  ;;  %v2398_v52 = vmax.f32 %v2382_v57, 0.0  ;;  %v2399_v55 = vmax.f32 %v2383_v19, 0.0  ;;  %v2400_v2 = vmax.f32 %v2384_v48, 0.0  ;;  %2597 = vrot.lane.b32.xlu1 %v5073_v36, %s3897_s19 }
 0x64e   :  { %v2477_v33 = vmax.f32 %v2461_v6, 0.0  ;;  %v2478_v61 = vmax.f32 %v2462_v56, 0.0  ;;  %v2479_v24 = vmax.f32 %v2463_v26, 0.0  ;;  %v2480_v5 = vmax.f32 %v2464_v15, 0.0 }
 0x64f   :  { %v5117_v22 = vpack.c.bf16 %v2397_v50, %v2393_v37  ;;  %v5119_v1 = vpack.c.bf16 %v2398_v52, %v2394_v13  ;;  %v5121_v40 = vpack.c.bf16 %v2399_v55, %v2395_v21  ;;  %v5123_v31 = vpack.c.bf16 %v2400_v2, %v2396_v49 }
 0x650   :  { %v2485_v47 = vpack.c.bf16 %v2477_v33, %v2473_v42  ;;  %v2486_v53 = vpack.c.bf16 %v2478_v61, %v2474_v30  ;;  %v2487_v16 = vpack.c.bf16 %v2479_v24, %v2475_v46  ;;  %v5125_v9 = vpack.c.bf16 %v2480_v5, %v2476_v29 }
 0x651   :  { %2413 = vst [vmem:[#allocation2 + $0x20] sm:$0xff] %v5117_v22  ;;  %2414 = vst [vmem:[#allocation2 + $0x28] sm:$0xff] %v5119_v1  ;;  %v2581_v39 = vpack.c.bf16 %v2566_v3, %v2561_v58  ;;  %v2483_v37 = vpack.c.bf16 %v2471_v51, %v2467_v17  ;;  %v2484_v13 = vpack.c.bf16 %v2472_v8, %v2468_v32  ;;  %2997 = vmatprep.subr.bf16.mxu0 %v5119_v1 }
 0x652   :  { %2415 = vst [vmem:[#allocation2 + $0x30] sm:$0xff] %v5121_v40  ;;  %2416 = vst [vmem:[#allocation2 + $0x38] sm:$0xff] %v5123_v31  ;;  %v2482_v21 = vpack.c.bf16 %v2470_v18, %v2466_v43  ;;  %3050 = vmatprep.subr.bf16.mxu1 %v5123_v31  ;;  %2998 = vmatpush1.bf16.msra.mxu0 %v5117_v22  ;;  %v2449_v44 = vadd.f32 %v5018_v4, %v5007_v62  ;;  %v2536_v62 = vmul.f32 0.0, %v4951_v7 }
 0x653   :  { %2493 = vst [vmem:[#allocation2 + $0x60] sm:$0xff] %v2485_v47  ;;  %2494 = vst [vmem:[#allocation2 + $0x68] sm:$0xff] %v2486_v53  ;;  %v2453_v27 = vadd.f32 %v5021_v60, %v5039_v0  ;;  %2605 = vrot.lane.b32.xlu1 %v2581_v39, %s3897_s19  ;;  %2745 = vrot.lane.b32.xlu0 %v2483_v37, %s3897_s19  ;;  %v2531_v4 = vmul.f32 0.0, %v4957_v54  ;;  %v3846_v54 = vld [vmem:[%s5542_s1 + $0xc] ss:$16 sps:$4 sm:$0xff]  }
 0x654   :  { %2495 = vst [vmem:[#allocation2 + $0x70] sm:$0xff] %v2487_v16  ;;  %2496 = vst [vmem:[#allocation2 + $0x78] sm:$0xff] %v5125_v9  ;;  %3051 = vmatpush1.bf16.msra.mxu1 %v5121_v40  ;;  %v2465_v41 = vmax.f32 %v2449_v44, 0.0  ;;  %2999 = vmatprep.subr.bf16.mxu0 %v2482_v21  ;;  %v2556_v60 = vadd.f32 %v2536_v62, %v5083_v25 }
 0x655   :  { %2491 = vst [vmem:[#allocation2 + $0x50] sm:$0xff] %v2483_v37  ;;  %2492 = vst [vmem:[#allocation2 + $0x58] sm:$0xff] %v2484_v13  ;;  %v2469_v28 = vmax.f32 %v2453_v27, 0.0  ;;  %3052 = vmatprep.subr.bf16.mxu1 %v2484_v13  ;;  %v2551_v0 = vadd.f32 %v2531_v4, %v5065_v35  ;;  %3712 = vmatprep.mubr.msk.bf16.mxu0 %vm2988_vm6, %v3846_v54 }
 0x656   :  { %2490 = vst [vmem:[#allocation2 + $0x48] sm:$0xff] %v2482_v21  ;;  %v2576_v17 = vmax.f32 %v2556_v60, 0.0  ;;  %3714 = vmatprep.mubr.msk.bf16.mxu1 %vm2988_vm6, %v3846_v54  ;;  %v5558_v54 = vld [vmem:[#allocation8_spill] sm:$0xff] }
 0x657   :  { %v2481_v58 = vpack.c.bf16 %v2469_v28, %v2465_v41  ;;  %2747 = vrot.lane.b32.xlu0 %v2484_v13, %s3897_s19  ;;  %2743 = vrot.lane.b32.xlu1 %v2482_v21, %s3897_s19  ;;  %v2571_v7 = vmax.f32 %v2551_v0, 0.0  ;;  %v3844_v41 = vld [vmem:[%s5542_s1 + $0x8] ss:$16 sps:$4 sm:$0xff]   ;;  %v3847_v28 = vld [vmem:[%s5542_s1 + $0x2c] ss:$16 sps:$4 sm:$0xff]   ;;  %vm2292_vm9 = vcmp.lt.s32.totalorder %v5558_v54, 222 }
 0x658   :  { %3053 = vmatpush1.bf16.msra.mxu1 %v2483_v37  ;;  %v3849_v0 = vld [vmem:[%s5542_s1 + $0x28] ss:$16 sps:$4 sm:$0xff]   ;;  %s3907_s1 = smov 123  }
 0x659   :  { %2489 = vst [vmem:[#allocation2 + $0x40] sm:$0xff] %v2481_v58  ;;  %3000 = vmatpush1.bf16.msra.mxu0 %v2481_v58  ;;  %3054 = vmatprep.subr.bf16.mxu1 %v5125_v9  ;;  %v2586_v32 = vpack.c.bf16 %v2576_v17, %v2571_v7  ;;  %v5557_v17 = vmov 0.0  }
 0x65a   :  { %3001 = vmatprep.subr.bf16.mxu0 %v2486_v53  ;;  %v2294_v7 = vsel %vm2290_vm8, 1.0, %v5557_v17 }
 0x65b   :  { %2889 = vrot.lane.b32.xlu0 %v5067_v23, %s3903_s17  ;;  %2741 = vrot.lane.b32.xlu1 %v2481_v58, %s3897_s19 }
 0x65c   :  { %3055 = vmatpush1.bf16.msra.mxu1 %v2487_v16 }
 0x65d   :  { %3002 = vmatpush1.bf16.msra.mxu0 %v2485_v47 }
 0x65f   :  { %2891 = vrot.lane.b32.xlu0 %v5071_v63, %s3903_s17  ;;  %2749 = vrot.lane.b32.xlu1 %v2581_v39, %s3897_s19 }
 0x663   :  { %2887 = vrot.lane.b32.xlu1 %v5069_v45, %s3903_s17  ;;  %2609 = vrot.lane.b32.xlu0 %v5119_v1, %s3897_s19 }
 0x667   :  { %2885 = vrot.lane.b32.xlu1 %v5073_v36, %s3903_s17  ;;  %2607 = vrot.lane.b32.xlu0 %v5117_v22, %s3897_s19 }
 0x66b   :  { %2893 = vrot.lane.b32.xlu1 %v2581_v39, %s3903_s17  ;;  %2615 = vrot.lane.b32.xlu0 %v2586_v32, %s3897_s19 }
 0x66f   :  { %2611 = vrot.lane.b32.xlu1 %v5121_v40, %s3897_s19  ;;  %2753 = vrot.lane.b32.xlu0 %v2486_v53, %s3897_s19 }
 0x673   :  { %2613 = vrot.lane.b32.xlu1 %v5123_v31, %s3897_s19  ;;  %2751 = vrot.lane.b32.xlu0 %v2485_v47, %s3897_s19 }
 0x677   :  { %2755 = vrot.lane.b32.xlu1 %v2487_v16, %s3897_s19  ;;  %2759 = vrot.lane.b32.xlu0 %v2586_v32, %s3897_s19 }
 0x67b   :  { %2757 = vrot.lane.b32.xlu1 %v5125_v9, %s3897_s19  ;;  %2897 = vrot.lane.b32.xlu0 %v5119_v1, %s3903_s17 }
 0x67f   :  { %2899 = vrot.lane.b32.xlu1 %v5121_v40, %s3903_s17  ;;  %2895 = vrot.lane.b32.xlu0 %v5117_v22, %s3903_s17 }
 0x683   :  { %2901 = vrot.lane.b32.xlu1 %v5123_v31, %s3903_s17  ;;  %2903 = vrot.lane.b32.xlu0 %v2586_v32, %s3903_s17 }
 0x6ba   :  { %v2602_v43 = vpop.permute.xlu0 %2601 }
 0x6bb   :  { %v2600_v11 = vpop.permute.xlu1 %2599 }
 0x6bc   :  { %v2618_v14 = vsel %vm720_vm1, %v2600_v11, %v2602_v43 }
 0x6bd   :  { %2634 = vst [vmem:[#allocation2 + $0x88] sm:$0xff] %v2618_v14  ;;  %3003 = vmatprep.subr.bf16.mxu0 %v2618_v14 }
 0x6be   :  { %v2604_v20 = vpop.permute.xlu0 %2603 }
 0x6bf   :  { %v2619_v38 = vsel %vm720_vm1, %v2602_v43, %v2604_v20  ;;  %v2598_v3 = vpop.permute.xlu1 %2597 }
 0x6c0   :  { %2635 = vst [vmem:[#allocation2 + $0x90] sm:$0xff] %v2619_v38  ;;  %v2617_v51 = vsel %vm720_vm1, %v2598_v3, %v2600_v11 }
 0x6c1   :  { %2633 = vst [vmem:[#allocation2 + $0x80] sm:$0xff] %v2617_v51  ;;  %3004 = vmatpush1.bf16.msra.mxu0 %v2617_v51 }
 0x6c5   :  { %v2746_v8 = vpop.permute.xlu0 %2745  ;;  %v2606_v18 = vpop.permute.xlu1 %2605 }
 0x6c6   :  { %v2620_v35 = vsel %vm720_vm1, %v2604_v20, %v2606_v18 }
 0x6c7   :  { %2636 = vst [vmem:[#allocation2 + $0x98] sm:$0xff] %v2620_v35  ;;  %3056 = vmatprep.subr.bf16.mxu1 %v2620_v35 }
 0x6c8   :  { %3057 = vmatpush1.bf16.msra.mxu1 %v2619_v38  ;;  %v2296_v38 = vsel %vm2292_vm9, 1.0, %v5557_v17 }
 0x6c9   :  { %v2748_v23 = vpop.permute.xlu0 %2747  ;;  %v2744_v45 = vpop.permute.xlu1 %2743 }
 0x6ca   :  { %v2763_v63 = vsel %vm720_vm1, %v2746_v8, %v2748_v23  ;;  %v2762_v36 = vsel %vm720_vm1, %v2744_v45, %v2746_v8 }
 0x6cd   :  { %v2890_v25 = vpop.permute.xlu0 %2889  ;;  %v2742_v49 = vpop.permute.xlu1 %2741 }
 0x6ce   :  { %v2761_v42 = vsel %vm720_vm1, %v2742_v49, %v2744_v45 }
 0x6d1   :  { %v2892_v30 = vpop.permute.xlu0 %2891  ;;  %v2750_v46 = vpop.permute.xlu1 %2749 }
 0x6d2   :  { %v2908_v29 = vsel %vm2905_vm7, %v2890_v25, %v2892_v30  ;;  %v2764_v10 = vsel %vm720_vm1, %v2748_v23, %v2750_v46 }
 0x6d5   :  { %v2610_v57 = vpop.permute.xlu0 %2609  ;;  %v2888_v19 = vpop.permute.xlu1 %2887 }
 0x6d6   :  { %v2907_v48 = vsel %vm2905_vm7, %v2888_v19, %v2890_v25 }
 0x6d9   :  { %v2608_v6 = vpop.permute.xlu0 %2607  ;;  %v2886_v56 = vpop.permute.xlu1 %2885 }
 0x6da   :  { %v2621_v26 = vsel %vm720_vm1, %v2608_v6, %v2610_v57  ;;  %v2906_v15 = vsel %vm2905_vm7, %v2886_v56, %v2888_v19 }
 0x6dd   :  { %v2616_v50 = vpop.permute.xlu0 %2615  ;;  %v2894_v52 = vpop.permute.xlu1 %2893 }
 0x6de   :  { %v2909_v55 = vsel %vm2905_vm7, %v2892_v30, %v2894_v52 }
 0x6e1   :  { %v2754_v2 = vpop.permute.xlu0 %2753  ;;  %v2612_v33 = vpop.permute.xlu1 %2611 }
 0x6e2   :  { %v2622_v61 = vsel %vm720_vm1, %v2610_v57, %v2612_v33 }
 0x6e3   :  { %3005 = vmatprep.subr.bf16.mxu0 %v2622_v61 }
 0x6e4   :  { %3006 = vmatpush1.bf16.msra.mxu0 %v2621_v26 }
 0x6e5   :  { %v2752_v24 = vpop.permute.xlu0 %2751  ;;  %v2614_v5 = vpop.permute.xlu1 %2613  ;;  %3007 = vmatprep.subr.bf16.mxu0 %v2762_v36 }
 0x6e6   :  { %v2765_v22 = vsel %vm720_vm1, %v2752_v24, %v2754_v2  ;;  %v2623_v1 = vsel %vm720_vm1, %v2612_v33, %v2614_v5  ;;  %v2624_v40 = vsel %vm720_vm1, %v2614_v5, %v2616_v50 }
 0x6e7   :  { %3058 = vmatprep.subr.bf16.mxu1 %v2624_v40 }
 0x6e8   :  { %3008 = vmatpush1.bf16.msra.mxu0 %v2761_v42  ;;  %3059 = vmatpush1.bf16.msra.mxu1 %v2623_v1 }
 0x6e9   :  { %v2760_v31 = vpop.permute.xlu0 %2759  ;;  %v2756_v47 = vpop.permute.xlu1 %2755  ;;  %3060 = vmatprep.subr.bf16.mxu1 %v2764_v10 }
 0x6ea   :  { %v2766_v53 = vsel %vm720_vm1, %v2754_v2, %v2756_v47 }
 0x6eb   :  { %3009 = vmatprep.subr.bf16.mxu0 %v2766_v53 }
 0x6ec   :  { %3010 = vmatpush1.bf16.msra.mxu0 %v2765_v22  ;;  %3061 = vmatpush1.bf16.msra.mxu1 %v2763_v63 }
 0x6ed   :  { %v2898_v16 = vpop.permute.xlu0 %2897  ;;  %v2758_v9 = vpop.permute.xlu1 %2757  ;;  %3011 = vmatprep.subr.bf16.mxu0 %v2907_v48 }
 0x6ee   :  { %v2767_v39 = vsel %vm720_vm1, %v2756_v47, %v2758_v9  ;;  %v2768_v37 = vsel %vm720_vm1, %v2758_v9, %v2760_v31 }
 0x6ef   :  { %3062 = vmatprep.subr.bf16.mxu1 %v2768_v37 }
 0x6f0   :  { %3012 = vmatpush1.bf16.msra.mxu0 %v2906_v15  ;;  %3063 = vmatpush1.bf16.msra.mxu1 %v2767_v39 }
 0x6f1   :  { %v2896_v13 = vpop.permute.xlu0 %2895  ;;  %v2900_v21 = vpop.permute.xlu1 %2899  ;;  %3064 = vmatprep.subr.bf16.mxu1 %v2909_v55 }
 0x6f2   :  { %v2910_v44 = vsel %vm2905_vm7, %v2896_v13, %v2898_v16  ;;  %v2911_v27 = vsel %vm2905_vm7, %v2898_v16, %v2900_v21 }
 0x6f3   :  { %3013 = vmatprep.subr.bf16.mxu0 %v2911_v27 }
 0x6f4   :  { %3014 = vmatpush1.bf16.msra.mxu0 %v2910_v44  ;;  %3065 = vmatpush1.bf16.msra.mxu1 %v2908_v29 }
 0x6f5   :  { %v2904_v58 = vpop.permute.xlu0 %2903  ;;  %v2902_v62 = vpop.permute.xlu1 %2901 }
 0x6f6   :  { %v2912_v4 = vsel %vm2905_vm7, %v2900_v21, %v2902_v62  ;;  %v2913_v60 = vsel %vm2905_vm7, %v2902_v62, %v2904_v58 }
 0x6f7   :  { %3028 = vmatmul.mubr.bf16.vlgmr.msra.gmra.mrb[32].mxu0 %v3844_v41  ;;  %3066 = vmatprep.subr.bf16.mxu1 %v2913_v60 }
 0x6f8   :  { %3067 = vmatpush1.bf16.msra.mxu1 %v2912_v4  ;;  %3713 = vmatprep.mubr.msk.bf16.mxu0 %vm2988_vm6, %v3847_v28 }
 0x6fb   :  { %3081 = vmatmul.mubr.bf16.vlgmr.msra.gmra.mrb[32].mxu1 %v3844_v41 }
 0x6fc   :  { %3715 = vmatprep.mubr.msk.bf16.mxu1 %vm2988_vm6, %v3847_v28 }
 0x6ff   :  { %3038 = vmatmul.mubr.bf16.gmra.mrb[36].mxu0 %v3849_v0 }
 0x703   :  { %3091 = vmatmul.mubr.bf16.gmra.mrb[36].mxu1 %v3849_v0 }
 0x7ca   :  { %v5242_v32 = vpop.f32.mrb[32].mxu0 }
 0x7cb   :  { %v3031_v43 = vpop.f32.mrb[33].mxu0  ;;  %v3137_v3 = vmul.f32 %v5242_v32, %v5242_v32 }
 0x7cc   :  { %v5245_v11 = vmul.f32 %v3031_v43, %v2294_v7  ;;  %v5247_v14 = vpop.f32.mrb[34].mxu0 }
 0x7cd   :  { %v3035_v20 = vpop.f32.mrb[35].mxu0  ;;  %v3141_v35 = vmul.f32 %v5247_v14, %v5247_v14 }
 0x7ce   :  { %v3117_v59 = vadd.f32 %v5245_v11, %v5242_v32  ;;  %v3138_v51 = vmul.f32 %v5245_v11, %v5245_v11  ;;  %v5256_v8 = vmul.f32 %v3035_v20, %v2294_v7  ;;  %v5258_v18 = vpop.f32.mrb[32].mxu1 }
 0x7cf   :  { %v3139_v23 = vmul.f32 %v5258_v18, %v5258_v18  ;;  %v3084_v45 = vpop.f32.mrb[33].mxu1 }
 0x7d0   :  { %v3153_v63 = vadd.f32 %v3138_v51, %v3137_v3  ;;  %v3122_v36 = vadd.f32 %v5256_v8, %v5247_v14  ;;  %v3142_v25 = vmul.f32 %v5256_v8, %v5256_v8  ;;  %v3118_v49 = vadd.f32 %v3117_v59, %v5258_v18  ;;  %v5269_v42 = vpop.f32.mrb[34].mxu1 }
 0x7d1   :  { %v5271_v30 = vmul.f32 %v3084_v45, %v2296_v38  ;;  %v3143_v46 = vmul.f32 %v5269_v42, %v5269_v42  ;;  %v3088_v29 = vpop.f32.mrb[35].mxu1 }
 0x7d2   :  { %v3158_v10 = vadd.f32 %v3142_v25, %v3141_v35  ;;  %v3154_v57 = vadd.f32 %v3153_v63, %v3139_v23  ;;  %v3123_v19 = vadd.f32 %v3122_v36, %v5269_v42  ;;  %v5276_v48 = vmul.f32 %v3088_v29, %v2296_v38  ;;  %v5278_v6 = vpop.f32.mrb[36].mxu0 }
 0x7d3   :  { %v3140_v56 = vmul.f32 %v5271_v30, %v5271_v30  ;;  %v3145_v26 = vmul.f32 %v5278_v6, %v5278_v6  ;;  %v3041_v15 = vpop.f32.mrb[37].mxu0  ;;  %v3119_v50 = vadd.f32 %v3118_v49, %v5271_v30 }
 0x7d4   :  { %v3159_v52 = vadd.f32 %v3158_v10, %v3143_v46  ;;  %v3144_v55 = vmul.f32 %v5276_v48, %v5276_v48  ;;  %v5287_v2 = vmul.f32 %v3041_v15, %v2294_v7  ;;  %v5289_v33 = vpop.f32.mrb[38].mxu0  ;;  %v3124_v61 = vadd.f32 %v3123_v19, %v5276_v48 }
 0x7d5   :  { %3120 = vadd.xlane.f32.xlu1 %v3119_v50  ;;  %v3045_v24 = vpop.f32.mrb[39].mxu0  ;;  %v3149_v1 = vmul.f32 %v5289_v33, %v5289_v33  ;;  %v3155_v16 = vadd.f32 %v3154_v57, %v3140_v56 }
 0x7d6   :  { %v3127_v5 = vadd.f32 %v5287_v2, %v5278_v6  ;;  %v3146_v22 = vmul.f32 %v5287_v2, %v5287_v2  ;;  %v5298_v40 = vmul.f32 %v3045_v24, %v2294_v7  ;;  %3125 = vadd.xlane.f32.xlu0 %v3124_v61  ;;  %v5300_v31 = vpop.f32.mrb[36].mxu1  ;;  %v3160_v9 = vadd.f32 %v3159_v52, %v3144_v55 }
 0x7d7   :  { %v3147_v47 = vmul.f32 %v5300_v31, %v5300_v31  ;;  %v3094_v53 = vpop.f32.mrb[37].mxu1 }
 0x7d8   :  { %v3163_v39 = vadd.f32 %v3146_v22, %v3145_v26  ;;  %v3132_v37 = vadd.f32 %v5298_v40, %v5289_v33  ;;  %v3150_v13 = vmul.f32 %v5298_v40, %v5298_v40  ;;  %v3128_v21 = vadd.f32 %v3127_v5, %v5300_v31  ;;  %v5309_v44 = vpop.f32.mrb[38].mxu1 }
 0x7d9   :  { %v5311_v27 = vmul.f32 %v3094_v53, %v2296_v38  ;;  %3156 = vadd.xlane.f32.xlu1 %v3155_v16  ;;  %v3151_v41 = vmul.f32 %v5309_v44, %v5309_v44  ;;  %v3098_v28 = vpop.f32.mrb[39].mxu1 }
 0x7da   :  { %v3168_v58 = vadd.f32 %v3150_v13, %v3149_v1  ;;  %v3164_v62 = vadd.f32 %v3163_v39, %v3147_v47  ;;  %v3133_v4 = vadd.f32 %v3132_v37, %v5309_v44  ;;  %v5316_v60 = vmul.f32 %v3098_v28, %v2296_v38  ;;  %3161 = vadd.xlane.f32.xlu0 %v3160_v9  ;;  %v3870_v37 = vld [vmem:[%s5543_s2] sm:$0xff] }
 0x7db   :  { %v3148_v0 = vmul.f32 %v5311_v27, %v5311_v27  ;;  %v3129_v17 = vadd.f32 %v3128_v21, %v5311_v27  ;;  %v3904_v38 = vmov 4   ;;  %v3871_v21 = vld [vmem:[%s5543_s2 + $0x8] sm:$0xff] }
 0x7dc   :  { %v3169_v7 = vadd.f32 %v3168_v58, %v3151_v41  ;;  %v3152_v54 = vmul.f32 %v5316_v60, %v5316_v60  ;;  %v3134_v43 = vadd.f32 %v3133_v4, %v5316_v60  ;;  %3753 = vset.pattern.permute.xlu1 %v3904_v38  ;;  %3754 = vset.pattern.permute.xlu0 %v3904_v38 }
 0x7dd   :  { %v3165_v20 = vadd.f32 %v3164_v62, %v3148_v0 }
 0x7de   :  { %3130 = vadd.xlane.f32.xlu0 %v3129_v17  ;;  %3135 = vadd.xlane.f32.xlu1 %v3134_v43  ;;  %v3170_v3 = vadd.f32 %v3169_v7, %v3152_v54  ;;  %v3905_v43 = vmov 5  }
 0x7e2   :  { %3166 = vadd.xlane.f32.xlu0 %v3165_v20  ;;  %3171 = vadd.xlane.f32.xlu1 %v3170_v3 }
 0x862   :  { %v3121_v59 = vpop.xlane.xlu1 %3120 }
 0x863   :  { %v3173_v51 = vmul.f32 0.0022522523, %v3121_v59  ;;  %v3126_v35 = vpop.xlane.xlu0 %3125 }
 0x864   :  { %v3174_v23 = vmul.f32 0.0022522523, %v3126_v35 }
 0x865   :  { %v3181_v63 = vmul.f32 %v3173_v51, %v3173_v51 }
 0x866   :  { %v3157_v45 = vpop.xlane.xlu1 %3156  ;;  %v3182_v49 = vmul.f32 %v3174_v23, %v3174_v23 }
 0x867   :  { %v3177_v36 = vmul.f32 0.0022522523, %v3157_v45  ;;  %v3162_v25 = vpop.xlane.xlu0 %3161 }
 0x868   :  { %v3178_v46 = vmul.f32 0.0022522523, %v3162_v25 }
 0x869   :  { %v3185_v29 = vsub.f32 %v3177_v36, %v3181_v63 }
 0x86a   :  { %v3186_v10 = vsub.f32 %v3178_v46, %v3182_v49 }
 0x86b   :  { %v3189_v57 = vadd.f32 1e-05, %v3185_v29  ;;  %v3131_v19 = vpop.xlane.xlu0 %3130  ;;  %v3136_v56 = vpop.xlane.xlu1 %3135 }
 0x86c   :  { %v3190_v26 = vadd.f32 1e-05, %v3186_v10  ;;  %v3175_v15 = vmul.f32 0.0022522523, %v3131_v19  ;;  %v3176_v50 = vmul.f32 0.0022522523, %v3136_v56 }
 0x86d   :  { %3862 = vrsqrt.f32 %v3189_v57 }
 0x86e   :  { %3864 = vrsqrt.f32 %v3190_v26  ;;  %v3183_v52 = vmul.f32 %v3175_v15, %v3175_v15  ;;  %v3184_v55 = vmul.f32 %v3176_v50, %v3176_v50 }
 0x86f   :  { %v3167_v61 = vpop.xlane.xlu0 %3166  ;;  %v3172_v24 = vpop.xlane.xlu1 %3171 }
 0x870   :  { %v3179_v5 = vmul.f32 0.0022522523, %v3167_v61  ;;  %v3180_v22 = vmul.f32 0.0022522523, %v3172_v24 }
 0x872   :  { %v3187_v1 = vsub.f32 %v3179_v5, %v3183_v52  ;;  %v3188_v47 = vsub.f32 %v3180_v22, %v3184_v55 }
 0x874   :  { %v3191_v53 = vadd.f32 1e-05, %v3187_v1  ;;  %v3192_v16 = vadd.f32 1e-05, %v3188_v47  ;;  %v3315_v47 = vld [vmem:[%s5544_s3 + $0x10] sm:$0xff] }
 0x876   :  { %3866 = vrsqrt.f32 %v3191_v53  ;;  %v3316_v53 = vld [vmem:[%s5544_s3 + $0x18] sm:$0xff] }
 0x877   :  { %v3863_v9 = vpop.eup %3862  ;;  %3868 = vrsqrt.f32 %v3192_v16 }
 0x878   :  { %v3865_v39 = vpop.eup %3864  ;;  %v3197_v13 = vmul.f32 %v3870_v37, %v3863_v9 }
 0x879   :  { %v3198_v41 = vmul.f32 %v3871_v21, %v3865_v39 }
 0x87a   :  { %v3201_v28 = vmul.f32 %v3197_v13, %v3173_v51 }
 0x87b   :  { %v3202_v58 = vmul.f32 %v3198_v41, %v3174_v23 }
 0x87c   :  { %3209 = vrot.lane.b32.xlu0 %v3201_v28, %s3900_s8 }
 0x87d   :  { %3211 = vrot.lane.b32.xlu1 %v3202_v58, %s3900_s8 }
 0x880   :  { %v3867_v62 = vpop.eup %3866 }
 0x881   :  { %v3869_v4 = vpop.eup %3868  ;;  %v3199_v0 = vmul.f32 %v3867_v62, %v4934_v34 }
 0x882   :  { %v3200_v17 = vmul.f32 %v3869_v4, %v4939_v12 }
 0x883   :  { %v3203_v7 = vmul.f32 %v3199_v0, %v3175_v15 }
 0x884   :  { %v3204_v54 = vmul.f32 %v3200_v17, %v3176_v50 }
 0x885   :  { %3213 = vrot.lane.b32.xlu1 %v3203_v7, %s3900_s8 }
 0x886   :  { %3215 = vrot.lane.b32.xlu0 %v3204_v54, %s3900_s8 }
 0x889   :  { %3227 = vperm.xlu1 %3753, %v3197_v13  }
 0x88a   :  { %3232 = vperm.xlu0 %3754, %v3198_v41  }
 0x88d   :  { %3237 = vperm.xlu1 %3753, %v3199_v0  }
 0x88e   :  { %3755 = vset.pattern.permute.xlu0 %v3905_v43 }
 0x891   :  { %3242 = vperm.xlu1 %3753, %v3200_v17  }
 0x895   :  { %3756 = vset.pattern.permute.xlu1 %v3905_v43 }
 0x8ee   :  { %v3210_v20 = vpop.permute.xlu0 %3209 }
 0x8ef   :  { %v3221_v3 = vsub.f32 %v3870_v37, %v3210_v20  ;;  %v3212_v38 = vpop.permute.xlu1 %3211 }
 0x8f0   :  { %v3222_v59 = vsub.f32 %v3871_v21, %v3212_v38 }
 0x8f1   :  { %3263 = vperm.xlu0 %3755, %v3221_v3  }
 0x8f2   :  { %3268 = vperm.xlu1 %3756, %v3222_v59  }
 0x8f7   :  { %v3214_v51 = vpop.permute.xlu1 %3213 }
 0x8f8   :  { %v3216_v35 = vpop.permute.xlu0 %3215  ;;  %v3223_v23 = vsub.f32 %v4934_v34, %v3214_v51 }
 0x8f9   :  { %v3224_v45 = vsub.f32 %v4939_v12, %v3216_v35 }
 0x8fa   :  { %3273 = vperm.xlu1 %3756, %v3223_v23   ;;  %v5401_v23 = vld [vmem:[%s5544_s3 + $0x28] sm:$0xff] }
 0x8fb   :  { %3278 = vperm.xlu0 %3755, %v3224_v45  }
 0x908   :  { %v3228_v63 = vpop.permute.xlu1 %3227 }
 0x909   :  { %v3233_v25 = vpop.permute.xlu0 %3232  ;;  %v3245_v46 = vmul.f32 %v3228_v63, %v5242_v32  ;;  %v3246_v29 = vmul.f32 %v3228_v63, %v5245_v11  ;;  %v3247_v10 = vmul.f32 %v3228_v63, %v5258_v18  ;;  %v3248_v57 = vmul.f32 %v3228_v63, %v5271_v30  ;;  %v3716_v32 = vld [vmem:[%s5544_s3 + $0x40] sm:$0xff]  ;;  %v3717_v18 = vld [vmem:[%s5544_s3 + $0x48] sm:$0xff] }
 0x90a   :  { %v3249_v34 = vmul.f32 %v3233_v25, %v5247_v14  ;;  %v3250_v12 = vmul.f32 %v3233_v25, %v5256_v8  ;;  %v3313_v14 = vld [vmem:[%s5544_s3] sm:$0xff]  ;;  %v3314_v8 = vld [vmem:[%s5544_s3 + $0x8] sm:$0xff]  ;;  %v3251_v13 = vmul.f32 %v3233_v25, %v5269_v42  ;;  %v3252_v0 = vmul.f32 %v3233_v25, %v5276_v48 }
 0x90c   :  { %v5338_v36 = vpop.permute.xlu1 %3237 }
 0x90d   :  { %v3253_v17 = vmul.f32 %v5338_v36, %v5278_v6  ;;  %v3254_v7 = vmul.f32 %v5338_v36, %v5287_v2 }
 0x910   :  { %v5340_v49 = vpop.permute.xlu1 %3242 }
 0x911   :  { %v3257_v42 = vmul.f32 %v5340_v49, %v5289_v33  ;;  %v3258_v54 = vmul.f32 %v5340_v49, %v5298_v40  ;;  %v5396_v40 = vld [vmem:[%s5544_s3 + $0x20] sm:$0xff] }
 0x970   :  { %v3264_v19 = vpop.permute.xlu0 %3263 }
 0x971   :  { %v3281_v56 = vadd.f32 %v3264_v19, %v3245_v46  ;;  %v3282_v26 = vadd.f32 %v3264_v19, %v3246_v29  ;;  %v3283_v15 = vadd.f32 %v3264_v19, %v3247_v10  ;;  %v3284_v50 = vadd.f32 %v3264_v19, %v3248_v57  ;;  %v3269_v52 = vpop.permute.xlu1 %3268  ;;  %v3724_v46 = vld [vmem:[%s5544_s3 + $0x80] sm:$0xff]  ;;  %v3725_v29 = vld [vmem:[%s5544_s3 + $0x88] sm:$0xff] }
 0x972   :  { %v3285_v55 = vadd.f32 %v3269_v52, %v3249_v34  ;;  %v3286_v11 = vadd.f32 %v3269_v52, %v3250_v12  ;;  %v3287_v43 = vadd.f32 %v3269_v52, %v3251_v13  ;;  %v3288_v3 = vadd.f32 %v3269_v52, %v3252_v0  ;;  %v5417_v10 = vld [vmem:[%s5544_s3 + $0x60] sm:$0xff]  ;;  %v5422_v57 = vld [vmem:[%s5544_s3 + $0x68] sm:$0xff]  ;;  %v3718_v13 = vld [vmem:[%s5544_s3 + $0x50] sm:$0xff] }
 0x973   :  { %v3297_v30 = vmax.f32 %v3281_v56, 0.0  ;;  %v3298_v61 = vmax.f32 %v3282_v26, 0.0  ;;  %v5360_v24 = vmax.f32 %v3283_v15, 0.0  ;;  %v5362_v5 = vmax.f32 %v3284_v50, 0.0 }
 0x974   :  { %v5364_v22 = vmax.f32 %v3285_v55, 0.0  ;;  %v5366_v1 = vmax.f32 %v3286_v11, 0.0  ;;  %v5424_v34 = vmax.f32 %v3287_v43, 0.0  ;;  %v5426_v12 = vmax.f32 %v3288_v3, 0.0 }
 0x975   :  { %v3403_v16 = vmul.f32 %v3716_v32, %v3297_v30  ;;  %v3404_v9 = vmul.f32 %v3717_v18, %v3298_v61  ;;  %v3322_v39 = vmul.f32 %v3313_v14, %v3297_v30  ;;  %v3323_v37 = vmul.f32 %v3314_v8, %v3298_v61 }
 0x976   :  { %v3358_v21 = vmul.f32 %v3313_v14, %v5360_v24  ;;  %v3359_v41 = vmul.f32 %v3314_v8, %v5362_v5  ;;  %v3324_v62 = vmul.f32 %v3315_v47, %v5364_v22  ;;  %v3325_v4 = vmul.f32 %v3316_v53, %v5366_v1  ;;  %v5443_v14 = vld [vmem:[%s5544_s3 + $0x70] sm:$0xff]  ;;  %v5448_v8 = vld [vmem:[%s5544_s3 + $0x78] sm:$0xff] }
 0x977   :  { %v3411_v28 = vadd.f32 %v3404_v9, %v3403_v16  ;;  %v3330_v58 = vadd.f32 %v3323_v37, %v3322_v39  ;;  %v3439_v6 = vmul.f32 %v3716_v32, %v5360_v24  ;;  %v3440_v33 = vmul.f32 %v3717_v18, %v5362_v5 }
 0x978   :  { %v3366_v2 = vadd.f32 %v3359_v41, %v3358_v21  ;;  %v3333_v35 = vadd.f32 %v3325_v4, %v3324_v62  ;;  %v3484_v50 = vmul.f32 %v3724_v46, %v3297_v30  ;;  %v3485_v52 = vmul.f32 %v3725_v29, %v3298_v61  ;;  %v3719_v21 = vld [vmem:[%s5544_s3 + $0x58] sm:$0xff] }
 0x979   :  { %3412 = vadd.xlane.f32.xlu0 %v3411_v28  ;;  %3331 = vadd.xlane.f32.xlu1 %v3330_v58  ;;  %v3274_v20 = vpop.permute.xlu1 %3273  ;;  %v3447_v15 = vadd.f32 %v3440_v33, %v3439_v6  ;;  %v3360_v61 = vmul.f32 %v3315_v47, %v5424_v34  ;;  %v3361_v16 = vmul.f32 %v3316_v53, %v5426_v12 }
 0x97a   :  { %v5388_v38 = vpop.permute.xlu0 %3278  ;;  %v3289_v48 = vadd.f32 %v3274_v20, %v3253_v17  ;;  %v3290_v59 = vadd.f32 %v3274_v20, %v3254_v7  ;;  %v3492_v30 = vadd.f32 %v3485_v52, %v3484_v50  ;;  %v3405_v53 = vmul.f32 %v3718_v13, %v5364_v22 }
 0x97b   :  { %v3293_v51 = vadd.f32 %v5388_v38, %v3257_v42  ;;  %v3294_v45 = vadd.f32 %v5388_v38, %v3258_v54  ;;  %v3369_v47 = vadd.f32 %v3361_v16, %v3360_v61  ;;  %v3406_v41 = vmul.f32 %v3719_v21, %v5366_v1 }
 0x97c   :  { %v5404_v63 = vmax.f32 %v3289_v48, 0.0  ;;  %v5406_v25 = vmax.f32 %v3290_v59, 0.0  ;;  %v3255_v28 = vmul.f32 %v5338_v36, %v5300_v31  ;;  %v3520_v62 = vmul.f32 %v3724_v46, %v5360_v24  ;;  %v3726_v31 = vld [vmem:[%s5544_s3 + $0x90] sm:$0xff]  ;;  %v3727_v24 = vld [vmem:[%s5544_s3 + $0x98] sm:$0xff] }
 0x97d   :  { %3367 = vadd.xlane.f32.xlu1 %v3366_v2  ;;  %3334 = vadd.xlane.f32.xlu0 %v3333_v35  ;;  %v5432_v26 = vmax.f32 %v3293_v51, 0.0  ;;  %v5434_v32 = vmax.f32 %v3294_v45, 0.0  ;;  %v3521_v4 = vmul.f32 %v3725_v29, %v5362_v5  ;;  %v3256_v0 = vmul.f32 %v5338_v36, %v5311_v27 }
 0x97e   :  { %v3326_v19 = vmul.f32 %v5396_v40, %v5404_v63  ;;  %v3327_v56 = vmul.f32 %v5401_v23, %v5406_v25  ;;  %v3407_v11 = vmul.f32 %v5417_v10, %v5404_v63  ;;  %v3408_v18 = vmul.f32 %v5422_v57, %v5406_v25 }
 0x97f   :  { %v3409_v39 = vmul.f32 %v5443_v14, %v5432_v26  ;;  %v3410_v37 = vmul.f32 %v5448_v8, %v5434_v32  ;;  %v3291_v17 = vadd.f32 %v3274_v20, %v3255_v28  ;;  %v3292_v7 = vadd.f32 %v3274_v20, %v3256_v0 }
 0x980   :  { %v3336_v55 = vadd.f32 %v3327_v56, %v3326_v19  ;;  %v3417_v9 = vadd.f32 %v3408_v18, %v3407_v11  ;;  %v3414_v42 = vadd.f32 %v3406_v41, %v3405_v53  ;;  %v3441_v54 = vmul.f32 %v3718_v13, %v5424_v34  ;;  %v3728_v11 = vld [vmem:[%s5544_s3 + $0xa0] sm:$0xff]  ;;  %v3729_v18 = vld [vmem:[%s5544_s3 + $0xa8] sm:$0xff] }
 0x981   :  { %3448 = vadd.xlane.f32.xlu1 %v3447_v15  ;;  %v3420_v58 = vadd.f32 %v3410_v37, %v3409_v39  ;;  %v3442_v43 = vmul.f32 %v3719_v21, %v5426_v12  ;;  %v3528_v3 = vadd.f32 %v3521_v4, %v3520_v62  ;;  %v3307_v27 = vmax.f32 %v3291_v17, 0.0  ;;  %v3730_v37 = vld [vmem:[%s5544_s3 + $0xb0] sm:$0xff] }
 0x982   :  { %3337 = vadd.xlane.f32.xlu0 %v3336_v55  ;;  %v3308_v36 = vmax.f32 %v3292_v7, 0.0  ;;  %v3486_v20 = vmul.f32 %v3726_v31, %v5364_v22  ;;  %v3487_v48 = vmul.f32 %v3727_v24, %v5366_v1  ;;  %v3259_v59 = vmul.f32 %v5340_v49, %v5309_v44  ;;  %v3319_v22 = vld [vmem:[%s5544_s3 + $0x30] sm:$0xff]  ;;  %v3320_v44 = vld [vmem:[%s5544_s3 + $0x38] sm:$0xff] }
 0x983   :  { %v3450_v5 = vadd.f32 %v3442_v43, %v3441_v54  ;;  %v3260_v6 = vmul.f32 %v5340_v49, %v5316_v60  ;;  %v3362_v33 = vmul.f32 %v5396_v40, %v3307_v27  ;;  %v3328_v46 = vmul.f32 %v3319_v22, %v5432_v26 }
 0x984   :  { %v3295_v51 = vadd.f32 %v5388_v38, %v3259_v59  ;;  %v3495_v35 = vadd.f32 %v3487_v48, %v3486_v20  ;;  %v3363_v45 = vmul.f32 %v5401_v23, %v3308_v36  ;;  %v3522_v56 = vmul.f32 %v3726_v31, %v5424_v34 }
 0x985   :  { %3493 = vadd.xlane.f32.xlu1 %v3492_v30  ;;  %v3296_v2 = vadd.f32 %v5388_v38, %v3260_v6  ;;  %v3329_v38 = vmul.f32 %v3320_v44, %v5434_v32  ;;  %v3523_v15 = vmul.f32 %v3727_v24, %v5426_v12  ;;  %v3443_v52 = vmul.f32 %v5417_v10, %v3307_v27 }
 0x986   :  { %3418 = vadd.xlane.f32.xlu0 %v3417_v9  ;;  %v3311_v60 = vmax.f32 %v3295_v51, 0.0  ;;  %v3372_v1 = vadd.f32 %v3363_v45, %v3362_v33  ;;  %v3444_v55 = vmul.f32 %v5422_v57, %v3308_v36  ;;  %v3488_v34 = vmul.f32 %v3728_v11, %v5404_v63  ;;  %v3731_v63 = vld [vmem:[%s5544_s3 + $0xb8] sm:$0xff] }
 0x987   :  { %v3312_v49 = vmax.f32 %v3296_v2, 0.0  ;;  %v3339_v40 = vadd.f32 %v3329_v38, %v3328_v46  ;;  %v3531_v50 = vadd.f32 %v3523_v15, %v3522_v56  ;;  %v3489_v12 = vmul.f32 %v3729_v18, %v5406_v25  ;;  %v3321_v15 = vld [vmem:[%s5543_s2] sm:$0x1] }
 0x988   :  { %v3364_v29 = vmul.f32 %v3319_v22, %v3311_v60  ;;  %v3453_v30 = vadd.f32 %v3444_v55, %v3443_v52  ;;  %v3524_v16 = vmul.f32 %v3728_v11, %v3307_v27  ;;  %v3525_v10 = vmul.f32 %v3729_v18, %v3308_v36 }
 0x989   :  { %3370 = vadd.xlane.f32.xlu1 %v3369_v47  ;;  %v3365_v23 = vmul.f32 %v3320_v44, %v3312_v49  ;;  %v3498_v61 = vadd.f32 %v3489_v12, %v3488_v34  ;;  %v3445_v9 = vmul.f32 %v5443_v14, %v3311_v60  ;;  %v3446_v39 = vmul.f32 %v5448_v8, %v3312_v49  ;;  %v3402_v34 = vld [vmem:[%s5543_s2 + $0x1] sm:$0x1] }
 0x98a   :  { %3421 = vadd.xlane.f32.xlu0 %v3420_v58  ;;  %v3534_v57 = vadd.f32 %v3525_v10, %v3524_v16  ;;  %v3490_v13 = vmul.f32 %v3730_v37, %v5432_v26  ;;  %v3491_v21 = vmul.f32 %v3731_v63, %v5434_v32  ;;  %v3526_v53 = vmul.f32 %v3730_v37, %v3311_v60 }
 0x98b   :  { %v3375_v19 = vadd.f32 %v3365_v23, %v3364_v29  ;;  %v3456_v25 = vadd.f32 %v3446_v39, %v3445_v9  ;;  %v3527_v14 = vmul.f32 %v3731_v63, %v3312_v49 }
 0x98c   :  { %v3501_v47 = vadd.f32 %v3491_v21, %v3490_v13 }
 0x98d   :  { %3415 = vadd.xlane.f32.xlu1 %v3414_v42  ;;  %v3537_v8 = vadd.f32 %v3527_v14, %v3526_v53 }
 0x98e   :  { %3529 = vadd.xlane.f32.xlu0 %v3528_v3 }
 0x991   :  { %3451 = vadd.xlane.f32.xlu1 %v3450_v5 }
 0x995   :  { %3496 = vadd.xlane.f32.xlu1 %v3495_v35 }
 0x999   :  { %3373 = vadd.xlane.f32.xlu1 %v3372_v1 }
 0x99d   :  { %3340 = vadd.xlane.f32.xlu1 %v3339_v40 }
 0x9a1   :  { %3376 = vadd.xlane.f32.xlu1 %v3375_v19 }
 0x9a5   :  { %3532 = vadd.xlane.f32.xlu1 %v3531_v50 }
 0x9a9   :  { %3454 = vadd.xlane.f32.xlu1 %v3453_v30 }
 0x9ad   :  { %3499 = vadd.xlane.f32.xlu1 %v3498_v61 }
 0x9b1   :  { %3535 = vadd.xlane.f32.xlu1 %v3534_v57 }
 0x9b5   :  { %3457 = vadd.xlane.f32.xlu1 %v3456_v25 }
 0x9b9   :  { %3502 = vadd.xlane.f32.xlu1 %v3501_v47 }
 0x9bd   :  { %3538 = vadd.xlane.f32.xlu1 %v3537_v8 }
 0xa06   :  { %v3332_v41 = vpop.xlane.xlu1 %3331  ;;  %v3413_v28 = vpop.xlane.xlu0 %3412 }
 0xa0a   :  { %v3368_v58 = vpop.xlane.xlu1 %3367  ;;  %v3335_v4 = vpop.xlane.xlu0 %3334 }
 0xa0b   :  { %v3342_v5 = vadd.f32 %v3335_v4, %v3332_v41 }
 0xa0e   :  { %v3449_v62 = vpop.xlane.xlu1 %3448 }
 0xa0f   :  { %v3338_v17 = vpop.xlane.xlu0 %3337 }
 0xa10   :  { %v3343_v20 = vadd.f32 %v3342_v5, %v3338_v17 }
 0xa12   :  { %v3494_v0 = vpop.xlane.xlu1 %3493 }
 0xa13   :  { %v3419_v42 = vpop.xlane.xlu0 %3418 }
 0xa16   :  { %v3371_v7 = vpop.xlane.xlu1 %3370 }
 0xa17   :  { %v3422_v3 = vpop.xlane.xlu0 %3421  ;;  %v3378_v6 = vadd.f32 %v3371_v7, %v3368_v58 }
 0xa1a   :  { %v3416_v54 = vpop.xlane.xlu1 %3415 }
 0xa1b   :  { %v3423_v26 = vadd.f32 %v3416_v54, %v3413_v28  ;;  %v3530_v21 = vpop.xlane.xlu0 %3529 }
 0xa1d   :  { %v3424_v43 = vadd.f32 %v3423_v26, %v3419_v42 }
 0xa1e   :  { %v3452_v32 = vpop.xlane.xlu1 %3451 }
 0xa1f   :  { %v3425_v31 = vadd.f32 %v3424_v43, %v3422_v3  ;;  %v3459_v57 = vadd.f32 %v3452_v32, %v3449_v62 }
 0xa21   :  { %v3426_v27 = vrot.slane %v3425_v31, 4 }
 0xa22   :  { %v3497_v24 = vpop.xlane.xlu1 %3496 }
 0xa23   :  { %v3427_v48 = vadd.f32 %v3426_v27, %v3425_v31  ;;  %v3504_v37 = vadd.f32 %v3497_v24, %v3494_v0  ;;  %v3483_v27 = vld [vmem:[%s5543_s2 + $0x2] sm:$0x1]  ;;  %s3909_s2 = smov [#allocation5]  }
 0xa24   :  { %s3561_s0 = sshll.u32 %s3909_s2, 4  ;;  %s3562_s0 = int_to_ptr.vmem [resolvable:$true] %s3561_s0 }
 0xa25   :  { %v3428_v2 = vrot.slane %v3427_v48, 2  ;;  %s3872_s29 = scalar_lea.vmem %s3562_s0, 32  ;;  %p3877_p1 = scmp.lt.s32.totalorder %s3562_s0, %s3562_s0 }
 0xa26   :  { %v3374_v36 = vpop.xlane.xlu1 %3373  ;;  %p3873_p0 = scmp.ne.s32.totalorder %s3562_s0, %s3872_s29  ;;  %p3878_p2 = scmp.lt.s32.totalorder %s3872_s29, %s3872_s29 }
 0xa27   :  { %v3379_v35 = vadd.f32 %v3378_v6, %v3374_v36  ;;  %v3429_v60 = vadd.f32 %v3428_v2, %v3427_v48 }
 0xa28   :  { %p3879_p3 = por %p3878_p2, %p3877_p1 }
 0xa29   :  { %v3430_v29 = vrot.slane %v3429_v60, 1 }
 0xa2a   :  { %v3341_v59 = vpop.xlane.xlu1 %3340  ;;  %p3880_p4 = pnand %p3879_p3, %p3873_p0 }
 0xa2b   :  { %v3344_v51 = vadd.f32 %v3343_v20, %v3341_v59  ;;  %v3431_v18 = vadd.f32 %v3430_v29, %v3429_v60 }
 0xa2d   :  { %v3345_v33 = vrot.slane %v3344_v51, 4  ;;  %v3432_v61 = vadd.f32 %v3431_v18, %v3402_v34 }
 0xa2e   :  { %v3377_v45 = vpop.xlane.xlu1 %3376 }
 0xa2f   :  { %v3346_v22 = vadd.f32 %v3345_v33, %v3344_v51  ;;  %v3380_v44 = vadd.f32 %v3379_v35, %v3377_v45 }
 0xa31   :  { %v3347_v49 = vrot.slane %v3346_v22, 2  ;;  %v3381_v1 = vrot.slane %v3380_v44, 4 }
 0xa32   :  { %v3533_v46 = vpop.xlane.xlu1 %3532 }
 0xa33   :  { %v3348_v38 = vadd.f32 %v3347_v49, %v3346_v22  ;;  %v3382_v40 = vadd.f32 %v3381_v1, %v3380_v44  ;;  %v3540_v53 = vadd.f32 %v3533_v46, %v3530_v21 }
 0xa35   :  { %v3349_v23 = vrot.slane %v3348_v38, 1  ;;  %v3383_v19 = vrot.slane %v3382_v40, 2 }
 0xa36   :  { %v3455_v56 = vpop.xlane.xlu1 %3454 }
 0xa37   :  { %v3350_v50 = vadd.f32 %v3349_v23, %v3348_v38  ;;  %v3384_v52 = vadd.f32 %v3383_v19, %v3382_v40  ;;  %v3460_v9 = vadd.f32 %v3459_v57, %v3455_v56 }
 0xa39   :  { %v3385_v55 = vrot.slane %v3384_v52, 1  ;;  %v3351_v11 = vadd.f32 %v3350_v50, %v3321_v15 }
 0xa3a   :  { %v3500_v30 = vpop.xlane.xlu1 %3499 }
 0xa3b   :  { %v3386_v12 = vadd.f32 %v3385_v55, %v3384_v52  ;;  %3353 = vrot.lane.b32.xlu0 %v3351_v11, %s3906_s25  ;;  %v3505_v25 = vadd.f32 %v3504_v37, %v3500_v30 }
 0xa3d   :  { %v3387_v16 = vadd.f32 %v3386_v12, %v3321_v15 }
 0xa3e   :  { %v3536_v10 = vpop.xlane.xlu1 %3535 }
 0xa3f   :  { %3434 = vrot.lane.b32.xlu0 %v3432_v61, %s3907_s1  ;;  %3389 = vrot.lane.b32.xlu1 %v3387_v16, %s3906_s25  ;;  %v3541_v41 = vadd.f32 %v3540_v53, %v3536_v10 }
 0xa42   :  { %v3458_v39 = vpop.xlane.xlu1 %3457 }
 0xa43   :  { %v3461_v63 = vadd.f32 %v3460_v9, %v3458_v39 }
 0xa45   :  { %v3462_v13 = vrot.slane %v3461_v63, 4 }
 0xa46   :  { %v3503_v47 = vpop.xlane.xlu1 %3502 }
 0xa47   :  { %v3463_v14 = vadd.f32 %v3462_v13, %v3461_v63  ;;  %v3506_v8 = vadd.f32 %v3505_v25, %v3503_v47 }
 0xa49   :  { %v3464_v28 = vrot.slane %v3463_v14, 2  ;;  %v3507_v58 = vrot.slane %v3506_v8, 4 }
 0xa4a   :  { %v3539_v4 = vpop.xlane.xlu1 %3538 }
 0xa4b   :  { %v3465_v62 = vadd.f32 %v3464_v28, %v3463_v14  ;;  %v3508_v17 = vadd.f32 %v3507_v58, %v3506_v8  ;;  %v3542_v7 = vadd.f32 %v3541_v41, %v3539_v4 }
 0xa4d   :  { %v3466_v42 = vrot.slane %v3465_v62, 1  ;;  %v3509_v54 = vrot.slane %v3508_v17, 2  ;;  %v3543_v26 = vrot.slane %v3542_v7, 4 }
 0xa4f   :  { %v3467_v43 = vadd.f32 %v3466_v42, %v3465_v62  ;;  %v3510_v0 = vadd.f32 %v3509_v54, %v3508_v17  ;;  %v3544_v32 = vadd.f32 %v3543_v26, %v3542_v7 }
 0xa51   :  { %v3511_v3 = vrot.slane %v3510_v0, 1  ;;  %v3545_v31 = vrot.slane %v3544_v32, 2  ;;  %v3468_v24 = vadd.f32 %v3467_v43, %v3402_v34 }
 0xa53   :  { %v3512_v36 = vadd.f32 %v3511_v3, %v3510_v0  ;;  %v3546_v5 = vadd.f32 %v3545_v31, %v3544_v32  ;;  %3470 = vrot.lane.b32.xlu0 %v3468_v24, %s3907_s1 }
 0xa55   :  { %v3547_v20 = vrot.slane %v3546_v5, 1  ;;  %v3513_v48 = vadd.f32 %v3512_v36, %v3483_v27 }
 0xa57   :  { %v3548_v59 = vadd.f32 %v3547_v20, %v3546_v5  ;;  %3515 = vrot.lane.b32.xlu1 %v3513_v48, %s3908_s28 }
 0xa59   :  { %v3549_v6 = vadd.f32 %v3548_v59, %v3483_v27 }
 0xa5b   :  { %3551 = vrot.lane.b32.xlu1 %v3549_v6, %s3908_s28 }
 0xaad   :  { %v3354_v51 = vpop.permute.xlu0 %3353 }
 0xaae   :  { %3357 = vst.msk [vmem:[#allocation5] sm:$0x1] %vm3356_vm10, %v3354_v51 }
 0xab1   :  { %v3435_v2 = vpop.permute.xlu0 %3434  ;;  %v3390_v35 = vpop.permute.xlu1 %3389 }
 0xab2   :  { %3438 = vst.msk [vmem:[#allocation5] sm:$0x1] %vm3437_vm11, %v3435_v2 }
 0xab3   :  { %3392 = vst.msk [vmem:[#allocation5 + $0x1] sm:$0x1] %vm3356_vm10, %v3390_v35 }
 0xac5   :  { %v3471_v33 = vpop.permute.xlu0 %3470 }
 0xac6   :  { %3473 = vst.msk [vmem:[#allocation5 + $0x1] sm:$0x1] %vm3437_vm11, %v3471_v33 }
 0xac9   :  { %v3516_v45 = vpop.permute.xlu1 %3515 }
 0xaca   :  { %3519 = vst.msk [vmem:[#allocation5] sm:$0x1] %vm3518_vm12, %v3516_v45 }
 0xacd   :  { %v3552_v22 = vpop.permute.xlu1 %3551 }
 0xace   :  { %3554 = vst.msk [vmem:[#allocation5 + $0x1] sm:$0x1] %vm3518_vm12, %v3552_v22 }
 0xacf   :  { %3883 = shalt.err (!%p3880_p4)
}
 0xad0   :  { %s3884_s6 = scalar_lea.hbm %s5545_s4, 32 }
 0xad1   :  { %p3885_p5 = scmp.ne.s32.totalorder %s5545_s4, %s3884_s6  ;;  %p3888_p6 = scmp.lt.u32.totalorder %s3884_s6, %s5545_s4 }
 0xad3   :  { %p3890_p7 = pnand %p3888_p6, %p3885_p5 }
 0xad5   :  { %3893 = shalt.err (!%p3890_p7)
}
 0xad6   :  { %3564 = dma.vmem_to_hbm [thread:$0]  %s3562_s0, 32, %s5545_s4, [#allocation6]  }
 0xad7   :  { %3894 = dma.done.wait [#allocation6], 32  }
 0xad8   :  { %3895 = vsyncadd [#allocation6], 4294967264 }
 0xad9   :  { %3568 = vsyncpa [#allocation6], 1 }

</bundles_post_ra>
